<compile_context>
chip_gen: v5e
topology: v5e:2x2
jax: 0.10.0
libtpu: 0.0.40
codegen_flags: <defaults>
</compile_context>

<pallas_src>
import functools

import jax
import jax.numpy as jnp
from jax import lax
from jax.experimental import pallas as pl
from jax.experimental.pallas import tpu as pltpu


def _qnet_kernel(x_ref, w1_ref, b1_ref, w2_ref, b2_ref, wf1_ref, bf1_ref,
                 wf_ref, bf_ref, o_ref, p1_ref, y1_ref, p2_ref, hin_ref, *,
                 C, WC, K1, S1, K2, S2, OH1, OW1, OH2, OW2, C1, C2,
                 blocked_conv1, BW1):
    """Fused forward for one image (one grid step = one batch element)."""

    # ---- conv1 im2col ----------------------------------------------------
    if blocked_conv1:
        # K1 == 2*S1: the image was pre-blocked host-side into
        # (H/S1, W/S1, S1*S1*C) row-major lanes.  Each conv1 patch is a 2x2
        # group of blocks; the two blocks sharing a block-row are contiguous,
        # so each patch is filled with two lane-dense 128-wide copies whose
        # destinations sit at lane offsets 0 and 128 (aligned).
        blk = S1 * S1 * C          # 64 lanes per block
        half = 2 * blk             # 128 lanes per adjacent block pair
        for oh in range(OH1):
            for ow in range(OW1):
                row = oh * OW1 + ow
                for di in range(2):
                    src = ((oh + di) * BW1 + ow) * blk
                    p1_ref[pl.ds(row, 1), pl.ds(di * half, half)] = (
                        x_ref[0, :, pl.ds(src, half)])
    else:
        # Generic fallback: one contiguous K1*C segment per kernel row.
        seg1 = K1 * C
        for oh in range(OH1):
            for ow in range(OW1):
                row = oh * OW1 + ow
                base = oh * S1 * WC + ow * S1 * C
                for kh in range(K1):
                    p1_ref[pl.ds(row, 1), pl.ds(kh * seg1, seg1)] = (
                        x_ref[0, :, pl.ds(base + kh * WC, seg1)])

    # ---- conv1 as a single GEMM (+ bias + ReLU), kept in VMEM -------------
    y1_ref[...] = jnp.maximum(
        jnp.dot(p1_ref[...], w1_ref[...], preferred_element_type=jnp.float32)
        + b1_ref[...], 0.0)

    # ---- conv2 im2col over the (OH1*OW1, C1) channels-last activations ----
    for oh in range(OH2):
        for ow in range(OW2):
            row = oh * OW2 + ow
            for dh in range(K2):
                for dw in range(K2):
                    src = (oh * S2 + dh) * OW1 + (ow * S2 + dw)
                    col = (dh * K2 + dw) * C1
                    p2_ref[pl.ds(row, 1), pl.ds(col, C1)] = y1_ref[pl.ds(src, 1), :]

    # ---- conv2 as a single GEMM (+ bias + ReLU) ----------------------------
    y2 = jnp.maximum(
        jnp.dot(p2_ref[...], w2_ref[...], preferred_element_type=jnp.float32)
        + b2_ref[...], 0.0)                                   # (OH2*OW2, C2)

    # ---- flatten (channels-last order; wf1 columns were permuted host-side) -
    for p in range(OH2 * OW2):
        hin_ref[:, pl.ds(p * C2, C2)] = y2[p:p + 1, :]

    # ---- final1 + ReLU, then final (output padded to a 128-lane dense store)
    h = jnp.maximum(
        jnp.dot(hin_ref[...], wf1_ref[...], preferred_element_type=jnp.float32)
        + bf1_ref[...], 0.0)
    o_ref[0] = (jnp.dot(h, wf_ref[...], preferred_element_type=jnp.float32)
                + bf_ref[...]).astype(o_ref.dtype)


def conv_qnet_forward(state_nhwc, params):
    """ConvQNet forward.  `state_nhwc` is (B, H, W, C) like the PyTorch input."""
    B, H, W, C = state_nhwc.shape
    w1, b1 = params["conv1"]
    w2, b2 = params["conv2"]
    wf1, bf1 = params["final1"]
    wf, bf = params["final"]

    C1, K1, S1 = w1.shape[0], w1.shape[2], 4      # Conv2d(C, 16, k=8, s=4)
    C2, K2, S2 = w2.shape[0], w2.shape[2], 2      # Conv2d(16, 32, k=4, s=2)
    OH1, OW1 = (H - K1) // S1 + 1, (W - K1) // S1 + 1
    OH2, OW2 = (OH1 - K2) // S2 + 1, (OW1 - K2) // S2 + 1
    lin = OH2 * OW2 * C2
    hidden = wf1.shape[0]
    n_actions = wf.shape[0]
    npad = -(-n_actions // 128) * 128             # lane-dense output width

    # Fast conv1 path: kernel == 2*stride and spatial dims divisible by stride.
    blocked = (K1 == 2 * S1) and (H % S1 == 0) and (W % S1 == 0)
    BH1, BW1 = H // S1, W // S1

    # ---- host-side weight / input repacking (layout plumbing, fused under jit)
    w1_hwio = jnp.transpose(w1, (2, 3, 1, 0))                 # (K1, K1, C, C1)
    if blocked:
        # Patch columns are ordered (di, dj, i, j, c) with kh = di*S1+i,
        # kw = dj*S1+j; permute the weight rows to match.
        w1k = w1_hwio.reshape(2, S1, 2, S1, C, C1)
        w1k = jnp.transpose(w1k, (0, 2, 1, 3, 4, 5)).reshape(K1 * K1 * C, C1)
        # Block the image into (H/S1, W/S1, S1*S1*C) and flatten per image.
        xb = state_nhwc.reshape(B, BH1, S1, BW1, S1, C)
        xb = jnp.transpose(xb, (0, 1, 3, 2, 4, 5))
        x_flat = xb.reshape(B, 1, H * W * C)
    else:
        w1k = w1_hwio.reshape(K1 * K1 * C, C1)
        x_flat = state_nhwc.reshape(B, 1, H * W * C)

    w2k = jnp.transpose(w2, (2, 3, 1, 0)).reshape(K2 * K2 * C1, C2)
    # PyTorch flattens NCHW -> (c, h, w); our in-kernel flatten is (h, w, c):
    # permute wf1's columns instead of transposing activations.
    wf1k = jnp.transpose(wf1.reshape(hidden, C2, OH2, OW2), (0, 2, 3, 1))
    wf1k = wf1k.reshape(hidden, lin).T                        # (lin, hidden)
    # final layer: pad N (=n_actions) to 128 so the only HBM store is lane-dense.
    wfk = jnp.zeros((hidden, npad), jnp.float32).at[:, :n_actions].set(wf.T)
    bfk = jnp.zeros((1, npad), jnp.float32).at[:, :n_actions].set(bf.reshape(1, -1))

    kernel = functools.partial(
        _qnet_kernel, C=C, WC=W * C, K1=K1, S1=S1, K2=K2, S2=S2,
        OH1=OH1, OW1=OW1, OH2=OH2, OW2=OW2, C1=C1, C2=C2,
        blocked_conv1=blocked, BW1=BW1)

    out_pad = pl.pallas_call(
        kernel,
        out_shape=jax.ShapeDtypeStruct((B, 1, npad), jnp.float32),
        grid=(B,),
        in_specs=[
            pl.BlockSpec((1, 1, H * W * C), lambda b: (b, 0, 0)),   # one image / step
            pl.BlockSpec((K1 * K1 * C, C1), lambda b: (0, 0)),      # conv1 weight
            pl.BlockSpec((1, C1), lambda b: (0, 0)),                # conv1 bias
            pl.BlockSpec((K2 * K2 * C1, C2), lambda b: (0, 0)),     # conv2 weight
            pl.BlockSpec((1, C2), lambda b: (0, 0)),                # conv2 bias
            pl.BlockSpec((lin, hidden), lambda b: (0, 0)),          # final1 weight
            pl.BlockSpec((1, hidden), lambda b: (0, 0)),            # final1 bias
            pl.BlockSpec((hidden, npad), lambda b: (0, 0)),         # final weight (pad)
            pl.BlockSpec((1, npad), lambda b: (0, 0)),              # final bias (pad)
        ],
        out_specs=pl.BlockSpec((1, 1, npad), lambda b: (b, 0, 0)),
        scratch_shapes=[
            pltpu.VMEM((OH1 * OW1, K1 * K1 * C), jnp.float32),      # conv1 im2col
            pltpu.VMEM((OH1 * OW1, C1), jnp.float32),               # relu(conv1)
            pltpu.VMEM((OH2 * OW2, K2 * K2 * C1), jnp.float32),     # conv2 im2col
            pltpu.VMEM((1, lin), jnp.float32),                      # flattened penult.
        ],
        compiler_params=pltpu.CompilerParams(
            dimension_semantics=("parallel",)),
    )(x_flat, w1k, b1.reshape(1, -1), w2k, b2.reshape(1, -1),
      wf1k, bf1.reshape(1, -1), wfk, bfk)

    return out_pad[:, 0, :n_actions]


def _reference_forward(state_nhwc, params):
    """Pure-XLA reference matching the PyTorch module exactly."""
    x = jnp.transpose(state_nhwc, (0, 3, 1, 2))
    w1, b1 = params["conv1"]
    y = lax.conv_general_dilated(x, w1, window_strides=(4, 4), padding="VALID",
                                 dimension_numbers=("NCHW", "OIHW", "NCHW"),
                                 precision=lax.Precision.HIGHEST)
    y = jnp.maximum(y + b1[None, :, None, None], 0.0)
    w2, b2 = params["conv2"]
    y = lax.conv_general_dilated(y, w2, window_strides=(2, 2), padding="VALID",
                                 dimension_numbers=("NCHW", "OIHW", "NCHW"),
                                 precision=lax.Precision.HIGHEST)
    y = jnp.maximum(y + b2[None, :, None, None], 0.0)
    flat = y.reshape(y.shape[0], -1)
    wf1, bf1 = params["final1"]
    h = jnp.maximum(jnp.dot(flat, wf1.T, precision=lax.Precision.HIGHEST) + bf1, 0.0)
    wf, bf = params["final"]
    return jnp.dot(h, wf.T, precision=lax.Precision.HIGHEST) + bf


if __name__ == "__main__":
    # H = W = 28, C = 4 -> conv1 out 6x6, conv2 out 2x2, lin_size = 2*2*32 = 128
    B, H, W, C = 2, 28, 28, 4
    n_actions = 6

    OH1, OW1 = (H - 8) // 4 + 1, (W - 8) // 4 + 1
    OH2, OW2 = (OH1 - 4) // 2 + 1, (OW1 - 4) // 2 + 1
    lin_size = OH2 * OW2 * 32

    key = jax.random.PRNGKey(0)
    ks = jax.random.split(key, 9)
    params = {
        "conv1": (0.05 * jax.random.normal(ks[0], (16, 4, 8, 8), jnp.float32),
                  0.05 * jax.random.normal(ks[1], (16,), jnp.float32)),
        "conv2": (0.05 * jax.random.normal(ks[2], (32, 16, 4, 4), jnp.float32),
                  0.05 * jax.random.normal(ks[3], (32,), jnp.float32)),
        "final1": (0.05 * jax.random.normal(ks[4], (256, lin_size), jnp.float32),
                   0.05 * jax.random.normal(ks[5], (256,), jnp.float32)),
        "final": (0.05 * jax.random.normal(ks[6], (n_actions, 256), jnp.float32),
                  0.05 * jax.random.normal(ks[7], (n_actions,), jnp.float32)),
    }
    state = jax.random.normal(ks[8], (B, H, W, C), jnp.float32)

    fwd = jax.jit(conv_qnet_forward)
    out = fwd(state, params)
    jax.block_until_ready(out)

    assert out.shape == (B, n_actions), out.shape
    assert out.dtype == jnp.float32

    ref = _reference_forward(state, params)
    err = float(jnp.max(jnp.abs(out - ref)))
    assert err < 5e-3, f"mismatch vs reference: max abs err = {err}"

    print("KERNEL_OK")
</pallas_src>

<mosaic_0001>
module attributes {stable_mosaic.version = 11 : i64} {
  func.func @_qnet_kernel(%arg0: i32, %arg1: memref<1x1x3136xf32, #tpu.memory_space<vmem>>, %arg2: memref<256x16xf32, #tpu.memory_space<vmem>>, %arg3: memref<1x16xf32, #tpu.memory_space<vmem>>, %arg4: memref<256x32xf32, #tpu.memory_space<vmem>>, %arg5: memref<1x32xf32, #tpu.memory_space<vmem>>, %arg6: memref<128x256xf32, #tpu.memory_space<vmem>>, %arg7: memref<1x256xf32, #tpu.memory_space<vmem>>, %arg8: memref<256x128xf32, #tpu.memory_space<vmem>>, %arg9: memref<1x128xf32, #tpu.memory_space<vmem>>, %arg10: memref<1x1x128xf32, #tpu.memory_space<vmem>>, %arg11: memref<36x256xf32, #tpu.memory_space<vmem>>, %arg12: memref<36x16xf32, #tpu.memory_space<vmem>>, %arg13: memref<4x256xf32, #tpu.memory_space<vmem>>, %arg14: memref<1x128xf32, #tpu.memory_space<vmem>>) attributes {dimension_semantics = [#tpu.dimension_semantics<parallel>], iteration_bounds = array<i64: 2>, scalar_prefetch = 0 : i64, scratch_operands = 4 : i64, tpu.core_type = #tpu.core_type<tc>, window_params = [{transform_indices = @transform_0, window_bounds = array<i64: 1, 1, 3136>}, {pipeline_mode = #tpu.pipeline_mode<synchronous>, transform_indices = @transform_1, window_bounds = array<i64: 256, 16>}, {pipeline_mode = #tpu.pipeline_mode<synchronous>, transform_indices = @transform_2, window_bounds = array<i64: 1, 16>}, {pipeline_mode = #tpu.pipeline_mode<synchronous>, transform_indices = @transform_3, window_bounds = array<i64: 256, 32>}, {pipeline_mode = #tpu.pipeline_mode<synchronous>, transform_indices = @transform_4, window_bounds = array<i64: 1, 32>}, {pipeline_mode = #tpu.pipeline_mode<synchronous>, transform_indices = @transform_5, window_bounds = array<i64: 128, 256>}, {pipeline_mode = #tpu.pipeline_mode<synchronous>, transform_indices = @transform_6, window_bounds = array<i64: 1, 256>}, {pipeline_mode = #tpu.pipeline_mode<synchronous>, transform_indices = @transform_7, window_bounds = array<i64: 256, 128>}, {pipeline_mode = #tpu.pipeline_mode<synchronous>, transform_indices = @transform_8, window_bounds = array<i64: 1, 128>}, {transform_indices = @transform_9, window_bounds = array<i64: 1, 1, 128>}]} {
    %c0 = arith.constant 0 : index
    %c0_0 = arith.constant 0 : index
    %c0_1 = arith.constant 0 : index
    %0 = vector.load %arg1[%c0, %c0_0, %c0_1] : memref<1x1x3136xf32, #tpu.memory_space<vmem>>, vector<1x1x128xf32>
    %1 = vector.shape_cast %0 : vector<1x1x128xf32> to vector<1x128xf32>
    %c0_2 = arith.constant 0 : index
    %c0_3 = arith.constant 0 : index
    %2 = vector.load %arg11[%c0_2, %c0_3] : memref<36x256xf32, #tpu.memory_space<vmem>>, vector<1x128xf32>
    tpu.vector_store %arg11[%c0_2, %c0_3], %1 {strides = array<i32>} : memref<36x256xf32, #tpu.memory_space<vmem>>, vector<1x128xf32>,
    %c0_4 = arith.constant 0 : index
    %c0_5 = arith.constant 0 : index
    %c448 = arith.constant 448 : index
    %3 = vector.load %arg1[%c0_4, %c0_5, %c448] : memref<1x1x3136xf32, #tpu.memory_space<vmem>>, vector<1x1x128xf32>
    %4 = vector.shape_cast %3 : vector<1x1x128xf32> to vector<1x128xf32>
    %c0_6 = arith.constant 0 : index
    %c128 = arith.constant 128 : index
    %5 = vector.load %arg11[%c0_6, %c128] : memref<36x256xf32, #tpu.memory_space<vmem>>, vector<1x128xf32>
    tpu.vector_store %arg11[%c0_6, %c128], %4 {strides = array<i32>} : memref<36x256xf32, #tpu.memory_space<vmem>>, vector<1x128xf32>,
    %c0_7 = arith.constant 0 : index
    %c0_8 = arith.constant 0 : index
    %c64 = arith.constant 64 : index
    %6 = vector.load %arg1[%c0_7, %c0_8, %c64] : memref<1x1x3136xf32, #tpu.memory_space<vmem>>, vector<1x1x128xf32>
    %7 = vector.shape_cast %6 : vector<1x1x128xf32> to vector<1x128xf32>
    %c1 = arith.constant 1 : index
    %c0_9 = arith.constant 0 : index
    %8 = vector.load %arg11[%c1, %c0_9] : memref<36x256xf32, #tpu.memory_space<vmem>>, vector<1x128xf32>
    tpu.vector_store %arg11[%c1, %c0_9], %7 {strides = array<i32>} : memref<36x256xf32, #tpu.memory_space<vmem>>, vector<1x128xf32>,
    %c0_10 = arith.constant 0 : index
    %c0_11 = arith.constant 0 : index
    %c512 = arith.constant 512 : index
    %9 = vector.load %arg1[%c0_10, %c0_11, %c512] : memref<1x1x3136xf32, #tpu.memory_space<vmem>>, vector<1x1x128xf32>
    %10 = vector.shape_cast %9 : vector<1x1x128xf32> to vector<1x128xf32>
    %c1_12 = arith.constant 1 : index
    %c128_13 = arith.constant 128 : index
    %11 = vector.load %arg11[%c1_12, %c128_13] : memref<36x256xf32, #tpu.memory_space<vmem>>, vector<1x128xf32>
    tpu.vector_store %arg11[%c1_12, %c128_13], %10 {strides = array<i32>} : memref<36x256xf32, #tpu.memory_space<vmem>>, vector<1x128xf32>,
    %c0_14 = arith.constant 0 : index
    %c0_15 = arith.constant 0 : index
    %c128_16 = arith.constant 128 : index
    %12 = vector.load %arg1[%c0_14, %c0_15, %c128_16] : memref<1x1x3136xf32, #tpu.memory_space<vmem>>, vector<1x1x128xf32>
    %13 = vector.shape_cast %12 : vector<1x1x128xf32> to vector<1x128xf32>
    %c2 = arith.constant 2 : index
    %c0_17 = arith.constant 0 : index
    %14 = vector.load %arg11[%c2, %c0_17] : memref<36x256xf32, #tpu.memory_space<vmem>>, vector<1x128xf32>
    tpu.vector_store %arg11[%c2, %c0_17], %13 {strides = array<i32>} : memref<36x256xf32, #tpu.memory_space<vmem>>, vector<1x128xf32>,
    %c0_18 = arith.constant 0 : index
    %c0_19 = arith.constant 0 : index
    %c576 = arith.constant 576 : index
    %15 = vector.load %arg1[%c0_18, %c0_19, %c576] : memref<1x1x3136xf32, #tpu.memory_space<vmem>>, vector<1x1x128xf32>
    %16 = vector.shape_cast %15 : vector<1x1x128xf32> to vector<1x128xf32>
    %c2_20 = arith.constant 2 : index
    %c128_21 = arith.constant 128 : index
    %17 = vector.load %arg11[%c2_20, %c128_21] : memref<36x256xf32, #tpu.memory_space<vmem>>, vector<1x128xf32>
    tpu.vector_store %arg11[%c2_20, %c128_21], %16 {strides = array<i32>} : memref<36x256xf32, #tpu.memory_space<vmem>>, vector<1x128xf32>,
    %c0_22 = arith.constant 0 : index
    %c0_23 = arith.constant 0 : index
    %c192 = arith.constant 192 : index
    %18 = vector.load %arg1[%c0_22, %c0_23, %c192] : memref<1x1x3136xf32, #tpu.memory_space<vmem>>, vector<1x1x128xf32>
    %19 = vector.shape_cast %18 : vector<1x1x128xf32> to vector<1x128xf32>
    %c3 = arith.constant 3 : index
    %c0_24 = arith.constant 0 : index
    %20 = vector.load %arg11[%c3, %c0_24] : memref<36x256xf32, #tpu.memory_space<vmem>>, vector<1x128xf32>
    tpu.vector_store %arg11[%c3, %c0_24], %19 {strides = array<i32>} : memref<36x256xf32, #tpu.memory_space<vmem>>, vector<1x128xf32>,
    %c0_25 = arith.constant 0 : index
    %c0_26 = arith.constant 0 : index
    %c640 = arith.constant 640 : index
    %21 = vector.load %arg1[%c0_25, %c0_26, %c640] : memref<1x1x3136xf32, #tpu.memory_space<vmem>>, vector<1x1x128xf32>
    %22 = vector.shape_cast %21 : vector<1x1x128xf32> to vector<1x128xf32>
    %c3_27 = arith.constant 3 : index
    %c128_28 = arith.constant 128 : index
    %23 = vector.load %arg11[%c3_27, %c128_28] : memref<36x256xf32, #tpu.memory_space<vmem>>, vector<1x128xf32>
    tpu.vector_store %arg11[%c3_27, %c128_28], %22 {strides = array<i32>} : memref<36x256xf32, #tpu.memory_space<vmem>>, vector<1x128xf32>,
    %c0_29 = arith.constant 0 : index
    %c0_30 = arith.constant 0 : index
    %c256 = arith.constant 256 : index
    %24 = vector.load %arg1[%c0_29, %c0_30, %c256] : memref<1x1x3136xf32, #tpu.memory_space<vmem>>, vector<1x1x128xf32>
    %25 = vector.shape_cast %24 : vector<1x1x128xf32> to vector<1x128xf32>
    %c4 = arith.constant 4 : index
    %c0_31 = arith.constant 0 : index
    %26 = vector.load %arg11[%c4, %c0_31] : memref<36x256xf32, #tpu.memory_space<vmem>>, vector<1x128xf32>
    tpu.vector_store %arg11[%c4, %c0_31], %25 {strides = array<i32>} : memref<36x256xf32, #tpu.memory_space<vmem>>, vector<1x128xf32>,
    %c0_32 = arith.constant 0 : index
    %c0_33 = arith.constant 0 : index
    %c704 = arith.constant 704 : index
    %27 = vector.load %arg1[%c0_32, %c0_33, %c704] : memref<1x1x3136xf32, #tpu.memory_space<vmem>>, vector<1x1x128xf32>
    %28 = vector.shape_cast %27 : vector<1x1x128xf32> to vector<1x128xf32>
    %c4_34 = arith.constant 4 : index
    %c128_35 = arith.constant 128 : index
    %29 = vector.load %arg11[%c4_34, %c128_35] : memref<36x256xf32, #tpu.memory_space<vmem>>, vector<1x128xf32>
    tpu.vector_store %arg11[%c4_34, %c128_35], %28 {strides = array<i32>} : memref<36x256xf32, #tpu.memory_space<vmem>>, vector<1x128xf32>,
    %c0_36 = arith.constant 0 : index
    %c0_37 = arith.constant 0 : index
    %c320 = arith.constant 320 : index
    %30 = vector.load %arg1[%c0_36, %c0_37, %c320] : memref<1x1x3136xf32, #tpu.memory_space<vmem>>, vector<1x1x128xf32>
    %31 = vector.shape_cast %30 : vector<1x1x128xf32> to vector<1x128xf32>
    %c5 = arith.constant 5 : index
    %c0_38 = arith.constant 0 : index
    %32 = vector.load %arg11[%c5, %c0_38] : memref<36x256xf32, #tpu.memory_space<vmem>>, vector<1x128xf32>
    tpu.vector_store %arg11[%c5, %c0_38], %31 {strides = array<i32>} : memref<36x256xf32, #tpu.memory_space<vmem>>, vector<1x128xf32>,
    %c0_39 = arith.constant 0 : index
    %c0_40 = arith.constant 0 : index
    %c768 = arith.constant 768 : index
    %33 = vector.load %arg1[%c0_39, %c0_40, %c768] : memref<1x1x3136xf32, #tpu.memory_space<vmem>>, vector<1x1x128xf32>
    %34 = vector.shape_cast %33 : vector<1x1x128xf32> to vector<1x128xf32>
    %c5_41 = arith.constant 5 : index
    %c128_42 = arith.constant 128 : index
    %35 = vector.load %arg11[%c5_41, %c128_42] : memref<36x256xf32, #tpu.memory_space<vmem>>, vector<1x128xf32>
    tpu.vector_store %arg11[%c5_41, %c128_42], %34 {strides = array<i32>} : memref<36x256xf32, #tpu.memory_space<vmem>>, vector<1x128xf32>,
    %c0_43 = arith.constant 0 : index
    %c0_44 = arith.constant 0 : index
    %c448_45 = arith.constant 448 : index
    %36 = vector.load %arg1[%c0_43, %c0_44, %c448_45] : memref<1x1x3136xf32, #tpu.memory_space<vmem>>, vector<1x1x128xf32>
    %37 = vector.shape_cast %36 : vector<1x1x128xf32> to vector<1x128xf32>
    %c6 = arith.constant 6 : index
    %c0_46 = arith.constant 0 : index
    %38 = vector.load %arg11[%c6, %c0_46] : memref<36x256xf32, #tpu.memory_space<vmem>>, vector<1x128xf32>
    tpu.vector_store %arg11[%c6, %c0_46], %37 {strides = array<i32>} : memref<36x256xf32, #tpu.memory_space<vmem>>, vector<1x128xf32>,
    %c0_47 = arith.constant 0 : index
    %c0_48 = arith.constant 0 : index
    %c896 = arith.constant 896 : index
    %39 = vector.load %arg1[%c0_47, %c0_48, %c896] : memref<1x1x3136xf32, #tpu.memory_space<vmem>>, vector<1x1x128xf32>
    %40 = vector.shape_cast %39 : vector<1x1x128xf32> to vector<1x128xf32>
    %c6_49 = arith.constant 6 : index
    %c128_50 = arith.constant 128 : index
    %41 = vector.load %arg11[%c6_49, %c128_50] : memref<36x256xf32, #tpu.memory_space<vmem>>, vector<1x128xf32>
    tpu.vector_store %arg11[%c6_49, %c128_50], %40 {strides = array<i32>} : memref<36x256xf32, #tpu.memory_space<vmem>>, vector<1x128xf32>,
    %c0_51 = arith.constant 0 : index
    %c0_52 = arith.constant 0 : index
    %c512_53 = arith.constant 512 : index
    %42 = vector.load %arg1[%c0_51, %c0_52, %c512_53] : memref<1x1x3136xf32, #tpu.memory_space<vmem>>, vector<1x1x128xf32>
    %43 = vector.shape_cast %42 : vector<1x1x128xf32> to vector<1x128xf32>
    %c7 = arith.constant 7 : index
    %c0_54 = arith.constant 0 : index
    %44 = vector.load %arg11[%c7, %c0_54] : memref<36x256xf32, #tpu.memory_space<vmem>>, vector<1x128xf32>
    tpu.vector_store %arg11[%c7, %c0_54], %43 {strides = array<i32>} : memref<36x256xf32, #tpu.memory_space<vmem>>, vector<1x128xf32>,
    %c0_55 = arith.constant 0 : index
    %c0_56 = arith.constant 0 : index
    %c960 = arith.constant 960 : index
    %45 = vector.load %arg1[%c0_55, %c0_56, %c960] : memref<1x1x3136xf32, #tpu.memory_space<vmem>>, vector<1x1x128xf32>
    %46 = vector.shape_cast %45 : vector<1x1x128xf32> to vector<1x128xf32>
    %c7_57 = arith.constant 7 : index
    %c128_58 = arith.constant 128 : index
    %47 = vector.load %arg11[%c7_57, %c128_58] : memref<36x256xf32, #tpu.memory_space<vmem>>, vector<1x128xf32>
    tpu.vector_store %arg11[%c7_57, %c128_58], %46 {strides = array<i32>} : memref<36x256xf32, #tpu.memory_space<vmem>>, vector<1x128xf32>,
    %c0_59 = arith.constant 0 : index
    %c0_60 = arith.constant 0 : index
    %c576_61 = arith.constant 576 : index
    %48 = vector.load %arg1[%c0_59, %c0_60, %c576_61] : memref<1x1x3136xf32, #tpu.memory_space<vmem>>, vector<1x1x128xf32>
    %49 = vector.shape_cast %48 : vector<1x1x128xf32> to vector<1x128xf32>
    %c8 = arith.constant 8 : index
    %c0_62 = arith.constant 0 : index
    %50 = vector.load %arg11[%c8, %c0_62] : memref<36x256xf32, #tpu.memory_space<vmem>>, vector<1x128xf32>
    tpu.vector_store %arg11[%c8, %c0_62], %49 {strides = array<i32>} : memref<36x256xf32, #tpu.memory_space<vmem>>, vector<1x128xf32>,
    %c0_63 = arith.constant 0 : index
    %c0_64 = arith.constant 0 : index
    %c1024 = arith.constant 1024 : index
    %51 = vector.load %arg1[%c0_63, %c0_64, %c1024] : memref<1x1x3136xf32, #tpu.memory_space<vmem>>, vector<1x1x128xf32>
    %52 = vector.shape_cast %51 : vector<1x1x128xf32> to vector<1x128xf32>
    %c8_65 = arith.constant 8 : index
    %c128_66 = arith.constant 128 : index
    %53 = vector.load %arg11[%c8_65, %c128_66] : memref<36x256xf32, #tpu.memory_space<vmem>>, vector<1x128xf32>
    tpu.vector_store %arg11[%c8_65, %c128_66], %52 {strides = array<i32>} : memref<36x256xf32, #tpu.memory_space<vmem>>, vector<1x128xf32>,
    %c0_67 = arith.constant 0 : index
    %c0_68 = arith.constant 0 : index
    %c640_69 = arith.constant 640 : index
    %54 = vector.load %arg1[%c0_67, %c0_68, %c640_69] : memref<1x1x3136xf32, #tpu.memory_space<vmem>>, vector<1x1x128xf32>
    %55 = vector.shape_cast %54 : vector<1x1x128xf32> to vector<1x128xf32>
    %c9 = arith.constant 9 : index
    %c0_70 = arith.constant 0 : index
    %56 = vector.load %arg11[%c9, %c0_70] : memref<36x256xf32, #tpu.memory_space<vmem>>, vector<1x128xf32>
    tpu.vector_store %arg11[%c9, %c0_70], %55 {strides = array<i32>} : memref<36x256xf32, #tpu.memory_space<vmem>>, vector<1x128xf32>,
    %c0_71 = arith.constant 0 : index
    %c0_72 = arith.constant 0 : index
    %c1088 = arith.constant 1088 : index
    %57 = vector.load %arg1[%c0_71, %c0_72, %c1088] : memref<1x1x3136xf32, #tpu.memory_space<vmem>>, vector<1x1x128xf32>
    %58 = vector.shape_cast %57 : vector<1x1x128xf32> to vector<1x128xf32>
    %c9_73 = arith.constant 9 : index
    %c128_74 = arith.constant 128 : index
    %59 = vector.load %arg11[%c9_73, %c128_74] : memref<36x256xf32, #tpu.memory_space<vmem>>, vector<1x128xf32>
    tpu.vector_store %arg11[%c9_73, %c128_74], %58 {strides = array<i32>} : memref<36x256xf32, #tpu.memory_space<vmem>>, vector<1x128xf32>,
    %c0_75 = arith.constant 0 : index
    %c0_76 = arith.constant 0 : index
    %c704_77 = arith.constant 704 : index
    %60 = vector.load %arg1[%c0_75, %c0_76, %c704_77] : memref<1x1x3136xf32, #tpu.memory_space<vmem>>, vector<1x1x128xf32>
    %61 = vector.shape_cast %60 : vector<1x1x128xf32> to vector<1x128xf32>
    %c10 = arith.constant 10 : index
    %c0_78 = arith.constant 0 : index
    %62 = vector.load %arg11[%c10, %c0_78] : memref<36x256xf32, #tpu.memory_space<vmem>>, vector<1x128xf32>
    tpu.vector_store %arg11[%c10, %c0_78], %61 {strides = array<i32>} : memref<36x256xf32, #tpu.memory_space<vmem>>, vector<1x128xf32>,
    %c0_79 = arith.constant 0 : index
    %c0_80 = arith.constant 0 : index
    %c1152 = arith.constant 1152 : index
    %63 = vector.load %arg1[%c0_79, %c0_80, %c1152] : memref<1x1x3136xf32, #tpu.memory_space<vmem>>, vector<1x1x128xf32>
    %64 = vector.shape_cast %63 : vector<1x1x128xf32> to vector<1x128xf32>
    %c10_81 = arith.constant 10 : index
    %c128_82 = arith.constant 128 : index
    %65 = vector.load %arg11[%c10_81, %c128_82] : memref<36x256xf32, #tpu.memory_space<vmem>>, vector<1x128xf32>
    tpu.vector_store %arg11[%c10_81, %c128_82], %64 {strides = array<i32>} : memref<36x256xf32, #tpu.memory_space<vmem>>, vector<1x128xf32>,
    %c0_83 = arith.constant 0 : index
    %c0_84 = arith.constant 0 : index
    %c768_85 = arith.constant 768 : index
    %66 = vector.load %arg1[%c0_83, %c0_84, %c768_85] : memref<1x1x3136xf32, #tpu.memory_space<vmem>>, vector<1x1x128xf32>
    %67 = vector.shape_cast %66 : vector<1x1x128xf32> to vector<1x128xf32>
    %c11 = arith.constant 11 : index
    %c0_86 = arith.constant 0 : index
    %68 = vector.load %arg11[%c11, %c0_86] : memref<36x256xf32, #tpu.memory_space<vmem>>, vector<1x128xf32>
    tpu.vector_store %arg11[%c11, %c0_86], %67 {strides = array<i32>} : memref<36x256xf32, #tpu.memory_space<vmem>>, vector<1x128xf32>,
    %c0_87 = arith.constant 0 : index
    %c0_88 = arith.constant 0 : index
    %c1216 = arith.constant 1216 : index
    %69 = vector.load %arg1[%c0_87, %c0_88, %c1216] : memref<1x1x3136xf32, #tpu.memory_space<vmem>>, vector<1x1x128xf32>
    %70 = vector.shape_cast %69 : vector<1x1x128xf32> to vector<1x128xf32>
    %c11_89 = arith.constant 11 : index
    %c128_90 = arith.constant 128 : index
    %71 = vector.load %arg11[%c11_89, %c128_90] : memref<36x256xf32, #tpu.memory_space<vmem>>, vector<1x128xf32>
    tpu.vector_store %arg11[%c11_89, %c128_90], %70 {strides = array<i32>} : memref<36x256xf32, #tpu.memory_space<vmem>>, vector<1x128xf32>,
    %c0_91 = arith.constant 0 : index
    %c0_92 = arith.constant 0 : index
    %c896_93 = arith.constant 896 : index
    %72 = vector.load %arg1[%c0_91, %c0_92, %c896_93] : memref<1x1x3136xf32, #tpu.memory_space<vmem>>, vector<1x1x128xf32>
    %73 = vector.shape_cast %72 : vector<1x1x128xf32> to vector<1x128xf32>
    %c12 = arith.constant 12 : index
    %c0_94 = arith.constant 0 : index
    %74 = vector.load %arg11[%c12, %c0_94] : memref<36x256xf32, #tpu.memory_space<vmem>>, vector<1x128xf32>
    tpu.vector_store %arg11[%c12, %c0_94], %73 {strides = array<i32>} : memref<36x256xf32, #tpu.memory_space<vmem>>, vector<1x128xf32>,
    %c0_95 = arith.constant 0 : index
    %c0_96 = arith.constant 0 : index
    %c1344 = arith.constant 1344 : index
    %75 = vector.load %arg1[%c0_95, %c0_96, %c1344] : memref<1x1x3136xf32, #tpu.memory_space<vmem>>, vector<1x1x128xf32>
    %76 = vector.shape_cast %75 : vector<1x1x128xf32> to vector<1x128xf32>
    %c12_97 = arith.constant 12 : index
    %c128_98 = arith.constant 128 : index
    %77 = vector.load %arg11[%c12_97, %c128_98] : memref<36x256xf32, #tpu.memory_space<vmem>>, vector<1x128xf32>
    tpu.vector_store %arg11[%c12_97, %c128_98], %76 {strides = array<i32>} : memref<36x256xf32, #tpu.memory_space<vmem>>, vector<1x128xf32>,
    %c0_99 = arith.constant 0 : index
    %c0_100 = arith.constant 0 : index
    %c960_101 = arith.constant 960 : index
    %78 = vector.load %arg1[%c0_99, %c0_100, %c960_101] : memref<1x1x3136xf32, #tpu.memory_space<vmem>>, vector<1x1x128xf32>
    %79 = vector.shape_cast %78 : vector<1x1x128xf32> to vector<1x128xf32>
    %c13 = arith.constant 13 : index
    %c0_102 = arith.constant 0 : index
    %80 = vector.load %arg11[%c13, %c0_102] : memref<36x256xf32, #tpu.memory_space<vmem>>, vector<1x128xf32>
    tpu.vector_store %arg11[%c13, %c0_102], %79 {strides = array<i32>} : memref<36x256xf32, #tpu.memory_space<vmem>>, vector<1x128xf32>,
    %c0_103 = arith.constant 0 : index
    %c0_104 = arith.constant 0 : index
    %c1408 = arith.constant 1408 : index
    %81 = vector.load %arg1[%c0_103, %c0_104, %c1408] : memref<1x1x3136xf32, #tpu.memory_space<vmem>>, vector<1x1x128xf32>
    %82 = vector.shape_cast %81 : vector<1x1x128xf32> to vector<1x128xf32>
    %c13_105 = arith.constant 13 : index
    %c128_106 = arith.constant 128 : index
    %83 = vector.load %arg11[%c13_105, %c128_106] : memref<36x256xf32, #tpu.memory_space<vmem>>, vector<1x128xf32>
    tpu.vector_store %arg11[%c13_105, %c128_106], %82 {strides = array<i32>} : memref<36x256xf32, #tpu.memory_space<vmem>>, vector<1x128xf32>,
    %c0_107 = arith.constant 0 : index
    %c0_108 = arith.constant 0 : index
    %c1024_109 = arith.constant 1024 : index
    %84 = vector.load %arg1[%c0_107, %c0_108, %c1024_109] : memref<1x1x3136xf32, #tpu.memory_space<vmem>>, vector<1x1x128xf32>
    %85 = vector.shape_cast %84 : vector<1x1x128xf32> to vector<1x128xf32>
    %c14 = arith.constant 14 : index
    %c0_110 = arith.constant 0 : index
    %86 = vector.load %arg11[%c14, %c0_110] : memref<36x256xf32, #tpu.memory_space<vmem>>, vector<1x128xf32>
    tpu.vector_store %arg11[%c14, %c0_110], %85 {strides = array<i32>} : memref<36x256xf32, #tpu.memory_space<vmem>>, vector<1x128xf32>,
    %c0_111 = arith.constant 0 : index
    %c0_112 = arith.constant 0 : index
    %c1472 = arith.constant 1472 : index
    %87 = vector.load %arg1[%c0_111, %c0_112, %c1472] : memref<1x1x3136xf32, #tpu.memory_space<vmem>>, vector<1x1x128xf32>
    %88 = vector.shape_cast %87 : vector<1x1x128xf32> to vector<1x128xf32>
    %c14_113 = arith.constant 14 : index
    %c128_114 = arith.constant 128 : index
    %89 = vector.load %arg11[%c14_113, %c128_114] : memref<36x256xf32, #tpu.memory_space<vmem>>, vector<1x128xf32>
    tpu.vector_store %arg11[%c14_113, %c128_114], %88 {strides = array<i32>} : memref<36x256xf32, #tpu.memory_space<vmem>>, vector<1x128xf32>,
    %c0_115 = arith.constant 0 : index
    %c0_116 = arith.constant 0 : index
    %c1088_117 = arith.constant 1088 : index
    %90 = vector.load %arg1[%c0_115, %c0_116, %c1088_117] : memref<1x1x3136xf32, #tpu.memory_space<vmem>>, vector<1x1x128xf32>
    %91 = vector.shape_cast %90 : vector<1x1x128xf32> to vector<1x128xf32>
    %c15 = arith.constant 15 : index
    %c0_118 = arith.constant 0 : index
    %92 = vector.load %arg11[%c15, %c0_118] : memref<36x256xf32, #tpu.memory_space<vmem>>, vector<1x128xf32>
    tpu.vector_store %arg11[%c15, %c0_118], %91 {strides = array<i32>} : memref<36x256xf32, #tpu.memory_space<vmem>>, vector<1x128xf32>,
    %c0_119 = arith.constant 0 : index
    %c0_120 = arith.constant 0 : index
    %c1536 = arith.constant 1536 : index
    %93 = vector.load %arg1[%c0_119, %c0_120, %c1536] : memref<1x1x3136xf32, #tpu.memory_space<vmem>>, vector<1x1x128xf32>
    %94 = vector.shape_cast %93 : vector<1x1x128xf32> to vector<1x128xf32>
    %c15_121 = arith.constant 15 : index
    %c128_122 = arith.constant 128 : index
    %95 = vector.load %arg11[%c15_121, %c128_122] : memref<36x256xf32, #tpu.memory_space<vmem>>, vector<1x128xf32>
    tpu.vector_store %arg11[%c15_121, %c128_122], %94 {strides = array<i32>} : memref<36x256xf32, #tpu.memory_space<vmem>>, vector<1x128xf32>,
    %c0_123 = arith.constant 0 : index
    %c0_124 = arith.constant 0 : index
    %c1152_125 = arith.constant 1152 : index
    %96 = vector.load %arg1[%c0_123, %c0_124, %c1152_125] : memref<1x1x3136xf32, #tpu.memory_space<vmem>>, vector<1x1x128xf32>
    %97 = vector.shape_cast %96 : vector<1x1x128xf32> to vector<1x128xf32>
    %c16 = arith.constant 16 : index
    %c0_126 = arith.constant 0 : index
    %98 = vector.load %arg11[%c16, %c0_126] : memref<36x256xf32, #tpu.memory_space<vmem>>, vector<1x128xf32>
    tpu.vector_store %arg11[%c16, %c0_126], %97 {strides = array<i32>} : memref<36x256xf32, #tpu.memory_space<vmem>>, vector<1x128xf32>,
    %c0_127 = arith.constant 0 : index
    %c0_128 = arith.constant 0 : index
    %c1600 = arith.constant 1600 : index
    %99 = vector.load %arg1[%c0_127, %c0_128, %c1600] : memref<1x1x3136xf32, #tpu.memory_space<vmem>>, vector<1x1x128xf32>
    %100 = vector.shape_cast %99 : vector<1x1x128xf32> to vector<1x128xf32>
    %c16_129 = arith.constant 16 : index
    %c128_130 = arith.constant 128 : index
    %101 = vector.load %arg11[%c16_129, %c128_130] : memref<36x256xf32, #tpu.memory_space<vmem>>, vector<1x128xf32>
    tpu.vector_store %arg11[%c16_129, %c128_130], %100 {strides = array<i32>} : memref<36x256xf32, #tpu.memory_space<vmem>>, vector<1x128xf32>,
    %c0_131 = arith.constant 0 : index
    %c0_132 = arith.constant 0 : index
    %c1216_133 = arith.constant 1216 : index
    %102 = vector.load %arg1[%c0_131, %c0_132, %c1216_133] : memref<1x1x3136xf32, #tpu.memory_space<vmem>>, vector<1x1x128xf32>
    %103 = vector.shape_cast %102 : vector<1x1x128xf32> to vector<1x128xf32>
    %c17 = arith.constant 17 : index
    %c0_134 = arith.constant 0 : index
    %104 = vector.load %arg11[%c17, %c0_134] : memref<36x256xf32, #tpu.memory_space<vmem>>, vector<1x128xf32>
    tpu.vector_store %arg11[%c17, %c0_134], %103 {strides = array<i32>} : memref<36x256xf32, #tpu.memory_space<vmem>>, vector<1x128xf32>,
    %c0_135 = arith.constant 0 : index
    %c0_136 = arith.constant 0 : index
    %c1664 = arith.constant 1664 : index
    %105 = vector.load %arg1[%c0_135, %c0_136, %c1664] : memref<1x1x3136xf32, #tpu.memory_space<vmem>>, vector<1x1x128xf32>
    %106 = vector.shape_cast %105 : vector<1x1x128xf32> to vector<1x128xf32>
    %c17_137 = arith.constant 17 : index
    %c128_138 = arith.constant 128 : index
    %107 = vector.load %arg11[%c17_137, %c128_138] : memref<36x256xf32, #tpu.memory_space<vmem>>, vector<1x128xf32>
    tpu.vector_store %arg11[%c17_137, %c128_138], %106 {strides = array<i32>} : memref<36x256xf32, #tpu.memory_space<vmem>>, vector<1x128xf32>,
    %c0_139 = arith.constant 0 : index
    %c0_140 = arith.constant 0 : index
    %c1344_141 = arith.constant 1344 : index
    %108 = vector.load %arg1[%c0_139, %c0_140, %c1344_141] : memref<1x1x3136xf32, #tpu.memory_space<vmem>>, vector<1x1x128xf32>
    %109 = vector.shape_cast %108 : vector<1x1x128xf32> to vector<1x128xf32>
    %c18 = arith.constant 18 : index
    %c0_142 = arith.constant 0 : index
    %110 = vector.load %arg11[%c18, %c0_142] : memref<36x256xf32, #tpu.memory_space<vmem>>, vector<1x128xf32>
    tpu.vector_store %arg11[%c18, %c0_142], %109 {strides = array<i32>} : memref<36x256xf32, #tpu.memory_space<vmem>>, vector<1x128xf32>,
    %c0_143 = arith.constant 0 : index
    %c0_144 = arith.constant 0 : index
    %c1792 = arith.constant 1792 : index
    %111 = vector.load %arg1[%c0_143, %c0_144, %c1792] : memref<1x1x3136xf32, #tpu.memory_space<vmem>>, vector<1x1x128xf32>
    %112 = vector.shape_cast %111 : vector<1x1x128xf32> to vector<1x128xf32>
    %c18_145 = arith.constant 18 : index
    %c128_146 = arith.constant 128 : index
    %113 = vector.load %arg11[%c18_145, %c128_146] : memref<36x256xf32, #tpu.memory_space<vmem>>, vector<1x128xf32>
    tpu.vector_store %arg11[%c18_145, %c128_146], %112 {strides = array<i32>} : memref<36x256xf32, #tpu.memory_space<vmem>>, vector<1x128xf32>,
    %c0_147 = arith.constant 0 : index
    %c0_148 = arith.constant 0 : index
    %c1408_149 = arith.constant 1408 : index
    %114 = vector.load %arg1[%c0_147, %c0_148, %c1408_149] : memref<1x1x3136xf32, #tpu.memory_space<vmem>>, vector<1x1x128xf32>
    %115 = vector.shape_cast %114 : vector<1x1x128xf32> to vector<1x128xf32>
    %c19 = arith.constant 19 : index
    %c0_150 = arith.constant 0 : index
    %116 = vector.load %arg11[%c19, %c0_150] : memref<36x256xf32, #tpu.memory_space<vmem>>, vector<1x128xf32>
    tpu.vector_store %arg11[%c19, %c0_150], %115 {strides = array<i32>} : memref<36x256xf32, #tpu.memory_space<vmem>>, vector<1x128xf32>,
    %c0_151 = arith.constant 0 : index
    %c0_152 = arith.constant 0 : index
    %c1856 = arith.constant 1856 : index
    %117 = vector.load %arg1[%c0_151, %c0_152, %c1856] : memref<1x1x3136xf32, #tpu.memory_space<vmem>>, vector<1x1x128xf32>
    %118 = vector.shape_cast %117 : vector<1x1x128xf32> to vector<1x128xf32>
    %c19_153 = arith.constant 19 : index
    %c128_154 = arith.constant 128 : index
    %119 = vector.load %arg11[%c19_153, %c128_154] : memref<36x256xf32, #tpu.memory_space<vmem>>, vector<1x128xf32>
    tpu.vector_store %arg11[%c19_153, %c128_154], %118 {strides = array<i32>} : memref<36x256xf32, #tpu.memory_space<vmem>>, vector<1x128xf32>,
    %c0_155 = arith.constant 0 : index
    %c0_156 = arith.constant 0 : index
    %c1472_157 = arith.constant 1472 : index
    %120 = vector.load %arg1[%c0_155, %c0_156, %c1472_157] : memref<1x1x3136xf32, #tpu.memory_space<vmem>>, vector<1x1x128xf32>
    %121 = vector.shape_cast %120 : vector<1x1x128xf32> to vector<1x128xf32>
    %c20 = arith.constant 20 : index
    %c0_158 = arith.constant 0 : index
    %122 = vector.load %arg11[%c20, %c0_158] : memref<36x256xf32, #tpu.memory_space<vmem>>, vector<1x128xf32>
    tpu.vector_store %arg11[%c20, %c0_158], %121 {strides = array<i32>} : memref<36x256xf32, #tpu.memory_space<vmem>>, vector<1x128xf32>,
    %c0_159 = arith.constant 0 : index
    %c0_160 = arith.constant 0 : index
    %c1920 = arith.constant 1920 : index
    %123 = vector.load %arg1[%c0_159, %c0_160, %c1920] : memref<1x1x3136xf32, #tpu.memory_space<vmem>>, vector<1x1x128xf32>
    %124 = vector.shape_cast %123 : vector<1x1x128xf32> to vector<1x128xf32>
    %c20_161 = arith.constant 20 : index
    %c128_162 = arith.constant 128 : index
    %125 = vector.load %arg11[%c20_161, %c128_162] : memref<36x256xf32, #tpu.memory_space<vmem>>, vector<1x128xf32>
    tpu.vector_store %arg11[%c20_161, %c128_162], %124 {strides = array<i32>} : memref<36x256xf32, #tpu.memory_space<vmem>>, vector<1x128xf32>,
    %c0_163 = arith.constant 0 : index
    %c0_164 = arith.constant 0 : index
    %c1536_165 = arith.constant 1536 : index
    %126 = vector.load %arg1[%c0_163, %c0_164, %c1536_165] : memref<1x1x3136xf32, #tpu.memory_space<vmem>>, vector<1x1x128xf32>
    %127 = vector.shape_cast %126 : vector<1x1x128xf32> to vector<1x128xf32>
    %c21 = arith.constant 21 : index
    %c0_166 = arith.constant 0 : index
    %128 = vector.load %arg11[%c21, %c0_166] : memref<36x256xf32, #tpu.memory_space<vmem>>, vector<1x128xf32>
    tpu.vector_store %arg11[%c21, %c0_166], %127 {strides = array<i32>} : memref<36x256xf32, #tpu.memory_space<vmem>>, vector<1x128xf32>,
    %c0_167 = arith.constant 0 : index
    %c0_168 = arith.constant 0 : index
    %c1984 = arith.constant 1984 : index
    %129 = vector.load %arg1[%c0_167, %c0_168, %c1984] : memref<1x1x3136xf32, #tpu.memory_space<vmem>>, vector<1x1x128xf32>
    %130 = vector.shape_cast %129 : vector<1x1x128xf32> to vector<1x128xf32>
    %c21_169 = arith.constant 21 : index
    %c128_170 = arith.constant 128 : index
    %131 = vector.load %arg11[%c21_169, %c128_170] : memref<36x256xf32, #tpu.memory_space<vmem>>, vector<1x128xf32>
    tpu.vector_store %arg11[%c21_169, %c128_170], %130 {strides = array<i32>} : memref<36x256xf32, #tpu.memory_space<vmem>>, vector<1x128xf32>,
    %c0_171 = arith.constant 0 : index
    %c0_172 = arith.constant 0 : index
    %c1600_173 = arith.constant 1600 : index
    %132 = vector.load %arg1[%c0_171, %c0_172, %c1600_173] : memref<1x1x3136xf32, #tpu.memory_space<vmem>>, vector<1x1x128xf32>
    %133 = vector.shape_cast %132 : vector<1x1x128xf32> to vector<1x128xf32>
    %c22 = arith.constant 22 : index
    %c0_174 = arith.constant 0 : index
    %134 = vector.load %arg11[%c22, %c0_174] : memref<36x256xf32, #tpu.memory_space<vmem>>, vector<1x128xf32>
    tpu.vector_store %arg11[%c22, %c0_174], %133 {strides = array<i32>} : memref<36x256xf32, #tpu.memory_space<vmem>>, vector<1x128xf32>,
    %c0_175 = arith.constant 0 : index
    %c0_176 = arith.constant 0 : index
    %c2048 = arith.constant 2048 : index
    %135 = vector.load %arg1[%c0_175, %c0_176, %c2048] : memref<1x1x3136xf32, #tpu.memory_space<vmem>>, vector<1x1x128xf32>
    %136 = vector.shape_cast %135 : vector<1x1x128xf32> to vector<1x128xf32>
    %c22_177 = arith.constant 22 : index
    %c128_178 = arith.constant 128 : index
    %137 = vector.load %arg11[%c22_177, %c128_178] : memref<36x256xf32, #tpu.memory_space<vmem>>, vector<1x128xf32>
    tpu.vector_store %arg11[%c22_177, %c128_178], %136 {strides = array<i32>} : memref<36x256xf32, #tpu.memory_space<vmem>>, vector<1x128xf32>,
    %c0_179 = arith.constant 0 : index
    %c0_180 = arith.constant 0 : index
    %c1664_181 = arith.constant 1664 : index
    %138 = vector.load %arg1[%c0_179, %c0_180, %c1664_181] : memref<1x1x3136xf32, #tpu.memory_space<vmem>>, vector<1x1x128xf32>
    %139 = vector.shape_cast %138 : vector<1x1x128xf32> to vector<1x128xf32>
    %c23 = arith.constant 23 : index
    %c0_182 = arith.constant 0 : index
    %140 = vector.load %arg11[%c23, %c0_182] : memref<36x256xf32, #tpu.memory_space<vmem>>, vector<1x128xf32>
    tpu.vector_store %arg11[%c23, %c0_182], %139 {strides = array<i32>} : memref<36x256xf32, #tpu.memory_space<vmem>>, vector<1x128xf32>,
    %c0_183 = arith.constant 0 : index
    %c0_184 = arith.constant 0 : index
    %c2112 = arith.constant 2112 : index
    %141 = vector.load %arg1[%c0_183, %c0_184, %c2112] : memref<1x1x3136xf32, #tpu.memory_space<vmem>>, vector<1x1x128xf32>
    %142 = vector.shape_cast %141 : vector<1x1x128xf32> to vector<1x128xf32>
    %c23_185 = arith.constant 23 : index
    %c128_186 = arith.constant 128 : index
    %143 = vector.load %arg11[%c23_185, %c128_186] : memref<36x256xf32, #tpu.memory_space<vmem>>, vector<1x128xf32>
    tpu.vector_store %arg11[%c23_185, %c128_186], %142 {strides = array<i32>} : memref<36x256xf32, #tpu.memory_space<vmem>>, vector<1x128xf32>,
    %c0_187 = arith.constant 0 : index
    %c0_188 = arith.constant 0 : index
    %c1792_189 = arith.constant 1792 : index
    %144 = vector.load %arg1[%c0_187, %c0_188, %c1792_189] : memref<1x1x3136xf32, #tpu.memory_space<vmem>>, vector<1x1x128xf32>
    %145 = vector.shape_cast %144 : vector<1x1x128xf32> to vector<1x128xf32>
    %c24 = arith.constant 24 : index
    %c0_190 = arith.constant 0 : index
    %146 = vector.load %arg11[%c24, %c0_190] : memref<36x256xf32, #tpu.memory_space<vmem>>, vector<1x128xf32>
    tpu.vector_store %arg11[%c24, %c0_190], %145 {strides = array<i32>} : memref<36x256xf32, #tpu.memory_space<vmem>>, vector<1x128xf32>,
    %c0_191 = arith.constant 0 : index
    %c0_192 = arith.constant 0 : index
    %c2240 = arith.constant 2240 : index
    %147 = vector.load %arg1[%c0_191, %c0_192, %c2240] : memref<1x1x3136xf32, #tpu.memory_space<vmem>>, vector<1x1x128xf32>
    %148 = vector.shape_cast %147 : vector<1x1x128xf32> to vector<1x128xf32>
    %c24_193 = arith.constant 24 : index
    %c128_194 = arith.constant 128 : index
    %149 = vector.load %arg11[%c24_193, %c128_194] : memref<36x256xf32, #tpu.memory_space<vmem>>, vector<1x128xf32>
    tpu.vector_store %arg11[%c24_193, %c128_194], %148 {strides = array<i32>} : memref<36x256xf32, #tpu.memory_space<vmem>>, vector<1x128xf32>,
    %c0_195 = arith.constant 0 : index
    %c0_196 = arith.constant 0 : index
    %c1856_197 = arith.constant 1856 : index
    %150 = vector.load %arg1[%c0_195, %c0_196, %c1856_197] : memref<1x1x3136xf32, #tpu.memory_space<vmem>>, vector<1x1x128xf32>
    %151 = vector.shape_cast %150 : vector<1x1x128xf32> to vector<1x128xf32>
    %c25 = arith.constant 25 : index
    %c0_198 = arith.constant 0 : index
    %152 = vector.load %arg11[%c25, %c0_198] : memref<36x256xf32, #tpu.memory_space<vmem>>, vector<1x128xf32>
    tpu.vector_store %arg11[%c25, %c0_198], %151 {strides = array<i32>} : memref<36x256xf32, #tpu.memory_space<vmem>>, vector<1x128xf32>,
    %c0_199 = arith.constant 0 : index
    %c0_200 = arith.constant 0 : index
    %c2304 = arith.constant 2304 : index
    %153 = vector.load %arg1[%c0_199, %c0_200, %c2304] : memref<1x1x3136xf32, #tpu.memory_space<vmem>>, vector<1x1x128xf32>
    %154 = vector.shape_cast %153 : vector<1x1x128xf32> to vector<1x128xf32>
    %c25_201 = arith.constant 25 : index
    %c128_202 = arith.constant 128 : index
    %155 = vector.load %arg11[%c25_201, %c128_202] : memref<36x256xf32, #tpu.memory_space<vmem>>, vector<1x128xf32>
    tpu.vector_store %arg11[%c25_201, %c128_202], %154 {strides = array<i32>} : memref<36x256xf32, #tpu.memory_space<vmem>>, vector<1x128xf32>,
    %c0_203 = arith.constant 0 : index
    %c0_204 = arith.constant 0 : index
    %c1920_205 = arith.constant 1920 : index
    %156 = vector.load %arg1[%c0_203, %c0_204, %c1920_205] : memref<1x1x3136xf32, #tpu.memory_space<vmem>>, vector<1x1x128xf32>
    %157 = vector.shape_cast %156 : vector<1x1x128xf32> to vector<1x128xf32>
    %c26 = arith.constant 26 : index
    %c0_206 = arith.constant 0 : index
    %158 = vector.load %arg11[%c26, %c0_206] : memref<36x256xf32, #tpu.memory_space<vmem>>, vector<1x128xf32>
    tpu.vector_store %arg11[%c26, %c0_206], %157 {strides = array<i32>} : memref<36x256xf32, #tpu.memory_space<vmem>>, vector<1x128xf32>,
    %c0_207 = arith.constant 0 : index
    %c0_208 = arith.constant 0 : index
    %c2368 = arith.constant 2368 : index
    %159 = vector.load %arg1[%c0_207, %c0_208, %c2368] : memref<1x1x3136xf32, #tpu.memory_space<vmem>>, vector<1x1x128xf32>
    %160 = vector.shape_cast %159 : vector<1x1x128xf32> to vector<1x128xf32>
    %c26_209 = arith.constant 26 : index
    %c128_210 = arith.constant 128 : index
    %161 = vector.load %arg11[%c26_209, %c128_210] : memref<36x256xf32, #tpu.memory_space<vmem>>, vector<1x128xf32>
    tpu.vector_store %arg11[%c26_209, %c128_210], %160 {strides = array<i32>} : memref<36x256xf32, #tpu.memory_space<vmem>>, vector<1x128xf32>,
    %c0_211 = arith.constant 0 : index
    %c0_212 = arith.constant 0 : index
    %c1984_213 = arith.constant 1984 : index
    %162 = vector.load %arg1[%c0_211, %c0_212, %c1984_213] : memref<1x1x3136xf32, #tpu.memory_space<vmem>>, vector<1x1x128xf32>
    %163 = vector.shape_cast %162 : vector<1x1x128xf32> to vector<1x128xf32>
    %c27 = arith.constant 27 : index
    %c0_214 = arith.constant 0 : index
    %164 = vector.load %arg11[%c27, %c0_214] : memref<36x256xf32, #tpu.memory_space<vmem>>, vector<1x128xf32>
    tpu.vector_store %arg11[%c27, %c0_214], %163 {strides = array<i32>} : memref<36x256xf32, #tpu.memory_space<vmem>>, vector<1x128xf32>,
    %c0_215 = arith.constant 0 : index
    %c0_216 = arith.constant 0 : index
    %c2432 = arith.constant 2432 : index
    %165 = vector.load %arg1[%c0_215, %c0_216, %c2432] : memref<1x1x3136xf32, #tpu.memory_space<vmem>>, vector<1x1x128xf32>
    %166 = vector.shape_cast %165 : vector<1x1x128xf32> to vector<1x128xf32>
    %c27_217 = arith.constant 27 : index
    %c128_218 = arith.constant 128 : index
    %167 = vector.load %arg11[%c27_217, %c128_218] : memref<36x256xf32, #tpu.memory_space<vmem>>, vector<1x128xf32>
    tpu.vector_store %arg11[%c27_217, %c128_218], %166 {strides = array<i32>} : memref<36x256xf32, #tpu.memory_space<vmem>>, vector<1x128xf32>,
    %c0_219 = arith.constant 0 : index
    %c0_220 = arith.constant 0 : index
    %c2048_221 = arith.constant 2048 : index
    %168 = vector.load %arg1[%c0_219, %c0_220, %c2048_221] : memref<1x1x3136xf32, #tpu.memory_space<vmem>>, vector<1x1x128xf32>
    %169 = vector.shape_cast %168 : vector<1x1x128xf32> to vector<1x128xf32>
    %c28 = arith.constant 28 : index
    %c0_222 = arith.constant 0 : index
    %170 = vector.load %arg11[%c28, %c0_222] : memref<36x256xf32, #tpu.memory_space<vmem>>, vector<1x128xf32>
    tpu.vector_store %arg11[%c28, %c0_222], %169 {strides = array<i32>} : memref<36x256xf32, #tpu.memory_space<vmem>>, vector<1x128xf32>,
    %c0_223 = arith.constant 0 : index
    %c0_224 = arith.constant 0 : index
    %c2496 = arith.constant 2496 : index
    %171 = vector.load %arg1[%c0_223, %c0_224, %c2496] : memref<1x1x3136xf32, #tpu.memory_space<vmem>>, vector<1x1x128xf32>
    %172 = vector.shape_cast %171 : vector<1x1x128xf32> to vector<1x128xf32>
    %c28_225 = arith.constant 28 : index
    %c128_226 = arith.constant 128 : index
    %173 = vector.load %arg11[%c28_225, %c128_226] : memref<36x256xf32, #tpu.memory_space<vmem>>, vector<1x128xf32>
    tpu.vector_store %arg11[%c28_225, %c128_226], %172 {strides = array<i32>} : memref<36x256xf32, #tpu.memory_space<vmem>>, vector<1x128xf32>,
    %c0_227 = arith.constant 0 : index
    %c0_228 = arith.constant 0 : index
    %c2112_229 = arith.constant 2112 : index
    %174 = vector.load %arg1[%c0_227, %c0_228, %c2112_229] : memref<1x1x3136xf32, #tpu.memory_space<vmem>>, vector<1x1x128xf32>
    %175 = vector.shape_cast %174 : vector<1x1x128xf32> to vector<1x128xf32>
    %c29 = arith.constant 29 : index
    %c0_230 = arith.constant 0 : index
    %176 = vector.load %arg11[%c29, %c0_230] : memref<36x256xf32, #tpu.memory_space<vmem>>, vector<1x128xf32>
    tpu.vector_store %arg11[%c29, %c0_230], %175 {strides = array<i32>} : memref<36x256xf32, #tpu.memory_space<vmem>>, vector<1x128xf32>,
    %c0_231 = arith.constant 0 : index
    %c0_232 = arith.constant 0 : index
    %c2560 = arith.constant 2560 : index
    %177 = vector.load %arg1[%c0_231, %c0_232, %c2560] : memref<1x1x3136xf32, #tpu.memory_space<vmem>>, vector<1x1x128xf32>
    %178 = vector.shape_cast %177 : vector<1x1x128xf32> to vector<1x128xf32>
    %c29_233 = arith.constant 29 : index
    %c128_234 = arith.constant 128 : index
    %179 = vector.load %arg11[%c29_233, %c128_234] : memref<36x256xf32, #tpu.memory_space<vmem>>, vector<1x128xf32>
    tpu.vector_store %arg11[%c29_233, %c128_234], %178 {strides = array<i32>} : memref<36x256xf32, #tpu.memory_space<vmem>>, vector<1x128xf32>,
    %c0_235 = arith.constant 0 : index
    %c0_236 = arith.constant 0 : index
    %c2240_237 = arith.constant 2240 : index
    %180 = vector.load %arg1[%c0_235, %c0_236, %c2240_237] : memref<1x1x3136xf32, #tpu.memory_space<vmem>>, vector<1x1x128xf32>
    %181 = vector.shape_cast %180 : vector<1x1x128xf32> to vector<1x128xf32>
    %c30 = arith.constant 30 : index
    %c0_238 = arith.constant 0 : index
    %182 = vector.load %arg11[%c30, %c0_238] : memref<36x256xf32, #tpu.memory_space<vmem>>, vector<1x128xf32>
    tpu.vector_store %arg11[%c30, %c0_238], %181 {strides = array<i32>} : memref<36x256xf32, #tpu.memory_space<vmem>>, vector<1x128xf32>,
    %c0_239 = arith.constant 0 : index
    %c0_240 = arith.constant 0 : index
    %c2688 = arith.constant 2688 : index
    %183 = vector.load %arg1[%c0_239, %c0_240, %c2688] : memref<1x1x3136xf32, #tpu.memory_space<vmem>>, vector<1x1x128xf32>
    %184 = vector.shape_cast %183 : vector<1x1x128xf32> to vector<1x128xf32>
    %c30_241 = arith.constant 30 : index
    %c128_242 = arith.constant 128 : index
    %185 = vector.load %arg11[%c30_241, %c128_242] : memref<36x256xf32, #tpu.memory_space<vmem>>, vector<1x128xf32>
    tpu.vector_store %arg11[%c30_241, %c128_242], %184 {strides = array<i32>} : memref<36x256xf32, #tpu.memory_space<vmem>>, vector<1x128xf32>,
    %c0_243 = arith.constant 0 : index
    %c0_244 = arith.constant 0 : index
    %c2304_245 = arith.constant 2304 : index
    %186 = vector.load %arg1[%c0_243, %c0_244, %c2304_245] : memref<1x1x3136xf32, #tpu.memory_space<vmem>>, vector<1x1x128xf32>
    %187 = vector.shape_cast %186 : vector<1x1x128xf32> to vector<1x128xf32>
    %c31 = arith.constant 31 : index
    %c0_246 = arith.constant 0 : index
    %188 = vector.load %arg11[%c31, %c0_246] : memref<36x256xf32, #tpu.memory_space<vmem>>, vector<1x128xf32>
    tpu.vector_store %arg11[%c31, %c0_246], %187 {strides = array<i32>} : memref<36x256xf32, #tpu.memory_space<vmem>>, vector<1x128xf32>,
    %c0_247 = arith.constant 0 : index
    %c0_248 = arith.constant 0 : index
    %c2752 = arith.constant 2752 : index
    %189 = vector.load %arg1[%c0_247, %c0_248, %c2752] : memref<1x1x3136xf32, #tpu.memory_space<vmem>>, vector<1x1x128xf32>
    %190 = vector.shape_cast %189 : vector<1x1x128xf32> to vector<1x128xf32>
    %c31_249 = arith.constant 31 : index
    %c128_250 = arith.constant 128 : index
    %191 = vector.load %arg11[%c31_249, %c128_250] : memref<36x256xf32, #tpu.memory_space<vmem>>, vector<1x128xf32>
    tpu.vector_store %arg11[%c31_249, %c128_250], %190 {strides = array<i32>} : memref<36x256xf32, #tpu.memory_space<vmem>>, vector<1x128xf32>,
    %c0_251 = arith.constant 0 : index
    %c0_252 = arith.constant 0 : index
    %c2368_253 = arith.constant 2368 : index
    %192 = vector.load %arg1[%c0_251, %c0_252, %c2368_253] : memref<1x1x3136xf32, #tpu.memory_space<vmem>>, vector<1x1x128xf32>
    %193 = vector.shape_cast %192 : vector<1x1x128xf32> to vector<1x128xf32>
    %c32 = arith.constant 32 : index
    %c0_254 = arith.constant 0 : index
    %194 = vector.load %arg11[%c32, %c0_254] : memref<36x256xf32, #tpu.memory_space<vmem>>, vector<1x128xf32>
    tpu.vector_store %arg11[%c32, %c0_254], %193 {strides = array<i32>} : memref<36x256xf32, #tpu.memory_space<vmem>>, vector<1x128xf32>,
    %c0_255 = arith.constant 0 : index
    %c0_256 = arith.constant 0 : index
    %c2816 = arith.constant 2816 : index
    %195 = vector.load %arg1[%c0_255, %c0_256, %c2816] : memref<1x1x3136xf32, #tpu.memory_space<vmem>>, vector<1x1x128xf32>
    %196 = vector.shape_cast %195 : vector<1x1x128xf32> to vector<1x128xf32>
    %c32_257 = arith.constant 32 : index
    %c128_258 = arith.constant 128 : index
    %197 = vector.load %arg11[%c32_257, %c128_258] : memref<36x256xf32, #tpu.memory_space<vmem>>, vector<1x128xf32>
    tpu.vector_store %arg11[%c32_257, %c128_258], %196 {strides = array<i32>} : memref<36x256xf32, #tpu.memory_space<vmem>>, vector<1x128xf32>,
    %c0_259 = arith.constant 0 : index
    %c0_260 = arith.constant 0 : index
    %c2432_261 = arith.constant 2432 : index
    %198 = vector.load %arg1[%c0_259, %c0_260, %c2432_261] : memref<1x1x3136xf32, #tpu.memory_space<vmem>>, vector<1x1x128xf32>
    %199 = vector.shape_cast %198 : vector<1x1x128xf32> to vector<1x128xf32>
    %c33 = arith.constant 33 : index
    %c0_262 = arith.constant 0 : index
    %200 = vector.load %arg11[%c33, %c0_262] : memref<36x256xf32, #tpu.memory_space<vmem>>, vector<1x128xf32>
    tpu.vector_store %arg11[%c33, %c0_262], %199 {strides = array<i32>} : memref<36x256xf32, #tpu.memory_space<vmem>>, vector<1x128xf32>,
    %c0_263 = arith.constant 0 : index
    %c0_264 = arith.constant 0 : index
    %c2880 = arith.constant 2880 : index
    %201 = vector.load %arg1[%c0_263, %c0_264, %c2880] : memref<1x1x3136xf32, #tpu.memory_space<vmem>>, vector<1x1x128xf32>
    %202 = vector.shape_cast %201 : vector<1x1x128xf32> to vector<1x128xf32>
    %c33_265 = arith.constant 33 : index
    %c128_266 = arith.constant 128 : index
    %203 = vector.load %arg11[%c33_265, %c128_266] : memref<36x256xf32, #tpu.memory_space<vmem>>, vector<1x128xf32>
    tpu.vector_store %arg11[%c33_265, %c128_266], %202 {strides = array<i32>} : memref<36x256xf32, #tpu.memory_space<vmem>>, vector<1x128xf32>,
    %c0_267 = arith.constant 0 : index
    %c0_268 = arith.constant 0 : index
    %c2496_269 = arith.constant 2496 : index
    %204 = vector.load %arg1[%c0_267, %c0_268, %c2496_269] : memref<1x1x3136xf32, #tpu.memory_space<vmem>>, vector<1x1x128xf32>
    %205 = vector.shape_cast %204 : vector<1x1x128xf32> to vector<1x128xf32>
    %c34 = arith.constant 34 : index
    %c0_270 = arith.constant 0 : index
    %206 = vector.load %arg11[%c34, %c0_270] : memref<36x256xf32, #tpu.memory_space<vmem>>, vector<1x128xf32>
    tpu.vector_store %arg11[%c34, %c0_270], %205 {strides = array<i32>} : memref<36x256xf32, #tpu.memory_space<vmem>>, vector<1x128xf32>,
    %c0_271 = arith.constant 0 : index
    %c0_272 = arith.constant 0 : index
    %c2944 = arith.constant 2944 : index
    %207 = vector.load %arg1[%c0_271, %c0_272, %c2944] : memref<1x1x3136xf32, #tpu.memory_space<vmem>>, vector<1x1x128xf32>
    %208 = vector.shape_cast %207 : vector<1x1x128xf32> to vector<1x128xf32>
    %c34_273 = arith.constant 34 : index
    %c128_274 = arith.constant 128 : index
    %209 = vector.load %arg11[%c34_273, %c128_274] : memref<36x256xf32, #tpu.memory_space<vmem>>, vector<1x128xf32>
    tpu.vector_store %arg11[%c34_273, %c128_274], %208 {strides = array<i32>} : memref<36x256xf32, #tpu.memory_space<vmem>>, vector<1x128xf32>,
    %c0_275 = arith.constant 0 : index
    %c0_276 = arith.constant 0 : index
    %c2560_277 = arith.constant 2560 : index
    %210 = vector.load %arg1[%c0_275, %c0_276, %c2560_277] : memref<1x1x3136xf32, #tpu.memory_space<vmem>>, vector<1x1x128xf32>
    %211 = vector.shape_cast %210 : vector<1x1x128xf32> to vector<1x128xf32>
    %c35 = arith.constant 35 : index
    %c0_278 = arith.constant 0 : index
    %212 = vector.load %arg11[%c35, %c0_278] : memref<36x256xf32, #tpu.memory_space<vmem>>, vector<1x128xf32>
    tpu.vector_store %arg11[%c35, %c0_278], %211 {strides = array<i32>} : memref<36x256xf32, #tpu.memory_space<vmem>>, vector<1x128xf32>,
    %c0_279 = arith.constant 0 : index
    %c0_280 = arith.constant 0 : index
    %c3008 = arith.constant 3008 : index
    %213 = vector.load %arg1[%c0_279, %c0_280, %c3008] : memref<1x1x3136xf32, #tpu.memory_space<vmem>>, vector<1x1x128xf32>
    %214 = vector.shape_cast %213 : vector<1x1x128xf32> to vector<1x128xf32>
    %c35_281 = arith.constant 35 : index
    %c128_282 = arith.constant 128 : index
    %215 = vector.load %arg11[%c35_281, %c128_282] : memref<36x256xf32, #tpu.memory_space<vmem>>, vector<1x128xf32>
    tpu.vector_store %arg11[%c35_281, %c128_282], %214 {strides = array<i32>} : memref<36x256xf32, #tpu.memory_space<vmem>>, vector<1x128xf32>,
    %c0_283 = arith.constant 0 : index
    %c0_284 = arith.constant 0 : index
    %216 = vector.load %arg11[%c0_283, %c0_284] : memref<36x256xf32, #tpu.memory_space<vmem>>, vector<36x256xf32>
    %c0_285 = arith.constant 0 : index
    %c0_286 = arith.constant 0 : index
    %217 = vector.load %arg2[%c0_285, %c0_286] : memref<256x16xf32, #tpu.memory_space<vmem>>, vector<256x16xf32>
    %cst = arith.constant dense<0.000000e+00> : vector<36x16xf32>
    %218 = tpu.matmul %216, %217, %cst {dimension_numbers = #tpu.dot_dimension_numbers<[1], [0], [0], [1], [0, 0, 1, 1], [], []>} : vector<36x256xf32>, vector<256x16xf32>, vector<36x16xf32> -> vector<36x16xf32>
    %c0_287 = arith.constant 0 : index
    %c0_288 = arith.constant 0 : index
    %219 = vector.load %arg3[%c0_287, %c0_288] : memref<1x16xf32, #tpu.memory_space<vmem>>, vector<1x16xf32>
    %220 = vector.broadcast %219 : vector<1x16xf32> to vector<36x16xf32>
    %221 = arith.addf %218, %220 : vector<36x16xf32>
    %cst_289 = arith.constant 0.000000e+00 : f32
    %222 = vector.broadcast %cst_289 : f32 to vector<36x16xf32>
    %223 = arith.maximumf %221, %222 : vector<36x16xf32>
    %c0_290 = arith.constant 0 : index
    %c0_291 = arith.constant 0 : index
    %224 = vector.load %arg12[%c0_290, %c0_291] : memref<36x16xf32, #tpu.memory_space<vmem>>, vector<36x16xf32>
    tpu.vector_store %arg12[%c0_290, %c0_291], %223 {strides = array<i32>} : memref<36x16xf32, #tpu.memory_space<vmem>>, vector<36x16xf32>,
    %c0_292 = arith.constant 0 : index
    %c0_293 = arith.constant 0 : index
    %225 = vector.load %arg12[%c0_292, %c0_293] : memref<36x16xf32, #tpu.memory_space<vmem>>, vector<1x16xf32>
    %c0_294 = arith.constant 0 : index
    %c0_295 = arith.constant 0 : index
    %226 = vector.load %arg13[%c0_294, %c0_295] : memref<4x256xf32, #tpu.memory_space<vmem>>, vector<1x16xf32>
    tpu.vector_store %arg13[%c0_294, %c0_295], %225 {strides = array<i32>} : memref<4x256xf32, #tpu.memory_space<vmem>>, vector<1x16xf32>,
    %c1_296 = arith.constant 1 : index
    %c0_297 = arith.constant 0 : index
    %227 = vector.load %arg12[%c1_296, %c0_297] : memref<36x16xf32, #tpu.memory_space<vmem>>, vector<1x16xf32>
    %c0_298 = arith.constant 0 : index
    %c16_299 = arith.constant 16 : index
    %228 = vector.load %arg13[%c0_298, %c16_299] : memref<4x256xf32, #tpu.memory_space<vmem>>, vector<1x16xf32>
    tpu.vector_store %arg13[%c0_298, %c16_299], %227 {strides = array<i32>} : memref<4x256xf32, #tpu.memory_space<vmem>>, vector<1x16xf32>,
    %c2_300 = arith.constant 2 : index
    %c0_301 = arith.constant 0 : index
    %229 = vector.load %arg12[%c2_300, %c0_301] : memref<36x16xf32, #tpu.memory_space<vmem>>, vector<1x16xf32>
    %c0_302 = arith.constant 0 : index
    %c32_303 = arith.constant 32 : index
    %230 = vector.load %arg13[%c0_302, %c32_303] : memref<4x256xf32, #tpu.memory_space<vmem>>, vector<1x16xf32>
    tpu.vector_store %arg13[%c0_302, %c32_303], %229 {strides = array<i32>} : memref<4x256xf32, #tpu.memory_space<vmem>>, vector<1x16xf32>,
    %c3_304 = arith.constant 3 : index
    %c0_305 = arith.constant 0 : index
    %231 = vector.load %arg12[%c3_304, %c0_305] : memref<36x16xf32, #tpu.memory_space<vmem>>, vector<1x16xf32>
    %c0_306 = arith.constant 0 : index
    %c48 = arith.constant 48 : index
    %232 = vector.load %arg13[%c0_306, %c48] : memref<4x256xf32, #tpu.memory_space<vmem>>, vector<1x16xf32>
    tpu.vector_store %arg13[%c0_306, %c48], %231 {strides = array<i32>} : memref<4x256xf32, #tpu.memory_space<vmem>>, vector<1x16xf32>,
    %c6_307 = arith.constant 6 : index
    %c0_308 = arith.constant 0 : index
    %233 = vector.load %arg12[%c6_307, %c0_308] : memref<36x16xf32, #tpu.memory_space<vmem>>, vector<1x16xf32>
    %c0_309 = arith.constant 0 : index
    %c64_310 = arith.constant 64 : index
    %234 = vector.load %arg13[%c0_309, %c64_310] : memref<4x256xf32, #tpu.memory_space<vmem>>, vector<1x16xf32>
    tpu.vector_store %arg13[%c0_309, %c64_310], %233 {strides = array<i32>} : memref<4x256xf32, #tpu.memory_space<vmem>>, vector<1x16xf32>,
    %c7_311 = arith.constant 7 : index
    %c0_312 = arith.constant 0 : index
    %235 = vector.load %arg12[%c7_311, %c0_312] : memref<36x16xf32, #tpu.memory_space<vmem>>, vector<1x16xf32>
    %c0_313 = arith.constant 0 : index
    %c80 = arith.constant 80 : index
    %236 = vector.load %arg13[%c0_313, %c80] : memref<4x256xf32, #tpu.memory_space<vmem>>, vector<1x16xf32>
    tpu.vector_store %arg13[%c0_313, %c80], %235 {strides = array<i32>} : memref<4x256xf32, #tpu.memory_space<vmem>>, vector<1x16xf32>,
    %c8_314 = arith.constant 8 : index
    %c0_315 = arith.constant 0 : index
    %237 = vector.load %arg12[%c8_314, %c0_315] : memref<36x16xf32, #tpu.memory_space<vmem>>, vector<1x16xf32>
    %c0_316 = arith.constant 0 : index
    %c96 = arith.constant 96 : index
    %238 = vector.load %arg13[%c0_316, %c96] : memref<4x256xf32, #tpu.memory_space<vmem>>, vector<1x16xf32>
    tpu.vector_store %arg13[%c0_316, %c96], %237 {strides = array<i32>} : memref<4x256xf32, #tpu.memory_space<vmem>>, vector<1x16xf32>,
    %c9_317 = arith.constant 9 : index
    %c0_318 = arith.constant 0 : index
    %239 = vector.load %arg12[%c9_317, %c0_318] : memref<36x16xf32, #tpu.memory_space<vmem>>, vector<1x16xf32>
    %c0_319 = arith.constant 0 : index
    %c112 = arith.constant 112 : index
    %240 = vector.load %arg13[%c0_319, %c112] : memref<4x256xf32, #tpu.memory_space<vmem>>, vector<1x16xf32>
    tpu.vector_store %arg13[%c0_319, %c112], %239 {strides = array<i32>} : memref<4x256xf32, #tpu.memory_space<vmem>>, vector<1x16xf32>,
    %c12_320 = arith.constant 12 : index
    %c0_321 = arith.constant 0 : index
    %241 = vector.load %arg12[%c12_320, %c0_321] : memref<36x16xf32, #tpu.memory_space<vmem>>, vector<1x16xf32>
    %c0_322 = arith.constant 0 : index
    %c128_323 = arith.constant 128 : index
    %242 = vector.load %arg13[%c0_322, %c128_323] : memref<4x256xf32, #tpu.memory_space<vmem>>, vector<1x16xf32>
    tpu.vector_store %arg13[%c0_322, %c128_323], %241 {strides = array<i32>} : memref<4x256xf32, #tpu.memory_space<vmem>>, vector<1x16xf32>,
    %c13_324 = arith.constant 13 : index
    %c0_325 = arith.constant 0 : index
    %243 = vector.load %arg12[%c13_324, %c0_325] : memref<36x16xf32, #tpu.memory_space<vmem>>, vector<1x16xf32>
    %c0_326 = arith.constant 0 : index
    %c144 = arith.constant 144 : index
    %244 = vector.load %arg13[%c0_326, %c144] : memref<4x256xf32, #tpu.memory_space<vmem>>, vector<1x16xf32>
    tpu.vector_store %arg13[%c0_326, %c144], %243 {strides = array<i32>} : memref<4x256xf32, #tpu.memory_space<vmem>>, vector<1x16xf32>,
    %c14_327 = arith.constant 14 : index
    %c0_328 = arith.constant 0 : index
    %245 = vector.load %arg12[%c14_327, %c0_328] : memref<36x16xf32, #tpu.memory_space<vmem>>, vector<1x16xf32>
    %c0_329 = arith.constant 0 : index
    %c160 = arith.constant 160 : index
    %246 = vector.load %arg13[%c0_329, %c160] : memref<4x256xf32, #tpu.memory_space<vmem>>, vector<1x16xf32>
    tpu.vector_store %arg13[%c0_329, %c160], %245 {strides = array<i32>} : memref<4x256xf32, #tpu.memory_space<vmem>>, vector<1x16xf32>,
    %c15_330 = arith.constant 15 : index
    %c0_331 = arith.constant 0 : index
    %247 = vector.load %arg12[%c15_330, %c0_331] : memref<36x16xf32, #tpu.memory_space<vmem>>, vector<1x16xf32>
    %c0_332 = arith.constant 0 : index
    %c176 = arith.constant 176 : index
    %248 = vector.load %arg13[%c0_332, %c176] : memref<4x256xf32, #tpu.memory_space<vmem>>, vector<1x16xf32>
    tpu.vector_store %arg13[%c0_332, %c176], %247 {strides = array<i32>} : memref<4x256xf32, #tpu.memory_space<vmem>>, vector<1x16xf32>,
    %c18_333 = arith.constant 18 : index
    %c0_334 = arith.constant 0 : index
    %249 = vector.load %arg12[%c18_333, %c0_334] : memref<36x16xf32, #tpu.memory_space<vmem>>, vector<1x16xf32>
    %c0_335 = arith.constant 0 : index
    %c192_336 = arith.constant 192 : index
    %250 = vector.load %arg13[%c0_335, %c192_336] : memref<4x256xf32, #tpu.memory_space<vmem>>, vector<1x16xf32>
    tpu.vector_store %arg13[%c0_335, %c192_336], %249 {strides = array<i32>} : memref<4x256xf32, #tpu.memory_space<vmem>>, vector<1x16xf32>,
    %c19_337 = arith.constant 19 : index
    %c0_338 = arith.constant 0 : index
    %251 = vector.load %arg12[%c19_337, %c0_338] : memref<36x16xf32, #tpu.memory_space<vmem>>, vector<1x16xf32>
    %c0_339 = arith.constant 0 : index
    %c208 = arith.constant 208 : index
    %252 = vector.load %arg13[%c0_339, %c208] : memref<4x256xf32, #tpu.memory_space<vmem>>, vector<1x16xf32>
    tpu.vector_store %arg13[%c0_339, %c208], %251 {strides = array<i32>} : memref<4x256xf32, #tpu.memory_space<vmem>>, vector<1x16xf32>,
    %c20_340 = arith.constant 20 : index
    %c0_341 = arith.constant 0 : index
    %253 = vector.load %arg12[%c20_340, %c0_341] : memref<36x16xf32, #tpu.memory_space<vmem>>, vector<1x16xf32>
    %c0_342 = arith.constant 0 : index
    %c224 = arith.constant 224 : index
    %254 = vector.load %arg13[%c0_342, %c224] : memref<4x256xf32, #tpu.memory_space<vmem>>, vector<1x16xf32>
    tpu.vector_store %arg13[%c0_342, %c224], %253 {strides = array<i32>} : memref<4x256xf32, #tpu.memory_space<vmem>>, vector<1x16xf32>,
    %c21_343 = arith.constant 21 : index
    %c0_344 = arith.constant 0 : index
    %255 = vector.load %arg12[%c21_343, %c0_344] : memref<36x16xf32, #tpu.memory_space<vmem>>, vector<1x16xf32>
    %c0_345 = arith.constant 0 : index
    %c240 = arith.constant 240 : index
    %256 = vector.load %arg13[%c0_345, %c240] : memref<4x256xf32, #tpu.memory_space<vmem>>, vector<1x16xf32>
    tpu.vector_store %arg13[%c0_345, %c240], %255 {strides = array<i32>} : memref<4x256xf32, #tpu.memory_space<vmem>>, vector<1x16xf32>,
    %c2_346 = arith.constant 2 : index
    %c0_347 = arith.constant 0 : index
    %257 = vector.load %arg12[%c2_346, %c0_347] : memref<36x16xf32, #tpu.memory_space<vmem>>, vector<1x16xf32>
    %c1_348 = arith.constant 1 : index
    %c0_349 = arith.constant 0 : index
    %258 = vector.load %arg13[%c1_348, %c0_349] : memref<4x256xf32, #tpu.memory_space<vmem>>, vector<1x16xf32>
    tpu.vector_store %arg13[%c1_348, %c0_349], %257 {strides = array<i32>} : memref<4x256xf32, #tpu.memory_space<vmem>>, vector<1x16xf32>,
    %c3_350 = arith.constant 3 : index
    %c0_351 = arith.constant 0 : index
    %259 = vector.load %arg12[%c3_350, %c0_351] : memref<36x16xf32, #tpu.memory_space<vmem>>, vector<1x16xf32>
    %c1_352 = arith.constant 1 : index
    %c16_353 = arith.constant 16 : index
    %260 = vector.load %arg13[%c1_352, %c16_353] : memref<4x256xf32, #tpu.memory_space<vmem>>, vector<1x16xf32>
    tpu.vector_store %arg13[%c1_352, %c16_353], %259 {strides = array<i32>} : memref<4x256xf32, #tpu.memory_space<vmem>>, vector<1x16xf32>,
    %c4_354 = arith.constant 4 : index
    %c0_355 = arith.constant 0 : index
    %261 = vector.load %arg12[%c4_354, %c0_355] : memref<36x16xf32, #tpu.memory_space<vmem>>, vector<1x16xf32>
    %c1_356 = arith.constant 1 : index
    %c32_357 = arith.constant 32 : index
    %262 = vector.load %arg13[%c1_356, %c32_357] : memref<4x256xf32, #tpu.memory_space<vmem>>, vector<1x16xf32>
    tpu.vector_store %arg13[%c1_356, %c32_357], %261 {strides = array<i32>} : memref<4x256xf32, #tpu.memory_space<vmem>>, vector<1x16xf32>,
    %c5_358 = arith.constant 5 : index
    %c0_359 = arith.constant 0 : index
    %263 = vector.load %arg12[%c5_358, %c0_359] : memref<36x16xf32, #tpu.memory_space<vmem>>, vector<1x16xf32>
    %c1_360 = arith.constant 1 : index
    %c48_361 = arith.constant 48 : index
    %264 = vector.load %arg13[%c1_360, %c48_361] : memref<4x256xf32, #tpu.memory_space<vmem>>, vector<1x16xf32>
    tpu.vector_store %arg13[%c1_360, %c48_361], %263 {strides = array<i32>} : memref<4x256xf32, #tpu.memory_space<vmem>>, vector<1x16xf32>,
    %c8_362 = arith.constant 8 : index
    %c0_363 = arith.constant 0 : index
    %265 = vector.load %arg12[%c8_362, %c0_363] : memref<36x16xf32, #tpu.memory_space<vmem>>, vector<1x16xf32>
    %c1_364 = arith.constant 1 : index
    %c64_365 = arith.constant 64 : index
    %266 = vector.load %arg13[%c1_364, %c64_365] : memref<4x256xf32, #tpu.memory_space<vmem>>, vector<1x16xf32>
    tpu.vector_store %arg13[%c1_364, %c64_365], %265 {strides = array<i32>} : memref<4x256xf32, #tpu.memory_space<vmem>>, vector<1x16xf32>,
    %c9_366 = arith.constant 9 : index
    %c0_367 = arith.constant 0 : index
    %267 = vector.load %arg12[%c9_366, %c0_367] : memref<36x16xf32, #tpu.memory_space<vmem>>, vector<1x16xf32>
    %c1_368 = arith.constant 1 : index
    %c80_369 = arith.constant 80 : index
    %268 = vector.load %arg13[%c1_368, %c80_369] : memref<4x256xf32, #tpu.memory_space<vmem>>, vector<1x16xf32>
    tpu.vector_store %arg13[%c1_368, %c80_369], %267 {strides = array<i32>} : memref<4x256xf32, #tpu.memory_space<vmem>>, vector<1x16xf32>,
    %c10_370 = arith.constant 10 : index
    %c0_371 = arith.constant 0 : index
    %269 = vector.load %arg12[%c10_370, %c0_371] : memref<36x16xf32, #tpu.memory_space<vmem>>, vector<1x16xf32>
    %c1_372 = arith.constant 1 : index
    %c96_373 = arith.constant 96 : index
    %270 = vector.load %arg13[%c1_372, %c96_373] : memref<4x256xf32, #tpu.memory_space<vmem>>, vector<1x16xf32>
    tpu.vector_store %arg13[%c1_372, %c96_373], %269 {strides = array<i32>} : memref<4x256xf32, #tpu.memory_space<vmem>>, vector<1x16xf32>,
    %c11_374 = arith.constant 11 : index
    %c0_375 = arith.constant 0 : index
    %271 = vector.load %arg12[%c11_374, %c0_375] : memref<36x16xf32, #tpu.memory_space<vmem>>, vector<1x16xf32>
    %c1_376 = arith.constant 1 : index
    %c112_377 = arith.constant 112 : index
    %272 = vector.load %arg13[%c1_376, %c112_377] : memref<4x256xf32, #tpu.memory_space<vmem>>, vector<1x16xf32>
    tpu.vector_store %arg13[%c1_376, %c112_377], %271 {strides = array<i32>} : memref<4x256xf32, #tpu.memory_space<vmem>>, vector<1x16xf32>,
    %c14_378 = arith.constant 14 : index
    %c0_379 = arith.constant 0 : index
    %273 = vector.load %arg12[%c14_378, %c0_379] : memref<36x16xf32, #tpu.memory_space<vmem>>, vector<1x16xf32>
    %c1_380 = arith.constant 1 : index
    %c128_381 = arith.constant 128 : index
    %274 = vector.load %arg13[%c1_380, %c128_381] : memref<4x256xf32, #tpu.memory_space<vmem>>, vector<1x16xf32>
    tpu.vector_store %arg13[%c1_380, %c128_381], %273 {strides = array<i32>} : memref<4x256xf32, #tpu.memory_space<vmem>>, vector<1x16xf32>,
    %c15_382 = arith.constant 15 : index
    %c0_383 = arith.constant 0 : index
    %275 = vector.load %arg12[%c15_382, %c0_383] : memref<36x16xf32, #tpu.memory_space<vmem>>, vector<1x16xf32>
    %c1_384 = arith.constant 1 : index
    %c144_385 = arith.constant 144 : index
    %276 = vector.load %arg13[%c1_384, %c144_385] : memref<4x256xf32, #tpu.memory_space<vmem>>, vector<1x16xf32>
    tpu.vector_store %arg13[%c1_384, %c144_385], %275 {strides = array<i32>} : memref<4x256xf32, #tpu.memory_space<vmem>>, vector<1x16xf32>,
    %c16_386 = arith.constant 16 : index
    %c0_387 = arith.constant 0 : index
    %277 = vector.load %arg12[%c16_386, %c0_387] : memref<36x16xf32, #tpu.memory_space<vmem>>, vector<1x16xf32>
    %c1_388 = arith.constant 1 : index
    %c160_389 = arith.constant 160 : index
    %278 = vector.load %arg13[%c1_388, %c160_389] : memref<4x256xf32, #tpu.memory_space<vmem>>, vector<1x16xf32>
    tpu.vector_store %arg13[%c1_388, %c160_389], %277 {strides = array<i32>} : memref<4x256xf32, #tpu.memory_space<vmem>>, vector<1x16xf32>,
    %c17_390 = arith.constant 17 : index
    %c0_391 = arith.constant 0 : index
    %279 = vector.load %arg12[%c17_390, %c0_391] : memref<36x16xf32, #tpu.memory_space<vmem>>, vector<1x16xf32>
    %c1_392 = arith.constant 1 : index
    %c176_393 = arith.constant 176 : index
    %280 = vector.load %arg13[%c1_392, %c176_393] : memref<4x256xf32, #tpu.memory_space<vmem>>, vector<1x16xf32>
    tpu.vector_store %arg13[%c1_392, %c176_393], %279 {strides = array<i32>} : memref<4x256xf32, #tpu.memory_space<vmem>>, vector<1x16xf32>,
    %c20_394 = arith.constant 20 : index
    %c0_395 = arith.constant 0 : index
    %281 = vector.load %arg12[%c20_394, %c0_395] : memref<36x16xf32, #tpu.memory_space<vmem>>, vector<1x16xf32>
    %c1_396 = arith.constant 1 : index
    %c192_397 = arith.constant 192 : index
    %282 = vector.load %arg13[%c1_396, %c192_397] : memref<4x256xf32, #tpu.memory_space<vmem>>, vector<1x16xf32>
    tpu.vector_store %arg13[%c1_396, %c192_397], %281 {strides = array<i32>} : memref<4x256xf32, #tpu.memory_space<vmem>>, vector<1x16xf32>,
    %c21_398 = arith.constant 21 : index
    %c0_399 = arith.constant 0 : index
    %283 = vector.load %arg12[%c21_398, %c0_399] : memref<36x16xf32, #tpu.memory_space<vmem>>, vector<1x16xf32>
    %c1_400 = arith.constant 1 : index
    %c208_401 = arith.constant 208 : index
    %284 = vector.load %arg13[%c1_400, %c208_401] : memref<4x256xf32, #tpu.memory_space<vmem>>, vector<1x16xf32>
    tpu.vector_store %arg13[%c1_400, %c208_401], %283 {strides = array<i32>} : memref<4x256xf32, #tpu.memory_space<vmem>>, vector<1x16xf32>,
    %c22_402 = arith.constant 22 : index
    %c0_403 = arith.constant 0 : index
    %285 = vector.load %arg12[%c22_402, %c0_403] : memref<36x16xf32, #tpu.memory_space<vmem>>, vector<1x16xf32>
    %c1_404 = arith.constant 1 : index
    %c224_405 = arith.constant 224 : index
    %286 = vector.load %arg13[%c1_404, %c224_405] : memref<4x256xf32, #tpu.memory_space<vmem>>, vector<1x16xf32>
    tpu.vector_store %arg13[%c1_404, %c224_405], %285 {strides = array<i32>} : memref<4x256xf32, #tpu.memory_space<vmem>>, vector<1x16xf32>,
    %c23_406 = arith.constant 23 : index
    %c0_407 = arith.constant 0 : index
    %287 = vector.load %arg12[%c23_406, %c0_407] : memref<36x16xf32, #tpu.memory_space<vmem>>, vector<1x16xf32>
    %c1_408 = arith.constant 1 : index
    %c240_409 = arith.constant 240 : index
    %288 = vector.load %arg13[%c1_408, %c240_409] : memref<4x256xf32, #tpu.memory_space<vmem>>, vector<1x16xf32>
    tpu.vector_store %arg13[%c1_408, %c240_409], %287 {strides = array<i32>} : memref<4x256xf32, #tpu.memory_space<vmem>>, vector<1x16xf32>,
    %c12_410 = arith.constant 12 : index
    %c0_411 = arith.constant 0 : index
    %289 = vector.load %arg12[%c12_410, %c0_411] : memref<36x16xf32, #tpu.memory_space<vmem>>, vector<1x16xf32>
    %c2_412 = arith.constant 2 : index
    %c0_413 = arith.constant 0 : index
    %290 = vector.load %arg13[%c2_412, %c0_413] : memref<4x256xf32, #tpu.memory_space<vmem>>, vector<1x16xf32>
    tpu.vector_store %arg13[%c2_412, %c0_413], %289 {strides = array<i32>} : memref<4x256xf32, #tpu.memory_space<vmem>>, vector<1x16xf32>,
    %c13_414 = arith.constant 13 : index
    %c0_415 = arith.constant 0 : index
    %291 = vector.load %arg12[%c13_414, %c0_415] : memref<36x16xf32, #tpu.memory_space<vmem>>, vector<1x16xf32>
    %c2_416 = arith.constant 2 : index
    %c16_417 = arith.constant 16 : index
    %292 = vector.load %arg13[%c2_416, %c16_417] : memref<4x256xf32, #tpu.memory_space<vmem>>, vector<1x16xf32>
    tpu.vector_store %arg13[%c2_416, %c16_417], %291 {strides = array<i32>} : memref<4x256xf32, #tpu.memory_space<vmem>>, vector<1x16xf32>,
    %c14_418 = arith.constant 14 : index
    %c0_419 = arith.constant 0 : index
    %293 = vector.load %arg12[%c14_418, %c0_419] : memref<36x16xf32, #tpu.memory_space<vmem>>, vector<1x16xf32>
    %c2_420 = arith.constant 2 : index
    %c32_421 = arith.constant 32 : index
    %294 = vector.load %arg13[%c2_420, %c32_421] : memref<4x256xf32, #tpu.memory_space<vmem>>, vector<1x16xf32>
    tpu.vector_store %arg13[%c2_420, %c32_421], %293 {strides = array<i32>} : memref<4x256xf32, #tpu.memory_space<vmem>>, vector<1x16xf32>,
    %c15_422 = arith.constant 15 : index
    %c0_423 = arith.constant 0 : index
    %295 = vector.load %arg12[%c15_422, %c0_423] : memref<36x16xf32, #tpu.memory_space<vmem>>, vector<1x16xf32>
    %c2_424 = arith.constant 2 : index
    %c48_425 = arith.constant 48 : index
    %296 = vector.load %arg13[%c2_424, %c48_425] : memref<4x256xf32, #tpu.memory_space<vmem>>, vector<1x16xf32>
    tpu.vector_store %arg13[%c2_424, %c48_425], %295 {strides = array<i32>} : memref<4x256xf32, #tpu.memory_space<vmem>>, vector<1x16xf32>,
    %c18_426 = arith.constant 18 : index
    %c0_427 = arith.constant 0 : index
    %297 = vector.load %arg12[%c18_426, %c0_427] : memref<36x16xf32, #tpu.memory_space<vmem>>, vector<1x16xf32>
    %c2_428 = arith.constant 2 : index
    %c64_429 = arith.constant 64 : index
    %298 = vector.load %arg13[%c2_428, %c64_429] : memref<4x256xf32, #tpu.memory_space<vmem>>, vector<1x16xf32>
    tpu.vector_store %arg13[%c2_428, %c64_429], %297 {strides = array<i32>} : memref<4x256xf32, #tpu.memory_space<vmem>>, vector<1x16xf32>,
    %c19_430 = arith.constant 19 : index
    %c0_431 = arith.constant 0 : index
    %299 = vector.load %arg12[%c19_430, %c0_431] : memref<36x16xf32, #tpu.memory_space<vmem>>, vector<1x16xf32>
    %c2_432 = arith.constant 2 : index
    %c80_433 = arith.constant 80 : index
    %300 = vector.load %arg13[%c2_432, %c80_433] : memref<4x256xf32, #tpu.memory_space<vmem>>, vector<1x16xf32>
    tpu.vector_store %arg13[%c2_432, %c80_433], %299 {strides = array<i32>} : memref<4x256xf32, #tpu.memory_space<vmem>>, vector<1x16xf32>,
    %c20_434 = arith.constant 20 : index
    %c0_435 = arith.constant 0 : index
    %301 = vector.load %arg12[%c20_434, %c0_435] : memref<36x16xf32, #tpu.memory_space<vmem>>, vector<1x16xf32>
    %c2_436 = arith.constant 2 : index
    %c96_437 = arith.constant 96 : index
    %302 = vector.load %arg13[%c2_436, %c96_437] : memref<4x256xf32, #tpu.memory_space<vmem>>, vector<1x16xf32>
    tpu.vector_store %arg13[%c2_436, %c96_437], %301 {strides = array<i32>} : memref<4x256xf32, #tpu.memory_space<vmem>>, vector<1x16xf32>,
    %c21_438 = arith.constant 21 : index
    %c0_439 = arith.constant 0 : index
    %303 = vector.load %arg12[%c21_438, %c0_439] : memref<36x16xf32, #tpu.memory_space<vmem>>, vector<1x16xf32>
    %c2_440 = arith.constant 2 : index
    %c112_441 = arith.constant 112 : index
    %304 = vector.load %arg13[%c2_440, %c112_441] : memref<4x256xf32, #tpu.memory_space<vmem>>, vector<1x16xf32>
    tpu.vector_store %arg13[%c2_440, %c112_441], %303 {strides = array<i32>} : memref<4x256xf32, #tpu.memory_space<vmem>>, vector<1x16xf32>,
    %c24_442 = arith.constant 24 : index
    %c0_443 = arith.constant 0 : index
    %305 = vector.load %arg12[%c24_442, %c0_443] : memref<36x16xf32, #tpu.memory_space<vmem>>, vector<1x16xf32>
    %c2_444 = arith.constant 2 : index
    %c128_445 = arith.constant 128 : index
    %306 = vector.load %arg13[%c2_444, %c128_445] : memref<4x256xf32, #tpu.memory_space<vmem>>, vector<1x16xf32>
    tpu.vector_store %arg13[%c2_444, %c128_445], %305 {strides = array<i32>} : memref<4x256xf32, #tpu.memory_space<vmem>>, vector<1x16xf32>,
    %c25_446 = arith.constant 25 : index
    %c0_447 = arith.constant 0 : index
    %307 = vector.load %arg12[%c25_446, %c0_447] : memref<36x16xf32, #tpu.memory_space<vmem>>, vector<1x16xf32>
    %c2_448 = arith.constant 2 : index
    %c144_449 = arith.constant 144 : index
    %308 = vector.load %arg13[%c2_448, %c144_449] : memref<4x256xf32, #tpu.memory_space<vmem>>, vector<1x16xf32>
    tpu.vector_store %arg13[%c2_448, %c144_449], %307 {strides = array<i32>} : memref<4x256xf32, #tpu.memory_space<vmem>>, vector<1x16xf32>,
    %c26_450 = arith.constant 26 : index
    %c0_451 = arith.constant 0 : index
    %309 = vector.load %arg12[%c26_450, %c0_451] : memref<36x16xf32, #tpu.memory_space<vmem>>, vector<1x16xf32>
    %c2_452 = arith.constant 2 : index
    %c160_453 = arith.constant 160 : index
    %310 = vector.load %arg13[%c2_452, %c160_453] : memref<4x256xf32, #tpu.memory_space<vmem>>, vector<1x16xf32>
    tpu.vector_store %arg13[%c2_452, %c160_453], %309 {strides = array<i32>} : memref<4x256xf32, #tpu.memory_space<vmem>>, vector<1x16xf32>,
    %c27_454 = arith.constant 27 : index
    %c0_455 = arith.constant 0 : index
    %311 = vector.load %arg12[%c27_454, %c0_455] : memref<36x16xf32, #tpu.memory_space<vmem>>, vector<1x16xf32>
    %c2_456 = arith.constant 2 : index
    %c176_457 = arith.constant 176 : index
    %312 = vector.load %arg13[%c2_456, %c176_457] : memref<4x256xf32, #tpu.memory_space<vmem>>, vector<1x16xf32>
    tpu.vector_store %arg13[%c2_456, %c176_457], %311 {strides = array<i32>} : memref<4x256xf32, #tpu.memory_space<vmem>>, vector<1x16xf32>,
    %c30_458 = arith.constant 30 : index
    %c0_459 = arith.constant 0 : index
    %313 = vector.load %arg12[%c30_458, %c0_459] : memref<36x16xf32, #tpu.memory_space<vmem>>, vector<1x16xf32>
    %c2_460 = arith.constant 2 : index
    %c192_461 = arith.constant 192 : index
    %314 = vector.load %arg13[%c2_460, %c192_461] : memref<4x256xf32, #tpu.memory_space<vmem>>, vector<1x16xf32>
    tpu.vector_store %arg13[%c2_460, %c192_461], %313 {strides = array<i32>} : memref<4x256xf32, #tpu.memory_space<vmem>>, vector<1x16xf32>,
    %c31_462 = arith.constant 31 : index
    %c0_463 = arith.constant 0 : index
    %315 = vector.load %arg12[%c31_462, %c0_463] : memref<36x16xf32, #tpu.memory_space<vmem>>, vector<1x16xf32>
    %c2_464 = arith.constant 2 : index
    %c208_465 = arith.constant 208 : index
    %316 = vector.load %arg13[%c2_464, %c208_465] : memref<4x256xf32, #tpu.memory_space<vmem>>, vector<1x16xf32>
    tpu.vector_store %arg13[%c2_464, %c208_465], %315 {strides = array<i32>} : memref<4x256xf32, #tpu.memory_space<vmem>>, vector<1x16xf32>,
    %c32_466 = arith.constant 32 : index
    %c0_467 = arith.constant 0 : index
    %317 = vector.load %arg12[%c32_466, %c0_467] : memref<36x16xf32, #tpu.memory_space<vmem>>, vector<1x16xf32>
    %c2_468 = arith.constant 2 : index
    %c224_469 = arith.constant 224 : index
    %318 = vector.load %arg13[%c2_468, %c224_469] : memref<4x256xf32, #tpu.memory_space<vmem>>, vector<1x16xf32>
    tpu.vector_store %arg13[%c2_468, %c224_469], %317 {strides = array<i32>} : memref<4x256xf32, #tpu.memory_space<vmem>>, vector<1x16xf32>,
    %c33_470 = arith.constant 33 : index
    %c0_471 = arith.constant 0 : index
    %319 = vector.load %arg12[%c33_470, %c0_471] : memref<36x16xf32, #tpu.memory_space<vmem>>, vector<1x16xf32>
    %c2_472 = arith.constant 2 : index
    %c240_473 = arith.constant 240 : index
    %320 = vector.load %arg13[%c2_472, %c240_473] : memref<4x256xf32, #tpu.memory_space<vmem>>, vector<1x16xf32>
    tpu.vector_store %arg13[%c2_472, %c240_473], %319 {strides = array<i32>} : memref<4x256xf32, #tpu.memory_space<vmem>>, vector<1x16xf32>,
    %c14_474 = arith.constant 14 : index
    %c0_475 = arith.constant 0 : index
    %321 = vector.load %arg12[%c14_474, %c0_475] : memref<36x16xf32, #tpu.memory_space<vmem>>, vector<1x16xf32>
    %c3_476 = arith.constant 3 : index
    %c0_477 = arith.constant 0 : index
    %322 = vector.load %arg13[%c3_476, %c0_477] : memref<4x256xf32, #tpu.memory_space<vmem>>, vector<1x16xf32>
    tpu.vector_store %arg13[%c3_476, %c0_477], %321 {strides = array<i32>} : memref<4x256xf32, #tpu.memory_space<vmem>>, vector<1x16xf32>,
    %c15_478 = arith.constant 15 : index
    %c0_479 = arith.constant 0 : index
    %323 = vector.load %arg12[%c15_478, %c0_479] : memref<36x16xf32, #tpu.memory_space<vmem>>, vector<1x16xf32>
    %c3_480 = arith.constant 3 : index
    %c16_481 = arith.constant 16 : index
    %324 = vector.load %arg13[%c3_480, %c16_481] : memref<4x256xf32, #tpu.memory_space<vmem>>, vector<1x16xf32>
    tpu.vector_store %arg13[%c3_480, %c16_481], %323 {strides = array<i32>} : memref<4x256xf32, #tpu.memory_space<vmem>>, vector<1x16xf32>,
    %c16_482 = arith.constant 16 : index
    %c0_483 = arith.constant 0 : index
    %325 = vector.load %arg12[%c16_482, %c0_483] : memref<36x16xf32, #tpu.memory_space<vmem>>, vector<1x16xf32>
    %c3_484 = arith.constant 3 : index
    %c32_485 = arith.constant 32 : index
    %326 = vector.load %arg13[%c3_484, %c32_485] : memref<4x256xf32, #tpu.memory_space<vmem>>, vector<1x16xf32>
    tpu.vector_store %arg13[%c3_484, %c32_485], %325 {strides = array<i32>} : memref<4x256xf32, #tpu.memory_space<vmem>>, vector<1x16xf32>,
    %c17_486 = arith.constant 17 : index
    %c0_487 = arith.constant 0 : index
    %327 = vector.load %arg12[%c17_486, %c0_487] : memref<36x16xf32, #tpu.memory_space<vmem>>, vector<1x16xf32>
    %c3_488 = arith.constant 3 : index
    %c48_489 = arith.constant 48 : index
    %328 = vector.load %arg13[%c3_488, %c48_489] : memref<4x256xf32, #tpu.memory_space<vmem>>, vector<1x16xf32>
    tpu.vector_store %arg13[%c3_488, %c48_489], %327 {strides = array<i32>} : memref<4x256xf32, #tpu.memory_space<vmem>>, vector<1x16xf32>,
    %c20_490 = arith.constant 20 : index
    %c0_491 = arith.constant 0 : index
    %329 = vector.load %arg12[%c20_490, %c0_491] : memref<36x16xf32, #tpu.memory_space<vmem>>, vector<1x16xf32>
    %c3_492 = arith.constant 3 : index
    %c64_493 = arith.constant 64 : index
    %330 = vector.load %arg13[%c3_492, %c64_493] : memref<4x256xf32, #tpu.memory_space<vmem>>, vector<1x16xf32>
    tpu.vector_store %arg13[%c3_492, %c64_493], %329 {strides = array<i32>} : memref<4x256xf32, #tpu.memory_space<vmem>>, vector<1x16xf32>,
    %c21_494 = arith.constant 21 : index
    %c0_495 = arith.constant 0 : index
    %331 = vector.load %arg12[%c21_494, %c0_495] : memref<36x16xf32, #tpu.memory_space<vmem>>, vector<1x16xf32>
    %c3_496 = arith.constant 3 : index
    %c80_497 = arith.constant 80 : index
    %332 = vector.load %arg13[%c3_496, %c80_497] : memref<4x256xf32, #tpu.memory_space<vmem>>, vector<1x16xf32>
    tpu.vector_store %arg13[%c3_496, %c80_497], %331 {strides = array<i32>} : memref<4x256xf32, #tpu.memory_space<vmem>>, vector<1x16xf32>,
    %c22_498 = arith.constant 22 : index
    %c0_499 = arith.constant 0 : index
    %333 = vector.load %arg12[%c22_498, %c0_499] : memref<36x16xf32, #tpu.memory_space<vmem>>, vector<1x16xf32>
    %c3_500 = arith.constant 3 : index
    %c96_501 = arith.constant 96 : index
    %334 = vector.load %arg13[%c3_500, %c96_501] : memref<4x256xf32, #tpu.memory_space<vmem>>, vector<1x16xf32>
    tpu.vector_store %arg13[%c3_500, %c96_501], %333 {strides = array<i32>} : memref<4x256xf32, #tpu.memory_space<vmem>>, vector<1x16xf32>,
    %c23_502 = arith.constant 23 : index
    %c0_503 = arith.constant 0 : index
    %335 = vector.load %arg12[%c23_502, %c0_503] : memref<36x16xf32, #tpu.memory_space<vmem>>, vector<1x16xf32>
    %c3_504 = arith.constant 3 : index
    %c112_505 = arith.constant 112 : index
    %336 = vector.load %arg13[%c3_504, %c112_505] : memref<4x256xf32, #tpu.memory_space<vmem>>, vector<1x16xf32>
    tpu.vector_store %arg13[%c3_504, %c112_505], %335 {strides = array<i32>} : memref<4x256xf32, #tpu.memory_space<vmem>>, vector<1x16xf32>,
    %c26_506 = arith.constant 26 : index
    %c0_507 = arith.constant 0 : index
    %337 = vector.load %arg12[%c26_506, %c0_507] : memref<36x16xf32, #tpu.memory_space<vmem>>, vector<1x16xf32>
    %c3_508 = arith.constant 3 : index
    %c128_509 = arith.constant 128 : index
    %338 = vector.load %arg13[%c3_508, %c128_509] : memref<4x256xf32, #tpu.memory_space<vmem>>, vector<1x16xf32>
    tpu.vector_store %arg13[%c3_508, %c128_509], %337 {strides = array<i32>} : memref<4x256xf32, #tpu.memory_space<vmem>>, vector<1x16xf32>,
    %c27_510 = arith.constant 27 : index
    %c0_511 = arith.constant 0 : index
    %339 = vector.load %arg12[%c27_510, %c0_511] : memref<36x16xf32, #tpu.memory_space<vmem>>, vector<1x16xf32>
    %c3_512 = arith.constant 3 : index
    %c144_513 = arith.constant 144 : index
    %340 = vector.load %arg13[%c3_512, %c144_513] : memref<4x256xf32, #tpu.memory_space<vmem>>, vector<1x16xf32>
    tpu.vector_store %arg13[%c3_512, %c144_513], %339 {strides = array<i32>} : memref<4x256xf32, #tpu.memory_space<vmem>>, vector<1x16xf32>,
    %c28_514 = arith.constant 28 : index
    %c0_515 = arith.constant 0 : index
    %341 = vector.load %arg12[%c28_514, %c0_515] : memref<36x16xf32, #tpu.memory_space<vmem>>, vector<1x16xf32>
    %c3_516 = arith.constant 3 : index
    %c160_517 = arith.constant 160 : index
    %342 = vector.load %arg13[%c3_516, %c160_517] : memref<4x256xf32, #tpu.memory_space<vmem>>, vector<1x16xf32>
    tpu.vector_store %arg13[%c3_516, %c160_517], %341 {strides = array<i32>} : memref<4x256xf32, #tpu.memory_space<vmem>>, vector<1x16xf32>,
    %c29_518 = arith.constant 29 : index
    %c0_519 = arith.constant 0 : index
    %343 = vector.load %arg12[%c29_518, %c0_519] : memref<36x16xf32, #tpu.memory_space<vmem>>, vector<1x16xf32>
    %c3_520 = arith.constant 3 : index
    %c176_521 = arith.constant 176 : index
    %344 = vector.load %arg13[%c3_520, %c176_521] : memref<4x256xf32, #tpu.memory_space<vmem>>, vector<1x16xf32>
    tpu.vector_store %arg13[%c3_520, %c176_521], %343 {strides = array<i32>} : memref<4x256xf32, #tpu.memory_space<vmem>>, vector<1x16xf32>,
    %c32_522 = arith.constant 32 : index
    %c0_523 = arith.constant 0 : index
    %345 = vector.load %arg12[%c32_522, %c0_523] : memref<36x16xf32, #tpu.memory_space<vmem>>, vector<1x16xf32>
    %c3_524 = arith.constant 3 : index
    %c192_525 = arith.constant 192 : index
    %346 = vector.load %arg13[%c3_524, %c192_525] : memref<4x256xf32, #tpu.memory_space<vmem>>, vector<1x16xf32>
    tpu.vector_store %arg13[%c3_524, %c192_525], %345 {strides = array<i32>} : memref<4x256xf32, #tpu.memory_space<vmem>>, vector<1x16xf32>,
    %c33_526 = arith.constant 33 : index
    %c0_527 = arith.constant 0 : index
    %347 = vector.load %arg12[%c33_526, %c0_527] : memref<36x16xf32, #tpu.memory_space<vmem>>, vector<1x16xf32>
    %c3_528 = arith.constant 3 : index
    %c208_529 = arith.constant 208 : index
    %348 = vector.load %arg13[%c3_528, %c208_529] : memref<4x256xf32, #tpu.memory_space<vmem>>, vector<1x16xf32>
    tpu.vector_store %arg13[%c3_528, %c208_529], %347 {strides = array<i32>} : memref<4x256xf32, #tpu.memory_space<vmem>>, vector<1x16xf32>,
    %c34_530 = arith.constant 34 : index
    %c0_531 = arith.constant 0 : index
    %349 = vector.load %arg12[%c34_530, %c0_531] : memref<36x16xf32, #tpu.memory_space<vmem>>, vector<1x16xf32>
    %c3_532 = arith.constant 3 : index
    %c224_533 = arith.constant 224 : index
    %350 = vector.load %arg13[%c3_532, %c224_533] : memref<4x256xf32, #tpu.memory_space<vmem>>, vector<1x16xf32>
    tpu.vector_store %arg13[%c3_532, %c224_533], %349 {strides = array<i32>} : memref<4x256xf32, #tpu.memory_space<vmem>>, vector<1x16xf32>,
    %c35_534 = arith.constant 35 : index
    %c0_535 = arith.constant 0 : index
    %351 = vector.load %arg12[%c35_534, %c0_535] : memref<36x16xf32, #tpu.memory_space<vmem>>, vector<1x16xf32>
    %c3_536 = arith.constant 3 : index
    %c240_537 = arith.constant 240 : index
    %352 = vector.load %arg13[%c3_536, %c240_537] : memref<4x256xf32, #tpu.memory_space<vmem>>, vector<1x16xf32>
    tpu.vector_store %arg13[%c3_536, %c240_537], %351 {strides = array<i32>} : memref<4x256xf32, #tpu.memory_space<vmem>>, vector<1x16xf32>,
    %c0_538 = arith.constant 0 : index
    %c0_539 = arith.constant 0 : index
    %353 = vector.load %arg13[%c0_538, %c0_539] : memref<4x256xf32, #tpu.memory_space<vmem>>, vector<4x256xf32>
    %c0_540 = arith.constant 0 : index
    %c0_541 = arith.constant 0 : index
    %354 = vector.load %arg4[%c0_540, %c0_541] : memref<256x32xf32, #tpu.memory_space<vmem>>, vector<256x32xf32>
    %cst_542 = arith.constant dense<0.000000e+00> : vector<4x32xf32>
    %355 = tpu.matmul %353, %354, %cst_542 {dimension_numbers = #tpu.dot_dimension_numbers<[1], [0], [0], [1], [0, 0, 1, 1], [], []>} : vector<4x256xf32>, vector<256x32xf32>, vector<4x32xf32> -> vector<4x32xf32>
    %c0_543 = arith.constant 0 : index
    %c0_544 = arith.constant 0 : index
    %356 = vector.load %arg5[%c0_543, %c0_544] : memref<1x32xf32, #tpu.memory_space<vmem>>, vector<1x32xf32>
    %357 = vector.broadcast %356 : vector<1x32xf32> to vector<4x32xf32>
    %358 = arith.addf %355, %357 : vector<4x32xf32>
    %cst_545 = arith.constant 0.000000e+00 : f32
    %359 = vector.broadcast %cst_545 : f32 to vector<4x32xf32>
    %360 = arith.maximumf %358, %359 : vector<4x32xf32>
    %361 = vector.extract_strided_slice %360 {offsets = [0, 0], sizes = [1, 32], strides = [1, 1]} : vector<4x32xf32> to vector<1x32xf32>
    %c0_546 = arith.constant 0 : index
    %c0_547 = arith.constant 0 : index
    %362 = vector.load %arg14[%c0_546, %c0_547] : memref<1x128xf32, #tpu.memory_space<vmem>>, vector<1x32xf32>
    tpu.vector_store %arg14[%c0_546, %c0_547], %361 {strides = array<i32>} : memref<1x128xf32, #tpu.memory_space<vmem>>, vector<1x32xf32>,
    %363 = vector.extract_strided_slice %360 {offsets = [1, 0], sizes = [1, 32], strides = [1, 1]} : vector<4x32xf32> to vector<1x32xf32>
    %c0_548 = arith.constant 0 : index
    %c32_549 = arith.constant 32 : index
    %364 = vector.load %arg14[%c0_548, %c32_549] : memref<1x128xf32, #tpu.memory_space<vmem>>, vector<1x32xf32>
    tpu.vector_store %arg14[%c0_548, %c32_549], %363 {strides = array<i32>} : memref<1x128xf32, #tpu.memory_space<vmem>>, vector<1x32xf32>,
    %365 = vector.extract_strided_slice %360 {offsets = [2, 0], sizes = [1, 32], strides = [1, 1]} : vector<4x32xf32> to vector<1x32xf32>
    %c0_550 = arith.constant 0 : index
    %c64_551 = arith.constant 64 : index
    %366 = vector.load %arg14[%c0_550, %c64_551] : memref<1x128xf32, #tpu.memory_space<vmem>>, vector<1x32xf32>
    tpu.vector_store %arg14[%c0_550, %c64_551], %365 {strides = array<i32>} : memref<1x128xf32, #tpu.memory_space<vmem>>, vector<1x32xf32>,
    %367 = vector.extract_strided_slice %360 {offsets = [3, 0], sizes = [1, 32], strides = [1, 1]} : vector<4x32xf32> to vector<1x32xf32>
    %c0_552 = arith.constant 0 : index
    %c96_553 = arith.constant 96 : index
    %368 = vector.load %arg14[%c0_552, %c96_553] : memref<1x128xf32, #tpu.memory_space<vmem>>, vector<1x32xf32>
    tpu.vector_store %arg14[%c0_552, %c96_553], %367 {strides = array<i32>} : memref<1x128xf32, #tpu.memory_space<vmem>>, vector<1x32xf32>,
    %c0_554 = arith.constant 0 : index
    %c0_555 = arith.constant 0 : index
    %369 = vector.load %arg14[%c0_554, %c0_555] : memref<1x128xf32, #tpu.memory_space<vmem>>, vector<1x128xf32>
    %c0_556 = arith.constant 0 : index
    %c0_557 = arith.constant 0 : index
    %370 = vector.load %arg6[%c0_556, %c0_557] : memref<128x256xf32, #tpu.memory_space<vmem>>, vector<128x256xf32>
    %cst_558 = arith.constant dense<0.000000e+00> : vector<1x256xf32>
    %371 = tpu.matmul %369, %370, %cst_558 {dimension_numbers = #tpu.dot_dimension_numbers<[1], [0], [0], [1], [0, 0, 1, 1], [], []>} : vector<1x128xf32>, vector<128x256xf32>, vector<1x256xf32> -> vector<1x256xf32>
    %c0_559 = arith.constant 0 : index
    %c0_560 = arith.constant 0 : index
    %372 = vector.load %arg7[%c0_559, %c0_560] : memref<1x256xf32, #tpu.memory_space<vmem>>, vector<1x256xf32>
    %373 = arith.addf %371, %372 : vector<1x256xf32>
    %cst_561 = arith.constant 0.000000e+00 : f32
    %374 = vector.broadcast %cst_561 : f32 to vector<1x256xf32>
    %375 = arith.maximumf %373, %374 : vector<1x256xf32>
    %c0_562 = arith.constant 0 : index
    %c0_563 = arith.constant 0 : index
    %376 = vector.load %arg8[%c0_562, %c0_563] : memref<256x128xf32, #tpu.memory_space<vmem>>, vector<256x128xf32>
    %cst_564 = arith.constant dense<0.000000e+00> : vector<1x128xf32>
    %377 = tpu.matmul %375, %376, %cst_564 {dimension_numbers = #tpu.dot_dimension_numbers<[1], [0], [0], [1], [0, 0, 1, 1], [], []>} : vector<1x256xf32>, vector<256x128xf32>, vector<1x128xf32> -> vector<1x128xf32>
    %c0_565 = arith.constant 0 : index
    %c0_566 = arith.constant 0 : index
    %378 = vector.load %arg9[%c0_565, %c0_566] : memref<1x128xf32, #tpu.memory_space<vmem>>, vector<1x128xf32>
    %379 = arith.addf %377, %378 : vector<1x128xf32>
    %c0_567 = arith.constant 0 : index
    %c0_568 = arith.constant 0 : index
    %c0_569 = arith.constant 0 : index
    %380 = vector.load %arg10[%c0_567, %c0_568, %c0_569] : memref<1x1x128xf32, #tpu.memory_space<vmem>>, vector<1x1x128xf32>
    %381 = vector.shape_cast %380 : vector<1x1x128xf32> to vector<1x128xf32>
    %382 = vector.shape_cast %379 : vector<1x128xf32> to vector<1x1x128xf32>
    tpu.vector_store %arg10[%c0_567, %c0_568, %c0_569], %382 {strides = array<i32>} : memref<1x1x128xf32, #tpu.memory_space<vmem>>, vector<1x1x128xf32>,
    return
  }
  func.func @transform_0(%arg0: i32) -> (i32, i32, i32) {
    %c0_i32 = arith.constant 0 : i32
    %c0_i32_0 = arith.constant 0 : i32
    %c0_i32_1 = arith.constant 0 : i32
    return %arg0, %c0_i32, %c0_i32_0 : i32, i32, i32
  }
  func.func @transform_1(%arg0: i32) -> (i32, i32) {
    %c0_i32 = arith.constant 0 : i32
    %c0_i32_0 = arith.constant 0 : i32
    %c0_i32_1 = arith.constant 0 : i32
    return %c0_i32, %c0_i32_0 : i32, i32
  }
  func.func @transform_2(%arg0: i32) -> (i32, i32) {
    %c0_i32 = arith.constant 0 : i32
    %c0_i32_0 = arith.constant 0 : i32
    %c0_i32_1 = arith.constant 0 : i32
    return %c0_i32, %c0_i32_0 : i32, i32
  }
  func.func @transform_3(%arg0: i32) -> (i32, i32) {
    %c0_i32 = arith.constant 0 : i32
    %c0_i32_0 = arith.constant 0 : i32
    %c0_i32_1 = arith.constant 0 : i32
    return %c0_i32, %c0_i32_0 : i32, i32
  }
  func.func @transform_4(%arg0: i32) -> (i32, i32) {
    %c0_i32 = arith.constant 0 : i32
    %c0_i32_0 = arith.constant 0 : i32
    %c0_i32_1 = arith.constant 0 : i32
    return %c0_i32, %c0_i32_0 : i32, i32
  }
  func.func @transform_5(%arg0: i32) -> (i32, i32) {
    %c0_i32 = arith.constant 0 : i32
    %c0_i32_0 = arith.constant 0 : i32
    %c0_i32_1 = arith.constant 0 : i32
    return %c0_i32, %c0_i32_0 : i32, i32
  }
  func.func @transform_6(%arg0: i32) -> (i32, i32) {
    %c0_i32 = arith.constant 0 : i32
    %c0_i32_0 = arith.constant 0 : i32
    %c0_i32_1 = arith.constant 0 : i32
    return %c0_i32, %c0_i32_0 : i32, i32
  }
  func.func @transform_7(%arg0: i32) -> (i32, i32) {
    %c0_i32 = arith.constant 0 : i32
    %c0_i32_0 = arith.constant 0 : i32
    %c0_i32_1 = arith.constant 0 : i32
    return %c0_i32, %c0_i32_0 : i32, i32
  }
  func.func @transform_8(%arg0: i32) -> (i32, i32) {
    %c0_i32 = arith.constant 0 : i32
    %c0_i32_0 = arith.constant 0 : i32
    %c0_i32_1 = arith.constant 0 : i32
    return %c0_i32, %c0_i32_0 : i32, i32
  }
  func.func @transform_9(%arg0: i32) -> (i32, i32, i32) {
    %c0_i32 = arith.constant 0 : i32
    %c0_i32_0 = arith.constant 0 : i32
    %c0_i32_1 = arith.constant 0 : i32
    return %arg0, %c0_i32, %c0_i32_0 : i32, i32, i32
  }
}

</mosaic_0001>

<bundles_post_ra>
// kernel: conv_qnet_forward.1
= control target key start
LH: loop header
LB: loop body
LE: loop exit
PB: predicated region body
PF: predicated region fallthrough
CT: control target
= control target key end

     0   :  { %14 = vsyncpa [#allocation7], 0  ;;  %s2587_s0 = inlined_call_operand.vmem [shape: f32[2,1,3136], index: 0, kind: input, shape index: {}]   ;;  %s2588_s1 = inlined_call_operand.vmem [shape: f32[256,16], index: 1, kind: input, shape index: {}]   ;;  %s2589_s2 = inlined_call_operand.vmem [shape: f32[1,16], index: 2, kind: input, shape index: {}]   ;;  %s2590_s3 = inlined_call_operand.vmem [shape: f32[256,32], index: 3, kind: input, shape index: {}]   ;;  %s2591_s4 = inlined_call_operand.vmem [shape: f32[1,32], index: 4, kind: input, shape index: {}]   ;;  %s2592_s5 = inlined_call_operand.vmem [shape: f32[128,256], index: 5, kind: input, shape index: {}]   ;;  %s2593_s6 = inlined_call_operand.vmem [shape: f32[1,256], index: 6, kind: input, shape index: {}]   ;;  %s2594_s7 = inlined_call_operand.vmem [shape: f32[256,128], index: 7, kind: input, shape index: {}]   ;;  %s2595_s8 = inlined_call_operand.vmem [shape: f32[1,128], index: 8, kind: input, shape index: {}]   ;;  %s2596_s9 = inlined_call_operand.hbm [shape: f32[2,1,128], index: 9, kind: output, shape index: {}]  }
   0x1   :  { %16 = vsyncpa [#allocation7 + $0x1], 0  ;;  %s1779_s30 = smov 0   ;;  %s1781_s10 = smov 0  }
   0x2   :  { %s1783_s11 = smov 0   ;;  %s1785_s12 = smov 0  }
   0x3 LB: > { %s1800_s13 = sadd.s32 4294967295, %s1720_s12   ;;  %s1603_s14 = sadd.s32 4294967294, %s1720_s12   ;;  %s1720_s12 = sphi %s1785_s12, %s2604_s12   ;;  %s1716_s11 = sphi %s1783_s11, %s2603_s11   ;;  %s1712_s10 = sphi %s1781_s10, %s2602_s10   ;;  %s1708_s30 = sphi %s1779_s30, %s2601_s30  }
   0x4   : > { %s1804_s15 = sadd.s32 1, %s1720_s12   ;;  %s223_s16 = sadd.s32 1, %s1716_s11 }
   0x5   : > { %s220_s17 = ssub.s32 %s1720_s12, %s1804_s15  ;;  %p233_p0 = scmp.ne.s32.totalorder %s1716_s11, %s1712_s10 }
   0x6   : > { %p221_p1 = scmp.eq.s32.totalorder %s220_s17, 0  ;;  %p234_p2 = scmp.eq.s32.totalorder %s1800_s13, 1 }
   0x7   : > { %p239_p3 = scmp.ne.s32.totalorder %s1712_s10, %s1708_s30  ;;  %p240_p4 = scmp.eq.s32.totalorder %s1603_s14, 1 }
   0x8   : > { %s1815_s18 = scalar_select %p221_p1, %s1716_s11, %s223_s16  }
   0x9   : > { %p1817_p5 = por %p234_p2, %p233_p0  ;;  %p1821_p6 = por %p240_p4, %p239_p3 }
   0xa   : > { %p1606_p7 = scmp.ge.s32.totalorder %s1720_s12, 1  ;;  %p289_p8 = scmp.lt.s32.totalorder %s1720_s12, 3 }
   0xc   : > { %p290_p9 = pnand %p1606_p7, %p289_p8 }
   0xd   : > { %p323_p10 = scmp.lt.s32.totalorder (!%p290_p9), %s1800_s13, 1  ;;  %s1722_s26 = smov (!%p290_p9), 64  }
   0xe   : > { %293 = sbr.rel (%p290_p9) target bundleno = 1176 (0x498), region = 56  ;;  %s1726_s23 = smov (!%p290_p9), 80  }
   0xf   : > { %s1727_s24 = smov (!%p290_p9), 96   ;;  %s1728_s27 = smov (!%p290_p9), 112  }
  0x13   : > { %s324_s21 = scalar_select %p323_p10, %s1800_s13, 1  ;;  %v821_v45 = vld [vmem:[%s2588_s1 + $0x78] sm:$0xff]  ;;  %v820_v46 = vld [vmem:[%s2588_s1 + $0x70] sm:$0xff]  ;;  %v819_v52 = vld [vmem:[%s2588_s1 + $0x68] sm:$0xff]  ;;  %vm337_vm0 = vcmask 523264   ;;  %vm911_vm1 = vcmask 130048  }
  0x14   : > { %842 = vmatpush.msra.mxu0 %v821_v45  ;;  %v818_v54 = vld [vmem:[%s2588_s1 + $0x60] sm:$0xff]  ;;  %v817_v55 = vld [vmem:[%s2588_s1 + $0x58] sm:$0xff]  ;;  %v816_v58 = vld [vmem:[%s2588_s1 + $0x50] sm:$0xff]  ;;  %vm919_vm2 = vcmask 122880   ;;  %vm926_vm3 = vcmask 254080   ;;  %vm933_vm4 = vcmask 385280  }
  0x15   : > { %s1609_s22 = smul.u32 25, %s324_s21  ;;  %v815_v60 = vld [vmem:[%s2588_s1 + $0x48] sm:$0xff]  ;;  %v814_v63 = vld [vmem:[%s2588_s1 + $0x40] sm:$0xff]  ;;  %s1724_s21 = smov 16   ;;  %vm940_vm5 = vcmask 516480   ;;  %vm947_vm6 = vcmask 647680  }
  0x16   : > { %843 = vmatpush.msra.mxu0 %v820_v46  ;;  %v827_v46 = vld [vmem:[%s2588_s1 + $0xa8] sm:$0xff]  ;;  %vm954_vm7 = vcmask 778880   ;;  %vm916_vm8 = vcmask 125952   ;;  %vm961_vm9 = vcmask 910080   ;;  %vm968_vm10 = vcmask 1041280  }
  0x17   : > { %s1832_s25 = scalar_lea.vmem %s2587_s0, %s1609_s22  ;;  %s1725_s22 = smov 48   ;;  %vm1362_vm11 = vcmask 253952   ;;  %vm1368_vm12 = vcmask 517377   ;;  %vm1373_vm13 = vcmask 780802   ;;  %vm1378_vm14 = vcmask 1044227  }
  0x18   : > { %v367_v0 = vld [vmem:[%s1832_s25 + $0x1] sm:$0x3]  ;;  %v406_v9 = vld [vmem:[%s1832_s25 + $0x3] sm:$0x3]  ;;  %v382_v18 = vld [vmem:[%s1832_s25 + $0x5] sm:$0x3]  ;;  %844 = vmatpush.msra.mxu0 %v819_v52 }
  0x19   : > { %v341_v1 = vld [vmem:[%s1832_s25] sm:$0x3]  ;;  %v369_v2 = vperm.slane %v367_v0, 0  ;;  %v393_v4 = vld [vmem:[%s1832_s25 + $0x2] sm:$0x3]  ;;  %v370_v6 = vperm.slane %v367_v0, 1 }
  0x1a   : > { %v343_v3 = vperm.slane %v341_v1, 0  ;;  %v395_v5 = vperm.slane %v393_v4, 0  ;;  %v344_v7 = vperm.slane %v341_v1, 1  ;;  %v396_v8 = vperm.slane %v393_v4, 1  ;;  %v329_v12 = vld [vmem:[%s1832_s25 + $0x3] sm:$0x3]  ;;  %845 = vmatpush.msra.mxu0 %v818_v54 }
  0x1b   : > { %371 = vrot.lane.b32.xlu1 %v369_v2, %s1722_s26  ;;  %v409_v10 = vperm.slane %v406_v9, 1  ;;  %v408_v11 = vperm.slane %v406_v9, 0  ;;  %v331_v13 = vperm.slane %v329_v12, 0  ;;  %v356_v14 = vld [vmem:[%s1832_s25 + $0x4] sm:$0x3]  ;;  %v332_v16 = vperm.slane %v329_v12, 1 }
  0x1c   : > { %345 = vrot.lane.b32.xlu0 %v343_v3, %s1722_s26  ;;  %397 = vrot.lane.b32.xlu2 %v395_v5, %s1722_s26  ;;  %v358_v15 = vperm.slane %v356_v14, 0  ;;  %v359_v17 = vperm.slane %v356_v14, 1  ;;  %v385_v19 = vperm.slane %v382_v18, 1  ;;  %v384_v20 = vperm.slane %v382_v18, 0  ;;  %v421_v21 = vld [vmem:[%s1832_s25 + $0x7] sm:$0x3] }
  0x1d   : > { %v423_v22 = vperm.slane %v421_v21, 0  ;;  %v432_v23 = vld [vmem:[%s1832_s25 + $0x4] sm:$0x3]  ;;  %v424_v25 = vperm.slane %v421_v21, 1  ;;  %v497_v30 = vld [vmem:[%s1832_s25 + $0x7] sm:$0x3]  ;;  %846 = vmatpush.msra.mxu0 %v817_v55 }
  0x1e   : > { %v434_v24 = vperm.slane %v432_v23, 0  ;;  %v435_v26 = vperm.slane %v432_v23, 1  ;;  %v458_v27 = vld [vmem:[%s1832_s25 + $0x5] sm:$0x3]  ;;  %v499_v31 = vperm.slane %v497_v30, 0  ;;  %v500_v34 = vperm.slane %v497_v30, 1 }
  0x1f   : > { %v461_v28 = vperm.slane %v458_v27, 1  ;;  %v460_v29 = vperm.slane %v458_v27, 0  ;;  %v523_v32 = vld [vmem:[%s1832_s25 + $0x8] sm:$0x3]  ;;  %v486_v41 = vld [vmem:[%s1832_s25 + $0xa] sm:$0x3]  ;;  %847 = vmatpush.msra.mxu0 %v816_v58 }
  0x20   : > { %v525_v33 = vperm.slane %v523_v32, 0  ;;  %v526_v35 = vperm.slane %v523_v32, 1  ;;  %v447_v36 = vld [vmem:[%s1832_s25 + $0x8] sm:$0x3]  ;;  %v488_v42 = vperm.slane %v486_v41, 0  ;;  %v489_v44 = vperm.slane %v486_v41, 1 }
  0x21   : > { %v450_v37 = vperm.slane %v447_v36, 1  ;;  %v449_v38 = vperm.slane %v447_v36, 0  ;;  %v473_v39 = vld [vmem:[%s1832_s25 + $0x9] sm:$0x3]  ;;  %v512_v47 = vld [vmem:[%s1832_s25 + $0xb] sm:$0x3]  ;;  %848 = vmatpush.msra.mxu0 %v815_v60 }
  0x22   : > { %v475_v40 = vperm.slane %v473_v39, 0  ;;  %v476_v43 = vperm.slane %v473_v39, 1  ;;  %v515_v48 = vperm.slane %v512_v47, 1  ;;  %v514_v49 = vperm.slane %v512_v47, 0  ;;  %v549_v50 = vld [vmem:[%s1832_s25 + $0x9] sm:$0x3] }
  0x23   : > { %373 = vrot.lane.b32.xlu1 %v370_v6, %s1722_s26  ;;  %v551_v51 = vperm.slane %v549_v50, 0  ;;  %v562_v53 = vld [vmem:[%s1832_s25 + $0xa] sm:$0x3]  ;;  %v552_v57 = vperm.slane %v549_v50, 1  ;;  %v614_v2 = vld [vmem:[%s1832_s25 + $0xc] sm:$0x3]  ;;  %849 = vmatpush.msra.mxu0 %v814_v63 }
  0x24   : > { %347 = vrot.lane.b32.xlu0 %v344_v7, %s1722_s26  ;;  %399 = vrot.lane.b32.xlu2 %v396_v8, %s1722_s26  ;;  %v564_v56 = vperm.slane %v562_v53, 0  ;;  %v565_v59 = vperm.slane %v562_v53, 1  ;;  %v588_v61 = vld [vmem:[%s1832_s25 + $0xb] sm:$0x3]  ;;  %v616_v3 = vperm.slane %v614_v2, 0  ;;  %v813_v4 = vld [vmem:[%s2588_s1 + $0x38] sm:$0xff] }
  0x25   : > { %v591_v0 = vperm.slane %v588_v61, 1  ;;  %v590_v1 = vperm.slane %v588_v61, 0  ;;  %850 = vmatpush.msra.mxu0 %v813_v4  ;;  %v812_v5 = vld [vmem:[%s2588_s1 + $0x30] sm:$0xff]  ;;  %v811_v6 = vld [vmem:[%s2588_s1 + $0x28] sm:$0xff]  ;;  %v810_v9 = vld [vmem:[%s2588_s1 + $0x20] sm:$0xff] }
  0x26   : > { %v538_v7 = vld [vmem:[%s1832_s25 + $0xc] sm:$0x3]  ;;  %v837_v14 = vld [vmem:[%s2588_s1 + $0xf8] sm:$0xff]  ;;  %v327_v18 = vld [vmem:[%s1832_s25] sm:$0x1] }
  0x27   : > { %851 = vmatpush.msra.mxu0 %v812_v5  ;;  %874 = vmatpush.msra.mxu1 %v837_v14  ;;  %328 = vst [vmem:[#allocation2] sm:$0x1] %v327_v18  ;;  %v835_v21 = vld [vmem:[%s2588_s1 + $0xe8] sm:$0xff]  ;;  %v380_v23 = vld [vmem:[%s1832_s25 + $0x2] sm:$0x1]  ;;  %v833_v32 = vld [vmem:[%s2588_s1 + $0xd8] sm:$0xff] }
  0x28   : > { %381 = vst [vmem:[#allocation2 + $0x4] sm:$0x1] %v380_v23  ;;  %v834_v27 = vld [vmem:[%s2588_s1 + $0xe0] sm:$0xff]  ;;  %v603_v30 = vld [vmem:[%s1832_s25 + $0xf] sm:$0x3] }
  0x29   : > { %852 = vmatpush.msra.mxu0 %v811_v6  ;;  %v830_v39 = vld [vmem:[%s2588_s1 + $0xc0] sm:$0xff]  ;;  %v606_v41 = vperm.slane %v603_v30, 1  ;;  %v653_v45 = vld [vmem:[%s1832_s25 + $0xe] sm:$0x3]  ;;  %v824_v60 = vld [vmem:[%s2588_s1 + $0x90] sm:$0xff] }
  0x2a   : > { %v655_v52 = vperm.slane %v653_v45, 0  ;;  %v679_v53 = vld [vmem:[%s1832_s25 + $0xf] sm:$0x3]  ;;  %v826_v55 = vld [vmem:[%s2588_s1 + $0xa0] sm:$0xff] }
  0x2b   : > { %412 = vrot.lane.b32.xlu1 %v409_v10, %s1722_s26  ;;  %v540_v10 = vperm.slane %v538_v7, 0  ;;  %853 = vmatpush.msra.mxu0 %v810_v9  ;;  %v681_v58 = vperm.slane %v679_v53, 0  ;;  %v404_v61 = vld [vmem:[%s1832_s25 + $0x6] sm:$0x3]   ;;  %v705_v63 = vld [vmem:[%s1832_s25 + $0x10] sm:$0x3] }
  0x2c   : > { %410 = vrot.lane.b32.xlu0 %v408_v11, %s1722_s26  ;;  %333 = vrot.lane.b32.xlu2 %v331_v13, %s1722_s26  ;;  %v617_v11 = vperm.slane %v614_v2, 1  ;;  %v809_v13 = vld [vmem:[%s2588_s1 + $0x18] sm:$0xff]  ;;  %405 = vst [vmem:[#allocation2 + $0xd] sm:$0x3] %v404_v61   ;;  %v822_v4 = vld [vmem:[%s2588_s1 + $0x80] sm:$0xff]  ;;  %v707_v5 = vperm.slane %v705_v63, 0 }
  0x2d   : > { %854 = vmatpush.msra.mxu0 %v809_v13  ;;  %v682_v6 = vperm.slane %v679_v53, 1  ;;  %v445_v18 = vld [vmem:[%s1832_s25 + $0x5] sm:$0x1]  ;;  %v770_v53 = vld [vmem:[%s1832_s25 + $0x13] sm:$0x3] }
  0x2e   : > { %446 = vst [vmem:[#allocation2 + $0x11] sm:$0x1] %v445_v18  ;;  %v759_v61 = vld [vmem:[%s1832_s25 + $0x16] sm:$0x3] }
  0x33   : > { %360 = vrot.lane.b32.xlu1 %v358_v15, %s1722_s26  ;;  %v541_v15 = vperm.slane %v538_v7, 1  ;;  %v708_v7 = vperm.slane %v705_v63, 1  ;;  %v785_v63 = vld [vmem:[%s1832_s25 + $0x17] sm:$0x3] }
  0x34   : > { %335 = vrot.lane.b32.xlu0 %v332_v16, %s1722_s26  ;;  %362 = vrot.lane.b32.xlu2 %v359_v17, %s1722_s26  ;;  %v836_v16 = vld [vmem:[%s2588_s1 + $0xf0] sm:$0xff] }
  0x35   : > { %v808_v17 = vld [vmem:[%s2588_s1 + $0x10] sm:$0xff]  ;;  %875 = vmatpush.msra.mxu1 %v836_v16 }
  0x36   : > { %855 = vmatpush.msra.mxu0 %v808_v17  ;;  %v642_v16 = vld [vmem:[%s1832_s25 + $0x11] sm:$0x3] }
  0x37   : > { %876 = vmatpush.msra.mxu1 %v835_v21  ;;  %v510_v21 = vld [vmem:[%s1832_s25 + $0x8] sm:$0x1] }
  0x38   : > { %511 = vst [vmem:[#allocation2 + $0x16] sm:$0x1] %v510_v21 }
  0x39   : > { %877 = vmatpush.msra.mxu1 %v834_v27 }
  0x3b   : > { %388 = vrot.lane.b32.xlu1 %v385_v19, %s1722_s26  ;;  %v354_v19 = vld [vmem:[%s1832_s25 + $0x1] sm:$0x1]  ;;  %878 = vmatpush.msra.mxu1 %v833_v32 }
  0x3c   : > { %386 = vrot.lane.b32.xlu0 %v384_v20, %s1722_s26  ;;  %425 = vrot.lane.b32.xlu2 %v423_v22, %s1722_s26  ;;  %v807_v20 = vld [vmem:[%s2588_s1 + $0x8] sm:$0xff]  ;;  %355 = vst [vmem:[#allocation2 + $0x2] sm:$0x1] %v354_v19  ;;  %v471_v19 = vld [vmem:[%s1832_s25 + $0x6] sm:$0x3]  }
  0x3d   : > { %v577_v22 = vld [vmem:[%s1832_s25 + $0xe] sm:$0x3]  ;;  %856 = vmatpush.msra.mxu0 %v807_v20  ;;  %v644_v20 = vperm.slane %v642_v16, 0  ;;  %472 = vst [vmem:[#allocation2 + $0x13] sm:$0x3] %v471_v19  }
  0x43   : > { %436 = vrot.lane.b32.xlu1 %v434_v24, %s1722_s26  ;;  %v419_v24 = vld [vmem:[%s1832_s25 + $0x4] sm:$0x1] }
  0x44   : > { %427 = vrot.lane.b32.xlu0 %v424_v25, %s1722_s26  ;;  %438 = vrot.lane.b32.xlu2 %v435_v26, %s1722_s26  ;;  %v806_v26 = vld [vmem:[%s2588_s1] sm:$0xff]  ;;  %420 = vst [vmem:[#allocation2 + $0x7] sm:$0x1] %v419_v24 }
  0x45   : > { %857 = vmatpush.msra.mxu0 %v806_v26 }
  0x4b   : > { %464 = vrot.lane.b32.xlu1 %v461_v28, %s1722_s26  ;;  %v580_v28 = vperm.slane %v577_v22, 1 }
  0x4c   : > { %462 = vrot.lane.b32.xlu0 %v460_v29, %s1722_s26  ;;  %501 = vrot.lane.b32.xlu2 %v499_v31, %s1722_s26  ;;  %v579_v29 = vperm.slane %v577_v22, 0  ;;  %v605_v31 = vperm.slane %v603_v30, 0  ;;  %v668_v22 = vld [vmem:[%s1832_s25 + $0x12] sm:$0x3] }
  0x4d   : > { %v670_v27 = vperm.slane %v668_v22, 0  ;;  %v694_v30 = vld [vmem:[%s1832_s25 + $0x13] sm:$0x3] }
  0x53   : > { %527 = vrot.lane.b32.xlu1 %v525_v33, %s1722_s26  ;;  %v832_v33 = vld [vmem:[%s2588_s1 + $0xd0] sm:$0xff] }
  0x54   : > { %503 = vrot.lane.b32.xlu0 %v500_v34, %s1722_s26  ;;  %529 = vrot.lane.b32.xlu2 %v526_v35, %s1722_s26  ;;  %v831_v34 = vld [vmem:[%s2588_s1 + $0xc8] sm:$0xff]  ;;  %v629_v35 = vld [vmem:[%s1832_s25 + $0x10] sm:$0x3] }
  0x55   : > { %879 = vmatpush.msra.mxu1 %v832_v33 }
  0x57   : > { %880 = vmatpush.msra.mxu1 %v831_v34 }
  0x59   : > { %881 = vmatpush.msra.mxu1 %v830_v39 }
  0x5b   : > { %453 = vrot.lane.b32.xlu1 %v450_v37, %s1722_s26 }
  0x5c   : > { %451 = vrot.lane.b32.xlu0 %v449_v38, %s1722_s26  ;;  %477 = vrot.lane.b32.xlu2 %v475_v40, %s1722_s26  ;;  %v631_v40 = vperm.slane %v629_v35, 0 }
  0x63   : > { %490 = vrot.lane.b32.xlu1 %v488_v42, %s1722_s26  ;;  %v829_v42 = vld [vmem:[%s2588_s1 + $0xb8] sm:$0xff] }
  0x64   : > { %479 = vrot.lane.b32.xlu0 %v476_v43, %s1722_s26  ;;  %492 = vrot.lane.b32.xlu2 %v489_v44, %s1722_s26  ;;  %v632_v43 = vperm.slane %v629_v35, 1  ;;  %v828_v44 = vld [vmem:[%s2588_s1 + $0xb0] sm:$0xff] }
  0x65   : > { %882 = vmatpush.msra.mxu1 %v829_v42 }
  0x67   : > { %883 = vmatpush.msra.mxu1 %v828_v44 }
  0x69   : > { %884 = vmatpush.msra.mxu1 %v827_v46 }
  0x6b   : > { %518 = vrot.lane.b32.xlu1 %v515_v48, %s1722_s26  ;;  %885 = vmatpush.msra.mxu1 %v826_v55 }
  0x6c   : > { %516 = vrot.lane.b32.xlu0 %v514_v49, %s1722_s26  ;;  %553 = vrot.lane.b32.xlu2 %v551_v51, %s1722_s26  ;;  %v656_v51 = vperm.slane %v653_v45, 1 }
  0x73   : > { %566 = vrot.lane.b32.xlu1 %v564_v56, %s1722_s26  ;;  %v352_v56 = vld [vmem:[%s1832_s25 + $0x4] sm:$0x1] }
  0x74   : > { %555 = vrot.lane.b32.xlu0 %v552_v57, %s1722_s26  ;;  %568 = vrot.lane.b32.xlu2 %v565_v59, %s1722_s26  ;;  %v378_v57 = vld [vmem:[%s1832_s25 + $0x5] sm:$0x1]  ;;  %v825_v59 = vld [vmem:[%s2588_s1 + $0x98] sm:$0xff]  ;;  %353 = vst [vmem:[#allocation2 + $0x9] sm:$0x1] %v352_v56 }
  0x75   : > { %886 = vmatpush.msra.mxu1 %v825_v59  ;;  %379 = vst [vmem:[#allocation2 + $0xb] sm:$0x1] %v378_v57  ;;  %v773_v59 = vperm.slane %v770_v53, 1 }
  0x76   : > { %v398_v62 = vpop.permute.xlu2 %397 }
  0x77   : > { %887 = vmatpush.msra.mxu1 %v824_v60  ;;  %v772_v60 = vperm.slane %v770_v53, 0 }
  0x7b   : > { %594 = vrot.lane.b32.xlu1 %v591_v0, %s1722_s26 }
  0x7c   : > { %592 = vrot.lane.b32.xlu0 %v590_v1, %s1722_s26  ;;  %618 = vrot.lane.b32.xlu2 %v616_v3, %s1722_s26 }
  0x7e   : > { %v400_v8 = vpop.permute.xlu2 %399 }
  0x7f   : > { %v401_v12 = vsel %vm337_vm0, %v398_v62, %v400_v8  ;;  %v823_v62 = vld [vmem:[%s2588_s1 + $0x88] sm:$0xff]  ;;  %v718_v8 = vld [vmem:[%s1832_s25 + $0x11] sm:$0x3] }
  0x80   : > { %403 = vst [vmem:[#allocation2 + $0x5] sm:$0x1] %v401_v12  ;;  %888 = vmatpush.msra.mxu1 %v823_v62  ;;  %v721_v14 = vperm.slane %v718_v8, 1  ;;  %v761_v62 = vperm.slane %v759_v61, 0 }
  0x82   : > { %889 = vmatpush.msra.mxu1 %v822_v4 }
  0x83   : > { %542 = vrot.lane.b32.xlu1 %v540_v10, %s1722_s26 }
  0x84   : > { %620 = vrot.lane.b32.xlu0 %v617_v11, %s1722_s26  ;;  %544 = vrot.lane.b32.xlu2 %v541_v15, %s1722_s26  ;;  %v720_v15 = vperm.slane %v718_v8, 0 }
  0x86   : > { %v1957_v25 = vpop.permute.xlu2 %333 }
  0x8b   : > { %583 = vrot.lane.b32.xlu1 %v580_v28, %s1722_s26  ;;  %v645_v28 = vperm.slane %v642_v16, 1  ;;  %v627_v16 = vld [vmem:[%s1832_s25 + $0xd] sm:$0x1] }
  0x8c   : > { %581 = vrot.lane.b32.xlu0 %v579_v29, %s1722_s26  ;;  %607 = vrot.lane.b32.xlu2 %v605_v31, %s1722_s26  ;;  %v671_v29 = vperm.slane %v668_v22, 1  ;;  %628 = vst [vmem:[#allocation2 + $0x27] sm:$0x1] %v627_v16 }
  0x8d   : > { %v372_v36 = vpop.permute.xlu1 %371 }
  0x8e   : > { %v346_v37 = vpop.permute.xlu0 %345  ;;  %v1979_v38 = vpop.permute.xlu2 %362 }
  0x93   : > { %633 = vrot.lane.b32.xlu1 %v631_v40, %s1722_s26  ;;  %v744_v40 = vld [vmem:[%s1832_s25 + $0x12] sm:$0x3] }
  0x94   : > { %609 = vrot.lane.b32.xlu0 %v606_v41, %s1722_s26  ;;  %635 = vrot.lane.b32.xlu2 %v632_v43, %s1722_s26  ;;  %v746_v45 = vperm.slane %v744_v40, 0 }
  0x95   : > { %v374_v47 = vpop.permute.xlu1 %373 }
  0x96   : > { %v348_v48 = vpop.permute.xlu0 %347  ;;  %v375_v49 = vsel %vm337_vm0, %v372_v36, %v374_v47  ;;  %v2000_v54 = vpop.permute.xlu2 %425  ;;  %v697_v36 = vperm.slane %v694_v30, 1 }
  0x97   : > { %v349_v50 = vsel %vm337_vm0, %v346_v37, %v348_v48  ;;  %377 = vst [vmem:[#allocation2 + $0x3] sm:$0x1] %v375_v49  ;;  %v696_v37 = vperm.slane %v694_v30, 0  ;;  %v747_v48 = vperm.slane %v744_v40, 1  ;;  %v443_v49 = vld [vmem:[%s1832_s25 + $0x8] sm:$0x1] }
  0x98   : > { %351 = vst [vmem:[#allocation2 + $0x1] sm:$0x1] %v349_v50  ;;  %v469_v50 = vld [vmem:[%s1832_s25 + $0x9] sm:$0x1] }
  0x99   : > { %444 = vst [vmem:[#allocation2 + $0x18] sm:$0x1] %v443_v49 }
  0x9a   : > { %470 = vst [vmem:[#allocation2 + $0x1a] sm:$0x1] %v469_v50 }
  0x9b   : > { %659 = vrot.lane.b32.xlu1 %v656_v51, %s1722_s26  ;;  %v508_v51 = vld [vmem:[%s1832_s25 + $0xb] sm:$0x1] }
  0x9c   : > { %657 = vrot.lane.b32.xlu0 %v655_v52, %s1722_s26  ;;  %683 = vrot.lane.b32.xlu2 %v681_v58, %s1722_s26  ;;  %v534_v52 = vld [vmem:[%s1832_s25 + $0xc] sm:$0x1]  ;;  %509 = vst [vmem:[#allocation2 + $0x1d] sm:$0x1] %v508_v51 }
  0x9d   : > { %v413_v0 = vpop.permute.xlu1 %412  ;;  %535 = vst [vmem:[#allocation2 + $0x1f] sm:$0x1] %v534_v52 }
  0x9e   : > { %v411_v1 = vpop.permute.xlu0 %410  ;;  %v439_v3 = vpop.permute.xlu2 %438 }
  0x9f   : > { %v414_v2 = vsel %vm337_vm0, %v411_v1, %v413_v0 }
  0xa0   : > { %416 = vst [vmem:[#allocation2 + $0x6] sm:$0x1] %v414_v2 }
  0xa3   : > { %709 = vrot.lane.b32.xlu1 %v707_v5, %s1722_s26  ;;  %v787_v5 = vperm.slane %v785_v63, 0 }
  0xa4   : > { %685 = vrot.lane.b32.xlu0 %v682_v6, %s1722_s26  ;;  %711 = vrot.lane.b32.xlu2 %v708_v7, %s1722_s26  ;;  %v762_v6 = vperm.slane %v759_v61, 1  ;;  %v788_v7 = vperm.slane %v785_v63, 1  ;;  %v664_v61 = vld [vmem:[%s1832_s25 + $0x12] sm:$0x1]  ;;  %v716_v63 = vld [vmem:[%s1832_s25 + $0x14] sm:$0x3]  }
  0xa5   : > { %v361_v9 = vpop.permute.xlu1 %360  ;;  %665 = vst [vmem:[#allocation2 + $0x39] sm:$0x1] %v664_v61 }
  0xa6   : > { %v336_v10 = vpop.permute.xlu0 %335  ;;  %v364_v12 = vsel %vm337_vm0, %v361_v9, %v1979_v38  ;;  %v2034_v17 = vpop.permute.xlu2 %501  ;;  %v733_v38 = vld [vmem:[%s1832_s25 + $0x15] sm:$0x3]  ;;  %717 = vst [vmem:[#allocation2 + $0x3d] sm:$0x3] %v716_v63  }
  0xa7   : > { %v338_v11 = vsel %vm337_vm0, %v1957_v25, %v336_v10  ;;  %v796_v13 = vld [vmem:[#allocation2] sm:$0xff]  ;;  %366 = vst [vmem:[#allocation2 + $0xa] sm:$0x1] %v364_v12  ;;  %v735_v39 = vperm.slane %v733_v38, 0  ;;  %v736_v47 = vperm.slane %v733_v38, 1 }
  0xa8   : > { %340 = vst [vmem:[#allocation2 + $0x8] sm:$0x1] %v338_v11  ;;  %858 = vmatmul.f32.vlgmr.msra.gmra.mxu0 %v796_v13  ;;  %v536_v13 = vld [vmem:[%s1832_s25 + $0x9] sm:$0x1] }
  0xa9   : > { %537 = vst [vmem:[#allocation2 + $0x20] sm:$0x1] %v536_v13  ;;  %v781_v13 = vld [vmem:[%s1832_s25 + $0x17] sm:$0x1] }
  0xaa   : > { %782 = vst [vmem:[#allocation2 + $0x4a] sm:$0x1] %v781_v13 }
  0xab   : > { %724 = vrot.lane.b32.xlu1 %v721_v14, %s1722_s26  ;;  %v575_v14 = vld [vmem:[%s1832_s25 + $0xb] sm:$0x1] }
  0xac   : > { %722 = vrot.lane.b32.xlu0 %v720_v15, %s1722_s26  ;;  %646 = vrot.lane.b32.xlu2 %v644_v20, %s1722_s26  ;;  %v601_v15 = vld [vmem:[%s1832_s25 + $0xc] sm:$0x1]  ;;  %576 = vst [vmem:[#allocation2 + $0x23] sm:$0x1] %v575_v14 }
  0xad   : > { %v389_v23 = vpop.permute.xlu1 %388  ;;  %602 = vst [vmem:[#allocation2 + $0x25] sm:$0x1] %v601_v15 }
  0xae   : > { %v387_v24 = vpop.permute.xlu0 %386  ;;  %v530_v26 = vpop.permute.xlu2 %529 }
  0xaf   : > { %v390_v25 = vsel %vm337_vm0, %v387_v24, %v389_v23 }
  0xb0   : > { %392 = vst [vmem:[#allocation2 + $0xc] sm:$0x1] %v390_v25 }
  0xb3   : > { %672 = vrot.lane.b32.xlu1 %v670_v27, %s1722_s26  ;;  %v599_v27 = vld [vmem:[%s1832_s25 + $0xf] sm:$0x1] }
  0xb4   : > { %648 = vrot.lane.b32.xlu0 %v645_v28, %s1722_s26  ;;  %674 = vrot.lane.b32.xlu2 %v671_v29, %s1722_s26  ;;  %v625_v29 = vld [vmem:[%s1832_s25 + $0x10] sm:$0x1]  ;;  %600 = vst [vmem:[#allocation2 + $0x2c] sm:$0x1] %v599_v27 }
  0xb5   : > { %v437_v31 = vpop.permute.xlu1 %436  ;;  %626 = vst [vmem:[#allocation2 + $0x2e] sm:$0x1] %v625_v29 }
  0xb6   : > { %v428_v32 = vpop.permute.xlu0 %427  ;;  %v440_v34 = vsel %vm337_vm0, %v437_v31, %v439_v3  ;;  %v2051_v35 = vpop.permute.xlu2 %477 }
  0xb7   : > { %v429_v33 = vsel %vm337_vm0, %v2000_v54, %v428_v32  ;;  %442 = vst [vmem:[#allocation2 + $0x10] sm:$0x1] %v440_v34 }
  0xb8   : > { %431 = vst [vmem:[#allocation2 + $0xf] sm:$0x1] %v429_v33 }
  0xbb   : > { %700 = vrot.lane.b32.xlu1 %v697_v36, %s1722_s26 }
  0xbc   : > { %698 = vrot.lane.b32.xlu0 %v696_v37, %s1722_s26  ;;  %737 = vrot.lane.b32.xlu2 %v735_v39, %s1722_s26 }
  0xbd   : > { %v465_v41 = vpop.permute.xlu1 %464 }
  0xbe   : > { %v463_v42 = vpop.permute.xlu0 %462  ;;  %v493_v46 = vpop.permute.xlu2 %492 }
  0xbf   : > { %v466_v43 = vsel %vm337_vm0, %v463_v42, %v465_v41  ;;  %v797_v44 = vld [vmem:[#allocation2 + $0x8] sm:$0xff] }
  0xc0   : > { %468 = vst [vmem:[#allocation2 + $0x12] sm:$0x1] %v466_v43  ;;  %890 = vmatmul.f32.vlgmr.msra.gmra.mxu1 %v797_v44  ;;  %v640_v43 = vld [vmem:[%s1832_s25 + $0xe] sm:$0x1]  ;;  %v666_v44 = vld [vmem:[%s1832_s25 + $0xf] sm:$0x1] }
  0xc1   : > { %641 = vst [vmem:[#allocation2 + $0x30] sm:$0x1] %v640_v43 }
  0xc2   : > { %667 = vst [vmem:[#allocation2 + $0x32] sm:$0x1] %v666_v44 }
  0xc3   : > { %748 = vrot.lane.b32.xlu1 %v746_v45, %s1722_s26  ;;  %v692_v45 = vld [vmem:[%s1832_s25 + $0x10] sm:$0x1] }
  0xc4   : > { %739 = vrot.lane.b32.xlu0 %v736_v47, %s1722_s26  ;;  %750 = vrot.lane.b32.xlu2 %v747_v48, %s1722_s26  ;;  %693 = vst [vmem:[#allocation2 + $0x34] sm:$0x1] %v692_v45 }
  0xc5   : > { %v528_v54 = vpop.permute.xlu1 %527 }
  0xc6   : > { %v504_v55 = vpop.permute.xlu0 %503  ;;  %v531_v57 = vsel %vm337_vm0, %v528_v54, %v530_v26  ;;  %v554_v58 = vpop.permute.xlu2 %553  ;;  %v560_v26 = vld [vmem:[%s1832_s25 + $0xd] sm:$0x3]  }
  0xc7   : > { %v505_v56 = vsel %vm337_vm0, %v2034_v17, %v504_v55  ;;  %533 = vst [vmem:[#allocation2 + $0x17] sm:$0x1] %v531_v57 }
  0xc8   : > { %507 = vst [vmem:[#allocation2 + $0x15] sm:$0x1] %v505_v56 }
  0xc9   : > { %561 = vst [vmem:[#allocation2 + $0x29] sm:$0x3] %v560_v26  }
  0xcb   : > { %776 = vrot.lane.b32.xlu1 %v773_v59, %s1722_s26 }
  0xcc   : > { %774 = vrot.lane.b32.xlu0 %v772_v60, %s1722_s26  ;;  %763 = vrot.lane.b32.xlu2 %v761_v62, %s1722_s26  ;;  %v690_v62 = vld [vmem:[%s1832_s25 + $0x13] sm:$0x1] }
  0xcd   : > { %v454_v0 = vpop.permute.xlu1 %453  ;;  %691 = vst [vmem:[#allocation2 + $0x3b] sm:$0x1] %v690_v62 }
  0xce   : > { %v452_v1 = vpop.permute.xlu0 %451  ;;  %v569_v3 = vpop.permute.xlu2 %568 }
  0xcf   : > { %v455_v2 = vsel %vm337_vm0, %v452_v1, %v454_v0  ;;  %v798_v4 = vld [vmem:[#allocation2 + $0x10] sm:$0xff] }
  0xd0   : > { %457 = vst [vmem:[#allocation2 + $0x19] sm:$0x1] %v455_v2  ;;  %861 = vmatmul.f32.gmra.mxu0 %v798_v4  ;;  %v757_v4 = vld [vmem:[%s1832_s25 + $0x13] sm:$0x1] }
  0xd1   : > { %758 = vst [vmem:[#allocation2 + $0x41] sm:$0x1] %v757_v4 }
  0xd3   : > { %789 = vrot.lane.b32.xlu1 %v787_v5, %s1722_s26  ;;  %v783_v5 = vld [vmem:[%s1832_s25 + $0x14] sm:$0x1] }
  0xd4   : > { %765 = vrot.lane.b32.xlu0 %v762_v6, %s1722_s26  ;;  %791 = vrot.lane.b32.xlu2 %v788_v7, %s1722_s26  ;;  %784 = vst [vmem:[#allocation2 + $0x43] sm:$0x1] %v783_v5 }
  0xd5   : > { %v491_v8 = vpop.permute.xlu1 %490 }
  0xd6   : > { %v480_v9 = vpop.permute.xlu0 %479  ;;  %v494_v11 = vsel %vm337_vm0, %v491_v8, %v493_v46  ;;  %v619_v12 = vpop.permute.xlu2 %618  ;;  %v731_v46 = vld [vmem:[%s1832_s25 + $0x12] sm:$0x1] }
  0xd7   : > { %v481_v10 = vsel %vm337_vm0, %v2051_v35, %v480_v9  ;;  %496 = vst [vmem:[#allocation2 + $0x1c] sm:$0x1] %v494_v11 }
  0xd8   : > { %483 = vst [vmem:[#allocation2 + $0x1b] sm:$0x1] %v481_v10 }
  0xd9   : > { %732 = vst [vmem:[#allocation2 + $0x37] sm:$0x1] %v731_v46 }
  0xdd   : > { %v519_v17 = vpop.permute.xlu1 %518 }
  0xde   : > { %v517_v18 = vpop.permute.xlu0 %516  ;;  %v545_v20 = vpop.permute.xlu2 %544 }
  0xdf   : > { %v520_v19 = vsel %vm337_vm0, %v517_v18, %v519_v17 }
  0xe0   : > { %522 = vst [vmem:[#allocation2 + $0x1e] sm:$0x1] %v520_v19 }
  0xe5   : > { %v567_v21 = vpop.permute.xlu1 %566 }
  0xe6   : > { %v556_v22 = vpop.permute.xlu0 %555  ;;  %v570_v24 = vsel %vm337_vm0, %v567_v21, %v569_v3  ;;  %v608_v28 = vpop.permute.xlu2 %607 }
  0xe7   : > { %v557_v23 = vsel %vm337_vm0, %v554_v58, %v556_v22  ;;  %v799_v25 = vld [vmem:[#allocation2 + $0x18] sm:$0xff]  ;;  %572 = vst [vmem:[#allocation2 + $0x22] sm:$0x1] %v570_v24 }
  0xe8   : > { %559 = vst [vmem:[#allocation2 + $0x21] sm:$0x1] %v557_v23  ;;  %893 = vmatmul.f32.gmra.mxu1 %v799_v25  ;;  %v2121_v22 = vld [vmem:[%s2589_s2] ss:$0 sm:$0xff] }
  0xed   : > { %v595_v30 = vpop.permute.xlu1 %594 }
  0xee   : > { %v593_v31 = vpop.permute.xlu0 %592  ;;  %v636_v33 = vpop.permute.xlu2 %635 }
  0xef   : > { %v596_v32 = vsel %vm337_vm0, %v593_v31, %v595_v30 }
  0xf0   : > { %598 = vst [vmem:[#allocation2 + $0x24] sm:$0x1] %v596_v32 }
  0xf5   : > { %v543_v34 = vpop.permute.xlu1 %542 }
  0xf6   : > { %v621_v35 = vpop.permute.xlu0 %620  ;;  %v546_v37 = vsel %vm337_vm0, %v543_v34, %v545_v20  ;;  %v684_v38 = vpop.permute.xlu2 %683 }
  0xf7   : > { %v622_v36 = vsel %vm337_vm0, %v619_v12, %v621_v35  ;;  %548 = vst [vmem:[#allocation2 + $0x28] sm:$0x1] %v546_v37  ;;  %v755_v12 = vld [vmem:[%s1832_s25 + $0x16] sm:$0x1]  ;;  %s2597_s25 = smov 32  }
  0xf8   : > { %624 = vst [vmem:[#allocation2 + $0x26] sm:$0x1] %v622_v36 }
  0xf9   : > { %756 = vst [vmem:[#allocation2 + $0x48] sm:$0x1] %v755_v12 }
  0xfd   : > { %v584_v39 = vpop.permute.xlu1 %583 }
  0xfe   : > { %v582_v40 = vpop.permute.xlu0 %581  ;;  %v712_v51 = vpop.permute.xlu2 %711 }
  0xff   : > { %v585_v41 = vsel %vm337_vm0, %v582_v40, %v584_v39  ;;  %v800_v42 = vld [vmem:[#allocation2 + $0x20] sm:$0xff] }
 0x100   : > { %587 = vst [vmem:[#allocation2 + $0x2b] sm:$0x1] %v585_v41  ;;  %864 = vmatmul.f32.gmra.mxu0 %v800_v42 }
 0x105   : > { %v634_v47 = vpop.permute.xlu1 %633 }
 0x106   : > { %v610_v48 = vpop.permute.xlu0 %609  ;;  %v637_v50 = vsel %vm337_vm0, %v634_v47, %v636_v33  ;;  %v647_v56 = vpop.permute.xlu2 %646 }
 0x107   : > { %v611_v49 = vsel %vm337_vm0, %v608_v28, %v610_v48  ;;  %639 = vst [vmem:[#allocation2 + $0x2f] sm:$0x1] %v637_v50 }
 0x108   : > { %613 = vst [vmem:[#allocation2 + $0x2d] sm:$0x1] %v611_v49 }
 0x10d   : > { %v660_v52 = vpop.permute.xlu1 %659 }
 0x10e   : > { %v658_v53 = vpop.permute.xlu0 %657  ;;  %v675_v0 = vpop.permute.xlu2 %674 }
 0x10f   : > { %v661_v54 = vsel %vm337_vm0, %v658_v53, %v660_v52  ;;  %v801_v55 = vld [vmem:[#allocation2 + $0x28] sm:$0xff] }
 0x110   : > { %663 = vst [vmem:[#allocation2 + $0x31] sm:$0x1] %v661_v54  ;;  %896 = vmatmul.f32.gmra.mxu1 %v801_v55 }
 0x115   : > { %v710_v57 = vpop.permute.xlu1 %709 }
 0x116   : > { %v686_v58 = vpop.permute.xlu0 %685  ;;  %v713_v60 = vsel %vm337_vm0, %v710_v57, %v712_v51  ;;  %v738_v6 = vpop.permute.xlu2 %737 }
 0x117   : > { %v687_v59 = vsel %vm337_vm0, %v684_v38, %v686_v58  ;;  %715 = vst [vmem:[#allocation2 + $0x35] sm:$0x1] %v713_v60 }
 0x118   : > { %689 = vst [vmem:[#allocation2 + $0x33] sm:$0x1] %v687_v59 }
 0x11d   : > { %v725_v1 = vpop.permute.xlu1 %724 }
 0x11e   : > { %v723_v2 = vpop.permute.xlu0 %722  ;;  %v751_v17 = vpop.permute.xlu2 %750 }
 0x11f   : > { %v726_v3 = vsel %vm337_vm0, %v723_v2, %v725_v1 }
 0x120   : > { %728 = vst [vmem:[#allocation2 + $0x36] sm:$0x1] %v726_v3 }
 0x125   : > { %v673_v7 = vpop.permute.xlu1 %672  ;;  %v859_v23 = vpop.f32.mrf.mxu0 }
 0x126   : > { %v649_v8 = vpop.permute.xlu0 %648  ;;  %v676_v10 = vsel %vm337_vm0, %v673_v7, %v675_v0  ;;  %v764_v24 = vpop.permute.xlu2 %763  ;;  %v860_v25 = vadd.f32 %v2121_v22, %v859_v23 }
 0x127   : > { %v650_v9 = vsel %vm337_vm0, %v647_v56, %v649_v8  ;;  %v802_v11 = vld [vmem:[#allocation2 + $0x30] sm:$0xff]  ;;  %678 = vst [vmem:[#allocation2 + $0x3a] sm:$0x1] %v676_v10 }
 0x128   : > { %652 = vst [vmem:[#allocation2 + $0x38] sm:$0x1] %v650_v9  ;;  %867 = vmatmul.f32.gmra.mxu0 %v802_v11 }
 0x12d   : > { %v701_v14 = vpop.permute.xlu1 %700 }
 0x12e   : > { %v699_v15 = vpop.permute.xlu0 %698  ;;  %v792_v33 = vpop.permute.xlu2 %791 }
 0x12f   : > { %v702_v16 = vsel %vm337_vm0, %v699_v15, %v701_v14 }
 0x130   : > { %704 = vst [vmem:[#allocation2 + $0x3c] sm:$0x1] %v702_v16 }
 0x135   : > { %v749_v18 = vpop.permute.xlu1 %748 }
 0x136   : > { %v740_v19 = vpop.permute.xlu0 %739  ;;  %v752_v21 = vsel %vm337_vm0, %v749_v18, %v751_v17 }
 0x137   : > { %v741_v20 = vsel %vm337_vm0, %v738_v6, %v740_v19  ;;  %754 = vst [vmem:[#allocation2 + $0x40] sm:$0x1] %v752_v21 }
 0x138   : > { %743 = vst [vmem:[#allocation2 + $0x3f] sm:$0x1] %v741_v20 }
 0x13d   : > { %v891_v26 = vpop.f32.mrf.mxu1  ;;  %v777_v28 = vpop.permute.xlu1 %776 }
 0x13e   : > { %v892_v27 = vadd.f32 %v891_v26, %v860_v25  ;;  %v775_v29 = vpop.permute.xlu0 %774 }
 0x13f   : > { %v778_v30 = vsel %vm337_vm0, %v775_v29, %v777_v28  ;;  %v803_v31 = vld [vmem:[#allocation2 + $0x38] sm:$0xff] }
 0x140   : > { %v906_v32 = vmax.f32 %v892_v27, 0.0  ;;  %780 = vst [vmem:[#allocation2 + $0x42] sm:$0x1] %v778_v30  ;;  %899 = vmatmul.f32.gmra.mxu1 %v803_v31 }
 0x142   : > { %912 = vst.msk [vmem:[#allocation3] sm:$0xff] %vm911_vm1, %v906_v32 }
 0x145   : > { %v790_v34 = vpop.permute.xlu1 %789 }
 0x146   : > { %v766_v35 = vpop.permute.xlu0 %765  ;;  %v793_v37 = vsel %vm337_vm0, %v790_v34, %v792_v33 }
 0x147   : > { %v767_v36 = vsel %vm337_vm0, %v764_v24, %v766_v35  ;;  %v804_v38 = vld [vmem:[#allocation2 + $0x40] sm:$0xf]  ;;  %795 = vst [vmem:[#allocation2 + $0x4b] sm:$0x1] %v793_v37 }
 0x148   : > { %769 = vst [vmem:[#allocation2 + $0x49] sm:$0x1] %v767_v36  ;;  %870 = vmatmul.f32.gmra.mxu0 %v804_v38 }
 0x149   : > { %v1022_v39 = vld [vmem:[#allocation3 + $0x4] sm:$0x1]  ;;  %v1016_v40 = vld [vmem:[#allocation3 + $0x3] sm:$0x1]  ;;  %v921_v41 = vld [vmem:[#allocation3 + $0x1] sm:$0x1] }
 0x14a   : > { %1024 = vrot.lane.b32.xlu1 %v1022_v39, %s2597_s25  ;;  %1018 = vrot.lane.b32.xlu2 %v1016_v40, %s1724_s21  ;;  %v1014_v42 = vld [vmem:[#allocation3 + $0x2] sm:$0x1]  ;;  %v918_v43 = vld [vmem:[#allocation3] sm:$0x1]  ;;  %v935_v45 = vld [vmem:[#allocation3 + $0x3] sm:$0x1] }
 0x14b   : > { %923 = vrot.lane.b32.xlu0 %v921_v41, %s1724_s21  ;;  %1015 = vst.msk [vmem:[#allocation4 + $0x1] sm:$0x1] %vm919_vm2, %v1014_v42  ;;  %v928_v46 = vld [vmem:[#allocation3 + $0x2] sm:$0x1]  ;;  %v1028_v47 = vld [vmem:[#allocation3 + $0x5] sm:$0x1] }
 0x14c   : > { %920 = vst.msk [vmem:[#allocation4] sm:$0x1] %vm919_vm2, %v918_v43  ;;  %v949_v48 = vld [vmem:[#allocation3 + $0x7] sm:$0x1]  ;;  %v942_v49 = vld [vmem:[#allocation3 + $0x6] sm:$0x1] }
 0x14d   : > { %v862_v50 = vpop.f32.mrf.mxu0 }
 0x14e   : > { %v863_v51 = vadd.f32 %v2121_v22, %v862_v50 }
 0x14f   : > { %v805_v44 = vld [vmem:[#allocation2 + $0x48] sm:$0xf] }
 0x150   : > { %902 = vmatmul.f32.gmra.mxu1 %v805_v44 }
 0x152   : > { %937 = vrot.lane.b32.xlu1 %v935_v45, %s1725_s22  ;;  %930 = vrot.lane.b32.xlu2 %v928_v46, %s2597_s25 }
 0x153   : > { %1030 = vrot.lane.b32.xlu0 %v1028_v47, %s1725_s22 }
 0x15a   : > { %951 = vrot.lane.b32.xlu2 %v949_v48, %s1726_s23 }
 0x15b   : > { %944 = vrot.lane.b32.xlu0 %v942_v49, %s1722_s26 }
 0x165   : > { %v894_v52 = vpop.f32.mrf.mxu1 }
 0x166   : > { %v895_v53 = vadd.f32 %v894_v52, %v863_v51 }
 0x168   : > { %v907_v54 = vmax.f32 %v895_v53, 0.0 }
 0x16a   : > { %913 = vst.msk [vmem:[#allocation3 + $0x8] sm:$0xff] %vm911_vm1, %v907_v54 }
 0x171   : > { %v972_v55 = vld [vmem:[#allocation3 + $0xd] sm:$0x1]  ;;  %v984_v56 = vld [vmem:[#allocation3 + $0xf] sm:$0x1]  ;;  %v970_v58 = vld [vmem:[#allocation3 + $0xc] sm:$0x1] }
 0x172   : > { %v1060_v57 = vld [vmem:[#allocation3 + $0xf] sm:$0x1]  ;;  %974 = vrot.lane.b32.xlu1 %v972_v55, %s1724_s21  ;;  %986 = vrot.lane.b32.xlu2 %v984_v56, %s1725_s22  ;;  %v1058_v59 = vld [vmem:[#allocation3 + $0xe] sm:$0x1]  ;;  %971 = vst.msk [vmem:[#allocation4 + $0x4] sm:$0x1] %vm919_vm2, %v970_v58 }
 0x173   : > { %1062 = vrot.lane.b32.xlu0 %v1060_v57, %s1724_s21  ;;  %v1102_v60 = vld [vmem:[#allocation3 + $0xc] sm:$0x1]  ;;  %v1190_v61 = vld [vmem:[#allocation3 + $0xe] sm:$0x1]  ;;  %1059 = vst.msk [vmem:[#allocation4 + $0x5] sm:$0x1] %vm919_vm2, %v1058_v59 }
 0x174   : > { %1103 = vst.msk [vmem:[#allocation4 + $0x2] sm:$0x1] %vm919_vm2, %v1102_v60  ;;  %v1104_v62 = vld [vmem:[#allocation3 + $0xd] sm:$0x1]  ;;  %v1116_v63 = vld [vmem:[#allocation3 + $0xf] sm:$0x1] }
 0x175   : > { %1191 = vst.msk [vmem:[#allocation4 + $0x3] sm:$0x1] %vm919_vm2, %v1190_v61  ;;  %v1192_v0 = vld [vmem:[#allocation3 + $0xf] sm:$0x1]  ;;  %v1040_v1 = vld [vmem:[#allocation3 + $0x9] sm:$0x1] }
 0x176   : > { %v1034_v2 = vld [vmem:[#allocation3 + $0x8] sm:$0x1]  ;;  %v978_v3 = vld [vmem:[#allocation3 + $0xe] sm:$0x1]  ;;  %v1046_v11 = vld [vmem:[#allocation3 + $0xa] sm:$0x1] }
 0x177   : > { %v956_v4 = vld [vmem:[#allocation3 + $0x8] sm:$0x1]  ;;  %v1110_v6 = vld [vmem:[#allocation3 + $0xe] sm:$0x1] }
 0x17a   : > { %1106 = vrot.lane.b32.xlu1 %v1104_v62, %s1724_s21  ;;  %1118 = vrot.lane.b32.xlu2 %v1116_v63, %s1725_s22 }
 0x17b   : > { %1194 = vrot.lane.b32.xlu0 %v1192_v0, %s1724_s21 }
 0x17d   : > { %v865_v5 = vpop.f32.mrf.mxu0 }
 0x17e   : > { %v866_v7 = vadd.f32 %v2121_v22, %v865_v5  ;;  %v1052_v5 = vld [vmem:[#allocation3 + $0xb] sm:$0x1] }
 0x182   : > { %1042 = vrot.lane.b32.xlu1 %v1040_v1, %s1726_s23  ;;  %1036 = vrot.lane.b32.xlu2 %v1034_v2, %s1722_s26  ;;  %v963_v1 = vld [vmem:[#allocation3 + $0x9] sm:$0x1] }
 0x183   : > { %980 = vrot.lane.b32.xlu0 %v978_v3, %s2597_s25 }
 0x18a   : > { %958 = vrot.lane.b32.xlu1 %v956_v4, %s1727_s24 }
 0x18b   : > { %1112 = vrot.lane.b32.xlu0 %v1110_v6, %s2597_s25 }
 0x18d   : > { %v897_v8 = vpop.f32.mrf.mxu1 }
 0x18e   : > { %v898_v9 = vadd.f32 %v897_v8, %v866_v7 }
 0x190   : > { %v908_v10 = vmax.f32 %v898_v9, 0.0 }
 0x192   : > { %914 = vst.msk [vmem:[#allocation3 + $0x10] sm:$0xff] %vm911_vm1, %v908_v10 }
 0x193   : > { %1048 = vrot.lane.b32.xlu0 %v1046_v11, %s1727_s24 }
 0x199   : > { %v1072_v12 = vld [vmem:[#allocation3 + $0x11] sm:$0x1]  ;;  %v1066_v13 = vld [vmem:[#allocation3 + $0x10] sm:$0x1]  ;;  %v1078_v14 = vld [vmem:[#allocation3 + $0x14] sm:$0x1] }
 0x19a   : > { %1074 = vrot.lane.b32.xlu1 %v1072_v12, %s1725_s22  ;;  %1068 = vrot.lane.b32.xlu2 %v1066_v13, %s2597_s25  ;;  %v1204_v15 = vld [vmem:[#allocation3 + $0x11] sm:$0x1]  ;;  %v1198_v16 = vld [vmem:[#allocation3 + $0x10] sm:$0x1]  ;;  %v1210_v17 = vld [vmem:[#allocation3 + $0x14] sm:$0x1] }
 0x19b   : > { %1080 = vrot.lane.b32.xlu0 %v1078_v14, %s1722_s26  ;;  %v990_v19 = vld [vmem:[#allocation3 + $0x12] sm:$0x1]  ;;  %v1084_v20 = vld [vmem:[#allocation3 + $0x15] sm:$0x1]  ;;  %v996_v21 = vld [vmem:[#allocation3 + $0x13] sm:$0x1] }
 0x19c   : > { %v1122_v23 = vld [vmem:[#allocation3 + $0x12] sm:$0x1]  ;;  %v1216_v24 = vld [vmem:[#allocation3 + $0x15] sm:$0x1]  ;;  %v1128_v25 = vld [vmem:[#allocation3 + $0x13] sm:$0x1] }
 0x19d   : > { %v1090_v28 = vld [vmem:[#allocation3 + $0x16] sm:$0x1]  ;;  %v1002_v29 = vld [vmem:[#allocation3 + $0x14] sm:$0x1]  ;;  %v1008_v4 = vld [vmem:[#allocation3 + $0x15] sm:$0x1] }
 0x19e   : > { %v1134_v59 = vld [vmem:[#allocation3 + $0x14] sm:$0x1]  ;;  %v1222_v63 = vld [vmem:[#allocation3 + $0x16] sm:$0x1]  ;;  %v1096_v6 = vld [vmem:[#allocation3 + $0x17] sm:$0x1] }
 0x19f   : > { %v1140_v10 = vld [vmem:[#allocation3 + $0x15] sm:$0x1]  ;;  %v1228_v12 = vld [vmem:[#allocation3 + $0x17] sm:$0x1] }
 0x1a2   : > { %1206 = vrot.lane.b32.xlu1 %v1204_v15, %s1725_s22  ;;  %1200 = vrot.lane.b32.xlu2 %v1198_v16, %s2597_s25 }
 0x1a3   : > { %1212 = vrot.lane.b32.xlu0 %v1210_v17, %s1722_s26 }
 0x1a4   : > { %v1019_v18 = vpop.permute.xlu2 %1018 }
 0x1a5   : > { %1021 = vst.msk [vmem:[#allocation4 + $0x1] sm:$0x1] %vm926_vm3, %v1019_v18  ;;  %v868_v26 = vpop.f32.mrf.mxu0 }
 0x1a6   : > { %v869_v30 = vadd.f32 %v2121_v22, %v868_v26 }
 0x1aa   : > { %992 = vrot.lane.b32.xlu1 %v990_v19, %s1722_s26  ;;  %1086 = vrot.lane.b32.xlu2 %v1084_v20, %s1726_s23 }
 0x1ab   : > { %998 = vrot.lane.b32.xlu0 %v996_v21, %s1726_s23 }
 0x1ac   : > { %v931_v27 = vpop.permute.xlu2 %930 }
 0x1b2   : > { %1124 = vrot.lane.b32.xlu1 %v1122_v23, %s1722_s26  ;;  %1218 = vrot.lane.b32.xlu2 %v1216_v24, %s1726_s23 }
 0x1b3   : > { %1130 = vrot.lane.b32.xlu0 %v1128_v25, %s1726_s23 }
 0x1b4   : > { %v952_v36 = vpop.permute.xlu2 %951 }
 0x1ba   : > { %1092 = vrot.lane.b32.xlu1 %v1090_v28, %s1727_s24  ;;  %1004 = vrot.lane.b32.xlu2 %v1002_v29, %s1727_s24 }
 0x1bc   : > { %v1025_v31 = vpop.permute.xlu1 %1024 }
 0x1bd   : > { %1027 = vst.msk [vmem:[#allocation4 + $0x1] sm:$0x1] %vm933_vm4, %v1025_v31  ;;  %v924_v32 = vpop.permute.xlu0 %923  ;;  %v900_v33 = vpop.f32.mrf.mxu1 }
 0x1be   : > { %927 = vst.msk [vmem:[#allocation4] sm:$0x1] %vm926_vm3, %v924_v32  ;;  %v901_v34 = vadd.f32 %v900_v33, %v869_v30 }
 0x1bf   : > { %934 = vst.msk [vmem:[#allocation4] sm:$0x1] %vm933_vm4, %v931_v27 }
 0x1c0   : > { %v909_v35 = vmax.f32 %v901_v34, 0.0 }
 0x1c2   : > { %915 = vst.msk [vmem:[#allocation3 + $0x18] sm:$0xff] %vm911_vm1, %v909_v35 }
 0x1c4   : > { %v938_v37 = vpop.permute.xlu1 %937 }
 0x1c5   : > { %941 = vst.msk [vmem:[#allocation4] sm:$0x1] %vm940_vm5, %v938_v37  ;;  %v1031_v38 = vpop.permute.xlu0 %1030  ;;  %v871_v42 = vpop.f32.mrf.mxu0 }
 0x1c6   : > { %1033 = vst.msk [vmem:[#allocation4 + $0x1] sm:$0x1] %vm940_vm5, %v1031_v38  ;;  %v872_v46 = vadd.f32 %v2121_v22, %v871_v42  ;;  %v1293_v42 = vld [vmem:[%s2590_s3 + $0x70] sm:$0xff] }
 0x1c9   : > { %v1236_v39 = vld [vmem:[#allocation3 + $0x1b] sm:$0x1]  ;;  %v1148_v40 = vld [vmem:[#allocation3 + $0x19] sm:$0x1]  ;;  %v1242_v41 = vld [vmem:[#allocation3 + $0x1c] sm:$0x1] }
 0x1ca   : > { %1238 = vrot.lane.b32.xlu1 %v1236_v39, %s1724_s21  ;;  %1150 = vrot.lane.b32.xlu2 %v1148_v40, %s1724_s21  ;;  %v1146_v43 = vld [vmem:[#allocation3 + $0x18] sm:$0x1]  ;;  %v1234_v45 = vld [vmem:[#allocation3 + $0x1a] sm:$0x1]  ;;  %v1248_v52 = vld [vmem:[#allocation3 + $0x1d] sm:$0x1] }
 0x1cb   : > { %1244 = vrot.lane.b32.xlu0 %v1242_v41, %s2597_s25  ;;  %1147 = vst.msk [vmem:[#allocation4 + $0x6] sm:$0x1] %vm919_vm2, %v1146_v43  ;;  %v1154_v51 = vld [vmem:[#allocation3 + $0x1a] sm:$0x1]  ;;  %v1160_v53 = vld [vmem:[#allocation3 + $0x1b] sm:$0x1] }
 0x1cc   : > { %v987_v44 = vpop.permute.xlu2 %986  ;;  %1235 = vst.msk [vmem:[#allocation4 + $0x7] sm:$0x1] %vm919_vm2, %v1234_v45  ;;  %v1172_v54 = vld [vmem:[#allocation3 + $0x1f] sm:$0x1]  ;;  %v1166_v55 = vld [vmem:[#allocation3 + $0x1e] sm:$0x1] }
 0x1cd   : > { %v945_v47 = vpop.permute.xlu0 %944  ;;  %v903_v48 = vpop.f32.mrf.mxu1  ;;  %v1294_v40 = vld [vmem:[%s2590_s3 + $0x78] sm:$0xff]  ;;  %v1309_v43 = vld [vmem:[%s2590_s3 + $0xf0] sm:$0xff]  ;;  %v1308_v45 = vld [vmem:[%s2590_s3 + $0xe8] sm:$0xff]  ;;  %s321_s21 = sand.u32 1, %s1712_s10  }
 0x1ce   : > { %948 = vst.msk [vmem:[#allocation4] sm:$0x1] %vm947_vm6, %v945_v47  ;;  %v904_v49 = vadd.f32 %v903_v48, %v872_v46  ;;  %v1310_v41 = vld [vmem:[%s2590_s3 + $0xf8] sm:$0xff]  ;;  %1321 = vmatpush.msra.mxu2 %v1294_v40  ;;  %v1291_v46 = vld [vmem:[%s2590_s3 + $0x60] sm:$0xff]  ;;  %s322_s29 = scalar_lea.vmem [#allocation6], %s321_s21  ;;  %s1536_s16 = scalar_lea.sflag [#allocation7], %s321_s21 }
 0x1cf   : > { %955 = vst.msk [vmem:[#allocation4] sm:$0x1] %vm954_vm7, %v952_v36  ;;  %1341 = vmatpush.msra.mxu3 %v1310_v41  ;;  %v1307_v47 = vld [vmem:[%s2590_s3 + $0xe0] sm:$0xff]  ;;  %v1402_v41 = vld [vmem:[%s2592_s5 + $0xa8] sm:$0xff]  ;;  %s1546_s14 = sshll.u32 %s322_s29, 4  ;;  %s1547_s14 = int_to_ptr.vmem [resolvable:$true] %s1546_s14 }
 0x1d0   : > { %v910_v50 = vmax.f32 %v904_v49, 0.0  ;;  %1322 = vmatpush.msra.mxu2 %v1293_v42  ;;  %v1401_v40 = vld [vmem:[%s2592_s5 + $0xa0] sm:$0xff]  ;;  %v1399_v42 = vld [vmem:[%s2592_s5 + $0x90] sm:$0xff] }
 0x1d1   : > { %1342 = vmatpush.msra.mxu3 %v1309_v43  ;;  %v1400_v43 = vld [vmem:[%s2592_s5 + $0x98] sm:$0xff] }
 0x1d2   : > { %1156 = vrot.lane.b32.xlu1 %v1154_v51, %s2597_s25  ;;  %1250 = vrot.lane.b32.xlu2 %v1248_v52, %s1725_s22  ;;  %917 = vst.msk [vmem:[#allocation3 + $0x20] sm:$0xf] %vm916_vm8, %v910_v50  ;;  %v1290_v51 = vld [vmem:[%s2590_s3 + $0x58] sm:$0xff]  ;;  %s2600_s25 = smov 32  }
 0x1d3   : > { %1162 = vrot.lane.b32.xlu0 %v1160_v53, %s1725_s22  ;;  %1343 = vmatpush.msra.mxu3 %v1308_v45  ;;  %v1306_v52 = vld [vmem:[%s2590_s3 + $0xd8] sm:$0xff]  ;;  %v1289_v53 = vld [vmem:[%s2590_s3 + $0x50] sm:$0xff]  ;;  %v1398_v45 = vld [vmem:[%s2592_s5 + $0x88] sm:$0xff]  ;;  %s1678_s22 = scalar_lea.hbm %s2596_s9, 2 }
 0x1d4   : > { %v1119_v22 = vpop.permute.xlu2 %1118 }
 0x1d5   : > { %1344 = vmatpush.msra.mxu3 %v1307_v47  ;;  %v1396_v47 = vld [vmem:[%s2592_s5 + $0x78] sm:$0xff] }
 0x1d7   : > { %1345 = vmatpush.msra.mxu3 %v1306_v52  ;;  %v1389_v52 = vld [vmem:[%s2592_s5 + $0x40] sm:$0xff] }
 0x1d9   : > { %v1260_v56 = vld [vmem:[#allocation3 + $0x21] sm:$0x1]  ;;  %v1254_v58 = vld [vmem:[#allocation3 + $0x20] sm:$0x1]  ;;  %v1266_v0 = vld [vmem:[#allocation3 + $0x22] sm:$0x1] }
 0x1da   : > { %1174 = vrot.lane.b32.xlu1 %v1172_v54, %s1726_s23  ;;  %1168 = vrot.lane.b32.xlu2 %v1166_v55, %s1722_s26  ;;  %v1178_v60 = vld [vmem:[#allocation3 + $0x20] sm:$0x1]  ;;  %v1184_v11 = vld [vmem:[#allocation3 + $0x21] sm:$0x1]  ;;  %v1272_v16 = vld [vmem:[#allocation3 + $0x23] sm:$0x1] }
 0x1db   : > { %1262 = vrot.lane.b32.xlu0 %v1260_v56, %s1726_s23  ;;  %v1288_v54 = vld [vmem:[%s2590_s3 + $0x48] sm:$0xff]  ;;  %v1287_v56 = vld [vmem:[%s2590_s3 + $0x40] sm:$0xff]  ;;  %s1544_s23 = scalar_lea.hbm %s2596_s9, %s1800_s13 }
 0x1dc   : > { %v1037_v57 = vpop.permute.xlu2 %1036  ;;  %v1304_v55 = vld [vmem:[%s2590_s3 + $0xc8] sm:$0xff] }
 0x1dd   : > { %1039 = vst.msk [vmem:[#allocation4 + $0x1] sm:$0x1] %vm947_vm6, %v1037_v57  ;;  %v1303_v57 = vld [vmem:[%s2590_s3 + $0xc0] sm:$0xff] }
 0x1e2   : > { %1256 = vrot.lane.b32.xlu1 %v1254_v58, %s1722_s26  ;;  %1136 = vrot.lane.b32.xlu2 %v1134_v59, %s1727_s24 }
 0x1e3   : > { %1180 = vrot.lane.b32.xlu0 %v1178_v60, %s1727_s24  ;;  %v1286_v60 = vld [vmem:[%s2590_s3 + $0x38] sm:$0xff] }
 0x1e4   : > { %v975_v61 = vpop.permute.xlu1 %974 }
 0x1e5   : > { %977 = vst.msk [vmem:[#allocation4 + $0x4] sm:$0x1] %vm926_vm3, %v975_v61  ;;  %v1063_v62 = vpop.permute.xlu0 %1062  ;;  %v1302_v61 = vld [vmem:[%s2590_s3 + $0xb8] sm:$0xff] }
 0x1e6   : > { %1065 = vst.msk [vmem:[#allocation4 + $0x5] sm:$0x1] %vm926_vm3, %v1063_v62 }
 0x1ea   : > { %1224 = vrot.lane.b32.xlu1 %v1222_v63, %s1727_s24  ;;  %1268 = vrot.lane.b32.xlu2 %v1266_v0, %s1727_s24  ;;  %v1285_v63 = vld [vmem:[%s2590_s3 + $0x30] sm:$0xff] }
 0x1eb   : > { %965 = vrot.lane.b32.xlu0 %v963_v1, %s1728_s27  ;;  %v1301_v0 = vld [vmem:[%s2590_s3 + $0xb0] sm:$0xff]  ;;  %v1284_v1 = vld [vmem:[%s2590_s3 + $0x28] sm:$0xff] }
 0x1ec   : > { %v1107_v2 = vpop.permute.xlu1 %1106 }
 0x1ed   : > { %1109 = vst.msk [vmem:[#allocation4 + $0x2] sm:$0x1] %vm926_vm3, %v1107_v2  ;;  %v1195_v3 = vpop.permute.xlu0 %1194  ;;  %v1300_v2 = vld [vmem:[%s2590_s3 + $0xa8] sm:$0xff] }
 0x1ee   : > { %1197 = vst.msk [vmem:[#allocation4 + $0x3] sm:$0x1] %vm926_vm3, %v1195_v3  ;;  %v1283_v3 = vld [vmem:[%s2590_s3 + $0x20] sm:$0xff] }
 0x1f2   : > { %1010 = vrot.lane.b32.xlu1 %v1008_v4, %s1728_s27  ;;  %1054 = vrot.lane.b32.xlu2 %v1052_v5, %s1728_s27  ;;  %v1299_v4 = vld [vmem:[%s2590_s3 + $0xa0] sm:$0xff] }
 0x1f3   : > { %1098 = vrot.lane.b32.xlu0 %v1096_v6, %s1728_s27  ;;  %v1282_v6 = vld [vmem:[%s2590_s3 + $0x18] sm:$0xff] }
 0x1f4   : > { %v1043_v7 = vpop.permute.xlu1 %1042  ;;  %v1069_v8 = vpop.permute.xlu2 %1068 }
 0x1f5   : > { %1045 = vst.msk [vmem:[#allocation4 + $0x1] sm:$0x1] %vm954_vm7, %v1043_v7  ;;  %v981_v9 = vpop.permute.xlu0 %980  ;;  %v1298_v7 = vld [vmem:[%s2590_s3 + $0x98] sm:$0xff] }
 0x1f6   : > { %1071 = vst.msk [vmem:[#allocation4 + $0x5] sm:$0x1] %vm933_vm4, %v1069_v8 }
 0x1f7   : > { %983 = vst.msk [vmem:[#allocation4 + $0x4] sm:$0x1] %vm933_vm4, %v981_v9  ;;  %v1281_v9 = vld [vmem:[%s2590_s3 + $0x10] sm:$0xff] }
 0x1f8   : > { %989 = vst.msk [vmem:[#allocation4 + $0x4] sm:$0x1] %vm940_vm5, %v987_v44  ;;  %v1292_v44 = vld [vmem:[%s2590_s3 + $0x68] sm:$0xff] }
 0x1f9   : > { %1323 = vmatpush.msra.mxu2 %v1292_v44  ;;  %v1397_v44 = vld [vmem:[%s2592_s5 + $0x80] sm:$0xff] }
 0x1fa   : > { %1142 = vrot.lane.b32.xlu1 %v1140_v10, %s1728_s27  ;;  %1186 = vrot.lane.b32.xlu2 %v1184_v11, %s1728_s27  ;;  %v1297_v10 = vld [vmem:[%s2590_s3 + $0x90] sm:$0xff]  ;;  %v1280_v11 = vld [vmem:[%s2590_s3 + $0x8] sm:$0xff] }
 0x1fb   : > { %1230 = vrot.lane.b32.xlu0 %v1228_v12, %s1728_s27  ;;  %1324 = vmatpush.msra.mxu2 %v1291_v46  ;;  %v1296_v12 = vld [vmem:[%s2590_s3 + $0x88] sm:$0xff]  ;;  %v1395_v46 = vld [vmem:[%s2592_s5 + $0x70] sm:$0xff] }
 0x1fc   : > { %v959_v13 = vpop.permute.xlu1 %958  ;;  %v1201_v14 = vpop.permute.xlu2 %1200 }
 0x1fd   : > { %962 = vst.msk [vmem:[#allocation4] sm:$0x1] %vm961_vm9, %v959_v13  ;;  %v1113_v15 = vpop.permute.xlu0 %1112  ;;  %1325 = vmatpush.msra.mxu2 %v1290_v51  ;;  %v1279_v13 = vld [vmem:[%s2590_s3] sm:$0xff]  ;;  %v1392_v51 = vld [vmem:[%s2592_s5 + $0x58] sm:$0xff] }
 0x1fe   : > { %1203 = vst.msk [vmem:[#allocation4 + $0x3] sm:$0x1] %vm933_vm4, %v1201_v14  ;;  %v1295_v14 = vld [vmem:[%s2590_s3 + $0x80] sm:$0xff] }
 0x1ff   : > { %1115 = vst.msk [vmem:[#allocation4 + $0x2] sm:$0x1] %vm933_vm4, %v1113_v15  ;;  %1326 = vmatpush.msra.mxu2 %v1289_v53  ;;  %v1390_v53 = vld [vmem:[%s2592_s5 + $0x48] sm:$0xff] }
 0x200   : > { %1121 = vst.msk [vmem:[#allocation4 + $0x2] sm:$0x1] %vm940_vm5, %v1119_v22  ;;  %v1305_v22 = vld [vmem:[%s2590_s3 + $0xd0] sm:$0xff] }
 0x201   : > { %1346 = vmatpush.msra.mxu3 %v1305_v22  ;;  %1327 = vmatpush.msra.mxu2 %v1288_v54  ;;  %v1387_v22 = vld [vmem:[%s2592_s5 + $0x30] sm:$0xff]  ;;  %v1388_v54 = vld [vmem:[%s2592_s5 + $0x38] sm:$0xff] }
 0x202   : > { %1274 = vrot.lane.b32.xlu1 %v1272_v16, %s1728_s27 }
 0x203   : > { %1347 = vmatpush.msra.mxu3 %v1304_v55  ;;  %1328 = vmatpush.msra.mxu2 %v1287_v56  ;;  %v1385_v55 = vld [vmem:[%s2592_s5 + $0x20] sm:$0xff]  ;;  %v1386_v56 = vld [vmem:[%s2592_s5 + $0x28] sm:$0xff] }
 0x204   : > { %v1087_v18 = vpop.permute.xlu2 %1086 }
 0x205   : > { %v1049_v17 = vpop.permute.xlu0 %1048  ;;  %1348 = vmatpush.msra.mxu3 %v1303_v57  ;;  %1329 = vmatpush.msra.mxu2 %v1286_v60  ;;  %v1383_v57 = vld [vmem:[%s2592_s5 + $0x10] sm:$0xff]  ;;  %v1382_v60 = vld [vmem:[%s2592_s5 + $0x8] sm:$0xff] }
 0x206   : > { %1051 = vst.msk [vmem:[#allocation4 + $0x1] sm:$0x1] %vm961_vm9, %v1049_v17 }
 0x207   : > { %1349 = vmatpush.msra.mxu3 %v1302_v61  ;;  %1330 = vmatpush.msra.mxu2 %v1285_v63  ;;  %v1492_v63 = vld [vmem:[%s2594_s7 + $0xf8] sm:$0xff] }
 0x208   : > { %1514 = vmatpush.msrb.mxu1 %v1492_v63 }
 0x209   : > { %1350 = vmatpush.msra.mxu3 %v1301_v0  ;;  %1331 = vmatpush.msra.mxu2 %v1284_v1  ;;  %v1475_v0 = vld [vmem:[%s2594_s7 + $0x70] sm:$0xff] }
 0x20a   : > { %v1491_v1 = vld [vmem:[%s2594_s7 + $0xf0] sm:$0xff] }
 0x20b   : > { %1351 = vmatpush.msra.mxu3 %v1300_v2  ;;  %1332 = vmatpush.msra.mxu2 %v1283_v3  ;;  %v1474_v2 = vld [vmem:[%s2594_s7 + $0x68] sm:$0xff] }
 0x20c   : > { %v1075_v19 = vpop.permute.xlu1 %1074  ;;  %v1219_v21 = vpop.permute.xlu2 %1218  ;;  %v1490_v3 = vld [vmem:[%s2594_s7 + $0xe8] sm:$0xff]  ;;  %1515 = vmatpush.msrb.mxu1 %v1491_v1 }
 0x20d   : > { %1077 = vst.msk [vmem:[#allocation4 + $0x5] sm:$0x1] %vm940_vm5, %v1075_v19  ;;  %v1081_v20 = vpop.permute.xlu0 %1080  ;;  %1352 = vmatpush.msra.mxu3 %v1299_v4  ;;  %1333 = vmatpush.msra.mxu2 %v1282_v6  ;;  %v1473_v4 = vld [vmem:[%s2594_s7 + $0x60] sm:$0xff]  ;;  %v1472_v6 = vld [vmem:[%s2594_s7 + $0x58] sm:$0xff] }
 0x20e   : > { %1083 = vst.msk [vmem:[#allocation4 + $0x5] sm:$0x1] %vm947_vm6, %v1081_v20  ;;  %1516 = vmatpush.msrb.mxu1 %v1490_v3 }
 0x20f   : > { %1089 = vst.msk [vmem:[#allocation4 + $0x5] sm:$0x1] %vm954_vm7, %v1087_v18  ;;  %1353 = vmatpush.msra.mxu3 %v1298_v7  ;;  %1334 = vmatpush.msra.mxu2 %v1281_v9  ;;  %v1488_v7 = vld [vmem:[%s2594_s7 + $0xd8] sm:$0xff]  ;;  %v1487_v9 = vld [vmem:[%s2594_s7 + $0xd0] sm:$0xff] }
 0x211   : > { %1354 = vmatpush.msra.mxu3 %v1297_v10  ;;  %1335 = vmatpush.msra.mxu2 %v1280_v11  ;;  %v1470_v10 = vld [vmem:[%s2594_s7 + $0x48] sm:$0xff] }
 0x212   : > { %v1486_v11 = vld [vmem:[%s2594_s7 + $0xc8] sm:$0xff] }
 0x213   : > { %1355 = vmatpush.msra.mxu3 %v1296_v12  ;;  %1336 = vmatpush.msra.mxu2 %v1279_v13  ;;  %v1469_v12 = vld [vmem:[%s2594_s7 + $0x40] sm:$0xff] }
 0x214   : > { %v1207_v23 = vpop.permute.xlu1 %1206  ;;  %v1005_v25 = vpop.permute.xlu2 %1004  ;;  %v1485_v13 = vld [vmem:[%s2594_s7 + $0xc0] sm:$0xff] }
 0x215   : > { %1209 = vst.msk [vmem:[#allocation4 + $0x3] sm:$0x1] %vm940_vm5, %v1207_v23  ;;  %v1213_v24 = vpop.permute.xlu0 %1212  ;;  %1356 = vmatpush.msra.mxu3 %v1295_v14  ;;  %v1468_v14 = vld [vmem:[%s2594_s7 + $0x38] sm:$0xff] }
 0x216   : > { %1215 = vst.msk [vmem:[#allocation4 + $0x3] sm:$0x1] %vm947_vm6, %v1213_v24  ;;  %v1657_v24 = vld [vmem:[%s2591_s4] ss:$0 sm:$0xff] }
 0x217   : > { %1221 = vst.msk [vmem:[#allocation4 + $0x3] sm:$0x1] %vm954_vm7, %v1219_v21 }
 0x21c   : > { %v993_v26 = vpop.permute.xlu1 %992 }
 0x21d   : > { %995 = vst.msk [vmem:[#allocation4 + $0x4] sm:$0x1] %vm947_vm6, %v993_v26  ;;  %v999_v27 = vpop.permute.xlu0 %998 }
 0x21e   : > { %1001 = vst.msk [vmem:[#allocation4 + $0x4] sm:$0x1] %vm954_vm7, %v999_v27 }
 0x21f   : > { %1007 = vst.msk [vmem:[#allocation4 + $0x4] sm:$0x1] %vm961_vm9, %v1005_v25 }
 0x224   : > { %v1151_v28 = vpop.permute.xlu2 %1150  ;;  %v1125_v29 = vpop.permute.xlu1 %1124 }
 0x225   : > { %1153 = vst.msk [vmem:[#allocation4 + $0x6] sm:$0x1] %vm926_vm3, %v1151_v28  ;;  %v1131_v30 = vpop.permute.xlu0 %1130 }
 0x226   : > { %1127 = vst.msk [vmem:[#allocation4 + $0x2] sm:$0x1] %vm947_vm6, %v1125_v29 }
 0x227   : > { %1133 = vst.msk [vmem:[#allocation4 + $0x2] sm:$0x1] %vm954_vm7, %v1131_v30  ;;  %v1411_v30 = vld [vmem:[%s2592_s5 + $0xf0] sm:$0xff] }
 0x228   : > { %1419 = vmatpush.msrb.mxu2 %v1411_v30  ;;  %v1479_v30 = vld [vmem:[%s2594_s7 + $0x90] sm:$0xff] }
 0x22c   : > { %v1251_v31 = vpop.permute.xlu2 %1250  ;;  %v1093_v32 = vpop.permute.xlu1 %1092 }
 0x22d   : > { %1095 = vst.msk [vmem:[#allocation4 + $0x5] sm:$0x1] %vm961_vm9, %v1093_v32  ;;  %v1409_v32 = vld [vmem:[%s2592_s5 + $0xe0] sm:$0xff] }
 0x22e   : > { %1420 = vmatpush.msrb.mxu2 %v1409_v32  ;;  %v1461_v32 = vld [vmem:[%s2594_s7] sm:$0xff] }
 0x234   : > { %v1169_v33 = vpop.permute.xlu2 %1168 }
 0x23c   : > { %v1239_v34 = vpop.permute.xlu1 %1238  ;;  %v1137_v35 = vpop.permute.xlu2 %1136 }
 0x23d   : > { %1241 = vst.msk [vmem:[#allocation4 + $0x7] sm:$0x1] %vm926_vm3, %v1239_v34  ;;  %v1245_v36 = vpop.permute.xlu0 %1244  ;;  %v1407_v34 = vld [vmem:[%s2592_s5 + $0xd0] sm:$0xff] }
 0x23e   : > { %1139 = vst.msk [vmem:[#allocation4 + $0x2] sm:$0x1] %vm961_vm9, %v1137_v35  ;;  %v1408_v35 = vld [vmem:[%s2592_s5 + $0xd8] sm:$0xff]  ;;  %1421 = vmatpush.msrb.mxu2 %v1407_v34  ;;  %v1413_v34 = vld [vmem:[%s2593_s6] sm:$0x3] }
 0x23f   : > { %1247 = vst.msk [vmem:[#allocation4 + $0x7] sm:$0x1] %vm933_vm4, %v1245_v36  ;;  %v1405_v36 = vld [vmem:[%s2592_s5 + $0xc0] sm:$0xff] }
 0x240   : > { %1253 = vst.msk [vmem:[#allocation4 + $0x7] sm:$0x1] %vm940_vm5, %v1251_v31  ;;  %v1412_v31 = vld [vmem:[%s2592_s5 + $0xf8] sm:$0xff]  ;;  %1422 = vmatpush.msrb.mxu2 %v1405_v36  ;;  %v1416_v36 = vperm.slane %v1413_v34, 1 }
 0x241   : > { %1439 = vmatpush.msrb.mxu3 %v1412_v31  ;;  %v1478_v31 = vld [vmem:[%s2594_s7 + $0x88] sm:$0xff] }
 0x244   : > { %v1157_v37 = vpop.permute.xlu1 %1156  ;;  %v1269_v38 = vpop.permute.xlu2 %1268 }
 0x245   : > { %1159 = vst.msk [vmem:[#allocation4 + $0x6] sm:$0x1] %vm933_vm4, %v1157_v37  ;;  %v1163_v39 = vpop.permute.xlu0 %1162  ;;  %v1406_v37 = vld [vmem:[%s2592_s5 + $0xc8] sm:$0xff] }
 0x246   : > { %1165 = vst.msk [vmem:[#allocation4 + $0x6] sm:$0x1] %vm940_vm5, %v1163_v39  ;;  %v1404_v39 = vld [vmem:[%s2592_s5 + $0xb8] sm:$0xff] }
 0x247   : > { %1171 = vst.msk [vmem:[#allocation4 + $0x6] sm:$0x1] %vm947_vm6, %v1169_v33  ;;  %v1410_v33 = vld [vmem:[%s2592_s5 + $0xe8] sm:$0xff] }
 0x248   : > { %1440 = vmatpush.msrb.mxu3 %v1410_v33  ;;  %v1477_v33 = vld [vmem:[%s2594_s7 + $0x80] sm:$0xff] }
 0x24a   : > { %1441 = vmatpush.msrb.mxu3 %v1408_v35  ;;  %v1415_v35 = vperm.slane %v1413_v34, 0 }
 0x24c   : > { %v1175_v48 = vpop.permute.xlu1 %1174  ;;  %v1055_v49 = vpop.permute.xlu2 %1054  ;;  %1442 = vmatpush.msrb.mxu3 %v1406_v37 }
 0x24d   : > { %1177 = vst.msk [vmem:[#allocation4 + $0x6] sm:$0x1] %vm954_vm7, %v1175_v48  ;;  %v1263_v50 = vpop.permute.xlu0 %1262  ;;  %v1393_v48 = vld [vmem:[%s2592_s5 + $0x60] sm:$0xff] }
 0x24e   : > { %1057 = vst.msk [vmem:[#allocation4 + $0x1] sm:$0x1] %vm968_vm10, %v1055_v49  ;;  %1443 = vmatpush.msrb.mxu3 %v1404_v39  ;;  %v1394_v49 = vld [vmem:[%s2592_s5 + $0x68] sm:$0xff] }
 0x250   : > { %1444 = vmatpush.msrb.mxu3 %v1402_v41 }
 0x252   : > { %1445 = vmatpush.msrb.mxu3 %v1400_v43  ;;  %v1493_v43 = vld [vmem:[%s2595_s8] sm:$0x1] }
 0x254   : > { %v1257_v58 = vpop.permute.xlu1 %1256  ;;  %v1187_v62 = vpop.permute.xlu2 %1186  ;;  %1446 = vmatpush.msrb.mxu3 %v1398_v45 }
 0x255   : > { %1259 = vst.msk [vmem:[#allocation4 + $0x7] sm:$0x1] %vm947_vm6, %v1257_v58  ;;  %v1181_v59 = vpop.permute.xlu0 %1180  ;;  %v1384_v58 = vld [vmem:[%s2592_s5 + $0x18] sm:$0xff] }
 0x256   : > { %1265 = vst.msk [vmem:[#allocation4 + $0x7] sm:$0x1] %vm954_vm7, %v1263_v50  ;;  %1447 = vmatpush.msrb.mxu3 %v1396_v47  ;;  %v1391_v50 = vld [vmem:[%s2592_s5 + $0x50] sm:$0xff] }
 0x257   : > { %1271 = vst.msk [vmem:[#allocation4 + $0x7] sm:$0x1] %vm961_vm9, %v1269_v38  ;;  %v1403_v38 = vld [vmem:[%s2592_s5 + $0xb0] sm:$0xff] }
 0x258   : > { %1183 = vst.msk [vmem:[#allocation4 + $0x6] sm:$0x1] %vm961_vm9, %v1181_v59  ;;  %1423 = vmatpush.msrb.mxu2 %v1403_v38  ;;  %1448 = vmatpush.msrb.mxu3 %v1394_v49  ;;  %v1381_v59 = vld [vmem:[%s2592_s5] sm:$0xff] }
 0x259   : > { %1189 = vst.msk [vmem:[#allocation4 + $0x6] sm:$0x1] %vm968_vm10, %v1187_v62  ;;  %v1476_v62 = vld [vmem:[%s2594_s7 + $0x78] sm:$0xff] }
 0x25a   : > { %1424 = vmatpush.msrb.mxu2 %v1401_v40  ;;  %1449 = vmatpush.msrb.mxu3 %v1392_v51 }
 0x25b   : > { %1494 = vmatpush.msrb.mxu0 %v1476_v62 }
 0x25c   : > { %v1225_v5 = vpop.permute.xlu1 %1224  ;;  %1425 = vmatpush.msrb.mxu2 %v1399_v42  ;;  %1450 = vmatpush.msrb.mxu3 %v1390_v53 }
 0x25d   : > { %1227 = vst.msk [vmem:[#allocation4 + $0x3] sm:$0x1] %vm961_vm9, %v1225_v5  ;;  %v966_v8 = vpop.permute.xlu0 %965  ;;  %1495 = vmatpush.msrb.mxu0 %v1475_v0  ;;  %v1489_v5 = vld [vmem:[%s2594_s7 + $0xe0] sm:$0xff] }
 0x25e   : > { %969 = vst.msk [vmem:[#allocation4] sm:$0x1] %vm968_vm10, %v966_v8  ;;  %1426 = vmatpush.msrb.mxu2 %v1397_v44  ;;  %1451 = vmatpush.msrb.mxu3 %v1388_v54  ;;  %v1471_v8 = vld [vmem:[%s2594_s7 + $0x50] sm:$0xff] }
 0x25f   : > { %1496 = vmatpush.msrb.mxu0 %v1474_v2  ;;  %1517 = vmatpush.msrb.mxu1 %v1489_v5 }
 0x260   : > { %1427 = vmatpush.msrb.mxu2 %v1395_v46  ;;  %1452 = vmatpush.msrb.mxu3 %v1386_v56 }
 0x261   : > { %1497 = vmatpush.msrb.mxu0 %v1473_v4  ;;  %1518 = vmatpush.msrb.mxu1 %v1488_v7 }
 0x262   : > { %1428 = vmatpush.msrb.mxu2 %v1393_v48  ;;  %1453 = vmatpush.msrb.mxu3 %v1384_v58 }
 0x263   : > { %1498 = vmatpush.msrb.mxu0 %v1472_v6  ;;  %1519 = vmatpush.msrb.mxu1 %v1487_v9 }
 0x264   : > { %v1011_v15 = vpop.permute.xlu1 %1010  ;;  %1429 = vmatpush.msrb.mxu2 %v1391_v50  ;;  %1454 = vmatpush.msrb.mxu3 %v1382_v60 }
 0x265   : > { %1013 = vst.msk [vmem:[#allocation4 + $0x4] sm:$0x1] %vm968_vm10, %v1011_v15  ;;  %v1099_v16 = vpop.permute.xlu0 %1098  ;;  %1499 = vmatpush.msrb.mxu0 %v1471_v8  ;;  %1520 = vmatpush.msrb.mxu1 %v1486_v11  ;;  %v1484_v15 = vld [vmem:[%s2594_s7 + $0xb8] sm:$0xff] }
 0x266   : > { %1101 = vst.msk [vmem:[#allocation4 + $0x5] sm:$0x1] %vm968_vm10, %v1099_v16  ;;  %1430 = vmatpush.msrb.mxu2 %v1389_v52  ;;  %v1467_v16 = vld [vmem:[%s2594_s7 + $0x30] sm:$0xff] }
 0x267   : > { %1500 = vmatpush.msrb.mxu0 %v1470_v10  ;;  %1521 = vmatpush.msrb.mxu1 %v1485_v13 }
 0x268   : > { %1431 = vmatpush.msrb.mxu2 %v1387_v22 }
 0x269   : > { %1501 = vmatpush.msrb.mxu0 %v1469_v12  ;;  %1522 = vmatpush.msrb.mxu1 %v1484_v15 }
 0x26a   : > { %1432 = vmatpush.msrb.mxu2 %v1385_v55 }
 0x26b   : > { %1502 = vmatpush.msrb.mxu0 %v1468_v14 }
 0x26c   : > { %v1143_v17 = vpop.permute.xlu1 %1142  ;;  %1433 = vmatpush.msrb.mxu2 %v1383_v57 }
 0x26d   : > { %1145 = vst.msk [vmem:[#allocation4 + $0x2] sm:$0x1] %vm968_vm10, %v1143_v17  ;;  %v1231_v18 = vpop.permute.xlu0 %1230  ;;  %v1483_v17 = vld [vmem:[%s2594_s7 + $0xb0] sm:$0xff]  ;;  %1503 = vmatpush.msrb.mxu0 %v1467_v16 }
 0x26e   : > { %1233 = vst.msk [vmem:[#allocation4 + $0x3] sm:$0x1] %vm968_vm10, %v1231_v18  ;;  %1434 = vmatpush.msrb.mxu2 %v1381_v59  ;;  %v1466_v18 = vld [vmem:[%s2594_s7 + $0x28] sm:$0xff]  ;;  %1523 = vmatpush.msrb.mxu1 %v1483_v17 }
 0x26f   : > { %1504 = vmatpush.msrb.mxu0 %v1466_v18 }
 0x274   : > { %v1275_v19 = vpop.permute.xlu1 %1274 }
 0x275   : > { %1277 = vst.msk [vmem:[#allocation4 + $0x7] sm:$0x1] %vm968_vm10, %v1275_v19  ;;  %v1482_v19 = vld [vmem:[%s2594_s7 + $0xa8] sm:$0xff] }
 0x276   : > { %1524 = vmatpush.msrb.mxu1 %v1482_v19 }
 0x27c   : > { %v1278_v20 = vld [vmem:[#allocation4] sm:$0xff] }
 0x27d   : > { %1316 = vst [vmem:[#allocation1] ss:$2 sm:$0xff] %v1278_v20  ;;  %v1465_v20 = vld [vmem:[%s2594_s7 + $0x20] sm:$0xff] }
 0x27e   : > { %1505 = vmatpush.msrb.mxu0 %v1465_v20 }
 0x284   : > { %v1317_v21 = vld.sshfl [vmem:[#allocation1] sm:$0xff pattern:$0x75316420]  ;;  %v1318_v23 = vld.sshfl [vmem:[#allocation1 + $0x8] sm:$0xff pattern:$0x75316420] }
 0x285   : > { %1337 = vmatmul.f32.vlgmr.msra.gmra.mxu2 %v1317_v21  ;;  %1357 = vmatmul.f32.vlgmr.msra.gmra.mxu3 %v1318_v23  ;;  %v1481_v21 = vld [vmem:[%s2594_s7 + $0xa0] sm:$0xff] }
 0x286   : > { %1525 = vmatpush.msrb.mxu1 %v1481_v21 }
 0x308   : > { %v1338_v25 = vpop.f32.mrf.mxu2  ;;  %v1358_v27 = vpop.f32.mrf.mxu3 }
 0x309   : > { %v1339_v26 = vadd.f32 %v1657_v24, %v1338_v25  ;;  %v1464_v25 = vld [vmem:[%s2594_s7 + $0x18] sm:$0xff] }
 0x30a   : > { %1506 = vmatpush.msrb.mxu0 %v1464_v25 }
 0x30b   : > { %v1359_v28 = vadd.f32 %v1358_v27, %v1339_v26  ;;  %v1480_v26 = vld [vmem:[%s2594_s7 + $0x98] sm:$0xff]  ;;  %v1463_v27 = vld [vmem:[%s2594_s7 + $0x10] sm:$0xff] }
 0x30c   : > { %1526 = vmatpush.msrb.mxu1 %v1480_v26  ;;  %1507 = vmatpush.msrb.mxu0 %v1463_v27 }
 0x30d   : > { %v1361_v29 = vmax.f32 %v1359_v28, 0.0 }
 0x30e   : > { %1527 = vmatpush.msrb.mxu1 %v1479_v30 }
 0x30f   : > { %1375 = vrot.lane.b32.xlu1 %v1361_v29, %s1727_s24  ;;  %1370 = vrot.lane.b32.xlu0 %v1361_v29, %s1722_s26  ;;  %1363 = vst.msk [vmem:[#allocation5] sm:$0x1] %vm1362_vm11, %v1361_v29  ;;  %s1548_s24 = sshll.u32 %s1544_s23, 4  ;;  %s1549_s24 = int_to_ptr.hbm [resolvable:$true] %s1548_s24 }
 0x310   : > { %1365 = vrot.lane.b32.xlu2 %v1361_v29, %s2600_s25  ;;  %v1462_v29 = vld [vmem:[%s2594_s7 + $0x8] sm:$0xff]  ;;  %1528 = vmatpush.msrb.mxu1 %v1478_v31  ;;  %s1672_s26 = sshra.s32 %s1549_s24, 4  ;;  %s1673_s26 = int_to_ptr.hbm [resolvable:$true] %s1672_s26 }
 0x311   : > { %1508 = vmatpush.msrb.mxu0 %v1462_v29  ;;  %s1674_s17 = scalar_lea.hbm %s1673_s26, 1  ;;  %p1679_p0 = scmp.lt.s32.totalorder %s1673_s26, %s2596_s9 }
 0x312   : > { %1529 = vmatpush.msrb.mxu1 %v1477_v33  ;;  %p1675_p11 = scmp.ne.s32.totalorder %s1673_s26, %s1674_s17  ;;  %p1680_p1 = scmp.lt.s32.totalorder %s1678_s22, %s1674_s17 }
 0x313   : > { %1509 = vmatpush.msrb.mxu0 %v1461_v32 }
 0x314   : > { %p1676_p12 = pnand %p1675_p11, %p1817_p5  ;;  %p1681_p2 = por %p1680_p1, %p1679_p0 }
 0x316   : > { %p1677_p13 = pneg %p1676_p12 }
 0x318   : > { %p1682_p3 = pnand %p1681_p2, %p1677_p13 }
 0x36a   : > { %v1366_v61 = vpop.permute.xlu2 %1365 }
 0x36b   : > { %1369 = vst.msk [vmem:[#allocation5 - $0x1] sm:$0x2] %vm1368_vm12, %v1366_v61 }
 0x381   : > { %v1376_v23 = vpop.permute.xlu1 %1375  ;;  %v1371_v24 = vpop.permute.xlu0 %1370 }
 0x382   : > { %1374 = vst.msk [vmem:[#allocation5 - $0x2] sm:$0x4] %vm1373_vm13, %v1371_v24 }
 0x383   : > { %1379 = vst.msk [vmem:[#allocation5 - $0x3] sm:$0x8] %vm1378_vm14, %v1376_v23 }
 0x38a   : > { %v1380_v28 = vld [vmem:[#allocation5] sm:$0x1] }
 0x38b   : > { %1435 = vmatmul.f32.vlgmr.msrb.gmra.mxu2 %v1380_v28  ;;  %1455 = vmatmul.f32.vlgmr.msrb.gmra.mxu3 %v1380_v28 }
 0x40e   : > { %v1436_v37 = vpop.f32.mrf.mxu2  ;;  %v1456_v38 = vpop.f32.mrf.mxu3 }
 0x40f   : > { %v1437_v39 = vadd.f32 %v1436_v37, %v1415_v35  ;;  %v1457_v40 = vadd.f32 %v1456_v38, %v1416_v36 }
 0x411   : > { %v1459_v41 = vmax.f32 %v1437_v39, 0.0  ;;  %v1460_v42 = vmax.f32 %v1457_v40, 0.0 }
 0x413   : > { %1510 = vmatmul.f32.vlgmr.msrb.gmra.mxu0 %v1459_v41  ;;  %1530 = vmatmul.f32.vlgmr.msrb.gmra.mxu1 %v1460_v42 }
 0x490   : > { %v1511_v44 = vpop.f32.mrf.mxu0  ;;  %v1531_v46 = vpop.f32.mrf.mxu1 }
 0x491   : > { %v1512_v45 = vadd.f32 %v1511_v44, %v1493_v43 }
 0x493   : > { %v1532_v47 = vadd.f32 %v1531_v46, %v1512_v45 }
 0x495   : > { %1534 = vst [vmem:[%s322_s29] sm:$0x1] %v1532_v47 }
 0x496   : > { %1685 = shalt.err (!%p1682_p3)
}
 0x497   : > { %1610 = dma.vmem_to_hbm [thread:$0]  (%p1817_p5), %s1547_s14, 16, %s1549_s24, %s1536_s16  }
 0x498 PF: > { %p1616_p4 = scmp.ge.s32.totalorder %s1720_s12, 2  ;;  %s1560_s21 = sand.u32 1, %s1708_s30  }
 0x499   : > { %s1561_s28 = scalar_lea.sflag [#allocation7], %s1560_s21 }
 0x49a   : > { %p1613_p7 = pnand %p1616_p4, %p1821_p6 }
 0x49c   : > { %p1614_p8 = pneg %p1613_p7 }
 0x49e   : > { %1703 = dma.done.wait (%p1614_p8), %s1561_s28, 16  }
 0x49f   : > { %1705 = vsyncadd (%p1614_p8), %s1561_s28, 4294967280  ;;  %p19_p9 = scmp.ge.s32.totalorder %s1804_s15, 4   ;;  %s2601_s30 = smov %s1712_s10 }
 0x4a0   : > { %s2602_s10 = smov %s1716_s11  ;;  %s2603_s11 = smov %s1815_s18 }
 0x4a1   : > { %s2604_s12 = smov %s1804_s15  ;;  %21 = sbr.rel (!%p19_p9) target bundleno = 3 (0x3), region = 91 }
 0x4a6   :  { %1566 = vsyncpa [#allocation7], 1 }
 0x4a7   :  { %1568 = vsyncpa [#allocation7 + $0x1], 1 }

</bundles_post_ra>
